<compile_context>
chip_gen: v7x
topology: tpu7x:2x2x1
jax: 0.10.0
libtpu: 0.0.40
codegen_flags: <defaults>
</compile_context>

<pallas_src>
import jax
import jax.numpy as jnp
from jax.experimental import pallas as pl
from jax.experimental.pallas import tpu as pltpu

# ---- HypE hyper-parameters (small, consistent with the module) -------------
NUM_ENT = 256
NUM_REL = 8
D1 = 200                       # forced by .view(-1, 1, 10, 20)
IN_CH = 1                      # forced by bn0(e1) with e1 of shape (B, 1, 10, 20)
OUT_CH = 4
FH, FW = 3, 3
H_IN, W_IN = 10, 20
H_OUT, W_OUT = H_IN - FH + 1, W_IN - FW + 1      # 8, 18
R_DIM = IN_CH * OUT_CH * FH * FW                 # 36
FC_LEN = H_OUT * W_OUT * OUT_CH                  # 576
BN_EPS = 1e-5


# ---------------------------------------------------------------------------
# Fused kernel: bn0 -> grouped conv (per-sample filters) -> flatten ->
#               fc (+ folded bn1/bn2) -> relu -> score vs all entities ->
#               + bias -> sigmoid
# ---------------------------------------------------------------------------
def hype_kernel(x_ref, r_ref, bn0_ref, w_ref, bias_ref, et_ref, b_ref,
                out_ref, flat_ref):
    B = x_ref.shape[1]

    # bn0 (eval mode, folded to scale/shift scalars held in SMEM)
    img = x_ref[...] * bn0_ref[0] + bn0_ref[1]                # (H_IN, B, W_IN)

    # The 9 shifted image windows (shared by all out-channels / samples).
    win = [img[dy:dy + H_OUT, :, dx:dx + W_OUT]               # each (H_OUT, B, W_OUT)
           for dy in range(FH) for dx in range(FW)]

    rk = r_ref[...]                                           # (OUT_CH, FH*FW, B, 1)

    # Grouped conv (groups = batch), vectorised over the batch: each tap is a
    # (B,1)-column broadcast FMA on an (H_OUT, B, W_OUT) tile.  Results are
    # written channel-major into the flattened VMEM scratch, matching
    # torch's .contiguous().view(B, -1) order (f = oc*144 + h*18 + w).
    for oc in range(OUT_CH):
        acc = jnp.zeros((H_OUT, B, W_OUT), jnp.float32)
        for t in range(FH * FW):
            acc = acc + rk[oc, t] * win[t]
        base = oc * H_OUT * W_OUT
        for h in range(H_OUT):
            flat_ref[:, pl.ds(base + h * W_OUT, W_OUT)] = acc[h]   # (B, W_OUT)

    # fc with bn1 (per-out-channel) and bn2 (per-feature) folded into the
    # weight / bias, then ReLU.
    hid = jnp.dot(flat_ref[...], w_ref[...], preferred_element_type=jnp.float32)
    hid = jnp.maximum(hid + bias_ref[...], 0.0)               # (B, D1)

    # Score against every entity embedding, add bias, sigmoid.  (B, NUM_ENT)
    # output is lane-dense (256 = 2 x 128 lanes).
    logits = jnp.dot(hid, et_ref[...], preferred_element_type=jnp.float32) + b_ref[...]
    out_ref[...] = 1.0 / (1.0 + jnp.exp(-logits))


# ---------------------------------------------------------------------------
# One-time parameter preparation (outside the per-call path):
#   - fold BatchNorm running stats into scale/shift,
#   - fold bn1 + bn2 into the fc weight / bias,
#   - pre-transpose E^T for the score matmul.
# ---------------------------------------------------------------------------
def _fold_bn(gamma, beta, mean, var):
    s = gamma / jnp.sqrt(var + BN_EPS)
    return s, beta - mean * s


def prepare_params(params):
    s0, t0 = _fold_bn(*params["bn0"])            # (1,)
    s1, t1 = _fold_bn(*params["bn1"])            # (OUT_CH,)
    s2, t2 = _fold_bn(*params["bn2"])            # (D1,)

    fc_wT = params["fc_w"]                       # stored as W^T: (FC_LEN, D1)
    s1_rows = jnp.repeat(s1, H_OUT * W_OUT)      # (FC_LEN,)  bn1 scale per flat pos
    t1_rows = jnp.repeat(t1, H_OUT * W_OUT)

    w_fold = fc_wT * s1_rows[:, None] * s2[None, :]                    # (FC_LEN, D1)
    bias_fold = (params["fc_b"] + t1_rows @ fc_wT) * s2 + t2           # (D1,)

    return dict(
        E=params["E"],                           # (NUM_ENT, D1) for the lookup
        R=params["R"],                           # (NUM_REL, R_DIM)
        bn0=jnp.stack([s0[0], t0[0]]),           # (2,) scalars for SMEM
        w_fold=w_fold,                           # (FC_LEN, D1)
        bias_fold=bias_fold[None, :],            # (1, D1)
        e_t=params["E"].T,                       # (D1, NUM_ENT), pre-transposed
        b=params["b"][None, :],                  # (1, NUM_ENT)
    )


@jax.jit
def hype_forward(e1_idx, r_idx, prep):
    B = e1_idx.shape[0]
    # Tiny XLA glue: embedding gathers + layout prep for the kernel.
    # (H, B, W) layout lets the kernel take clean per-tap slices.
    x0 = prep["E"][e1_idx].reshape(B, H_IN, W_IN).transpose(1, 0, 2)     # (10, B, 20)
    # (OUT_CH, FH*FW, B, 1): r4[oc, t, b, 0] = R[r_idx[b], oc*9 + t]
    r4 = prep["R"][r_idx].reshape(B, OUT_CH, FH * FW).transpose(1, 2, 0)[..., None]

    return pl.pallas_call(
        hype_kernel,
        out_shape=jax.ShapeDtypeStruct((B, NUM_ENT), jnp.float32),
        in_specs=[
            pl.BlockSpec(memory_space=pltpu.MemorySpace.VMEM),   # x0  (10, B, 20)
            pl.BlockSpec(memory_space=pltpu.MemorySpace.VMEM),   # r4  (4, 9, B, 1)
            pl.BlockSpec(memory_space=pltpu.MemorySpace.SMEM),   # bn0 scale/shift
            pl.BlockSpec(memory_space=pltpu.MemorySpace.VMEM),   # folded fc weight
            pl.BlockSpec(memory_space=pltpu.MemorySpace.VMEM),   # folded fc bias
            pl.BlockSpec(memory_space=pltpu.MemorySpace.VMEM),   # E^T
            pl.BlockSpec(memory_space=pltpu.MemorySpace.VMEM),   # entity bias b
        ],
        out_specs=pl.BlockSpec(memory_space=pltpu.MemorySpace.VMEM),
        scratch_shapes=[pltpu.VMEM((B, FC_LEN), jnp.float32)],   # flattened conv
    )(x0, r4, prep["bn0"], prep["w_fold"], prep["bias_fold"], prep["e_t"], prep["b"])


# ---------------------------------------------------------------------------
# Deterministic synthetic parameters (shapes from HypE.__init__)
# ---------------------------------------------------------------------------
def init_params(key):
    ks = jax.random.split(key, 8)

    def xavier(k, shape):
        std = (2.0 / (shape[0] + shape[1])) ** 0.5
        return std * jax.random.normal(k, shape, jnp.float32)

    def bn(k, n):
        k1, k2, k3, k4 = jax.random.split(k, 4)
        gamma = 1.0 + 0.1 * jax.random.normal(k1, (n,), jnp.float32)
        beta = 0.05 * jax.random.normal(k2, (n,), jnp.float32)
        mean = 0.01 * jax.random.normal(k3, (n,), jnp.float32)
        var = 1.0 + 0.1 * jax.random.uniform(k4, (n,), jnp.float32)
        return (gamma, beta, mean, var)

    E = xavier(ks[0], (NUM_ENT, D1)).at[0].set(0.0)   # padding_idx = 0
    R = xavier(ks[1], (NUM_REL, R_DIM)).at[0].set(0.0)
    return dict(
        E=E, R=R,
        fc_w=xavier(ks[2], (FC_LEN, D1)),             # stored as W^T (in, out)
        fc_b=0.01 * jax.random.normal(ks[3], (D1,), jnp.float32),
        # `b` is Parameter(zeros) in the module; use small values so the bias
        # add is actually exercised.
        b=0.01 * jax.random.normal(ks[7], (NUM_ENT,), jnp.float32),
        bn0=bn(ks[4], IN_CH), bn1=bn(ks[5], OUT_CH), bn2=bn(ks[6], D1),
    )


# Pure-JAX reference (same eval-mode math, no Pallas, no folding).
def hype_reference(e1_idx, r_idx, params):
    E_w, R_w = params["E"], params["R"]
    B = e1_idx.shape[0]

    def bn_apply(x, p, axis):
        g, bta, m, v = p
        shp = [1] * x.ndim
        shp[axis] = -1
        return ((x - m.reshape(shp)) / jnp.sqrt(v.reshape(shp) + BN_EPS)
                * g.reshape(shp) + bta.reshape(shp))

    e1 = E_w[e1_idx].reshape(B, 1, H_IN, W_IN)
    x = bn_apply(e1, params["bn0"], 1)
    k = R_w[r_idx].reshape(B, OUT_CH, FH, FW)
    conv = jnp.zeros((B, OUT_CH, H_OUT, W_OUT), jnp.float32)
    for dy in range(FH):
        for dx in range(FW):
            conv = conv + (k[:, :, dy, dx][:, :, None, None]
                           * x[:, 0, dy:dy + H_OUT, dx:dx + W_OUT][:, None, :, :])
    conv = bn_apply(conv, params["bn1"], 1)
    h = conv.reshape(B, -1) @ params["fc_w"] + params["fc_b"]
    h = jnp.maximum(bn_apply(h, params["bn2"], 1), 0.0)
    logits = h @ E_w.T + params["b"][None, :]
    return jax.nn.sigmoid(logits)


if __name__ == "__main__":
    key = jax.random.PRNGKey(0)
    params = init_params(key)
    prep = prepare_params(params)          # one-time folding / transposes

    e1_idx = jnp.array([3, 7], jnp.int32)
    r_idx = jnp.array([1, 2], jnp.int32)

    pred = hype_forward(e1_idx, r_idx, prep)
    jax.block_until_ready(pred)

    ref = hype_reference(e1_idx, r_idx, params)
    assert pred.shape == (2, NUM_ENT)
    err = float(jnp.max(jnp.abs(pred - ref)))
    assert jnp.allclose(pred, ref, atol=1e-4, rtol=1e-4), f"max abs err {err}"
    print("KERNEL_OK")
</pallas_src>

<mosaic_0001>
module attributes {stable_mosaic.version = 11 : i64} {
  func.func @hype_kernel(%arg0: memref<10x2x20xf32, #tpu.memory_space<vmem>>, %arg1: memref<4x9x2x1xf32, #tpu.memory_space<vmem>>, %arg2: memref<2xf32, #tpu.memory_space<smem>>, %arg3: memref<576x200xf32, #tpu.memory_space<vmem>>, %arg4: memref<1x200xf32, #tpu.memory_space<vmem>>, %arg5: memref<200x256xf32, #tpu.memory_space<vmem>>, %arg6: memref<1x256xf32, #tpu.memory_space<vmem>>, %arg7: memref<2x256xf32, #tpu.memory_space<vmem>>, %arg8: memref<2x576xf32, #tpu.memory_space<vmem>>) attributes {dimension_semantics = [], scalar_prefetch = 0 : i64, scratch_operands = 1 : i64, tpu.core_type = #tpu.core_type<tc>} {
    %c0 = arith.constant 0 : index
    %c0_0 = arith.constant 0 : index
    %c0_1 = arith.constant 0 : index
    %0 = vector.load %arg0[%c0, %c0_0, %c0_1] : memref<10x2x20xf32, #tpu.memory_space<vmem>>, vector<10x2x20xf32>
    %c0_2 = arith.constant 0 : index
    %1 = memref.load %arg2[%c0_2] : memref<2xf32, #tpu.memory_space<smem>>
    %2 = vector.broadcast %1 : f32 to vector<10x2x20xf32>
    %3 = arith.mulf %0, %2 : vector<10x2x20xf32>
    %c1 = arith.constant 1 : index
    %4 = memref.load %arg2[%c1] : memref<2xf32, #tpu.memory_space<smem>>
    %5 = vector.broadcast %4 : f32 to vector<10x2x20xf32>
    %6 = arith.addf %3, %5 : vector<10x2x20xf32>
    %7 = vector.extract_strided_slice %6 {offsets = [0, 0, 0], sizes = [8, 2, 18], strides = [1, 1, 1]} : vector<10x2x20xf32> to vector<8x2x18xf32>
    %8 = vector.extract_strided_slice %6 {offsets = [0, 0, 1], sizes = [8, 2, 18], strides = [1, 1, 1]} : vector<10x2x20xf32> to vector<8x2x18xf32>
    %9 = vector.extract_strided_slice %6 {offsets = [0, 0, 2], sizes = [8, 2, 18], strides = [1, 1, 1]} : vector<10x2x20xf32> to vector<8x2x18xf32>
    %10 = vector.extract_strided_slice %6 {offsets = [1, 0, 0], sizes = [8, 2, 18], strides = [1, 1, 1]} : vector<10x2x20xf32> to vector<8x2x18xf32>
    %11 = vector.extract_strided_slice %6 {offsets = [1, 0, 1], sizes = [8, 2, 18], strides = [1, 1, 1]} : vector<10x2x20xf32> to vector<8x2x18xf32>
    %12 = vector.extract_strided_slice %6 {offsets = [1, 0, 2], sizes = [8, 2, 18], strides = [1, 1, 1]} : vector<10x2x20xf32> to vector<8x2x18xf32>
    %13 = vector.extract_strided_slice %6 {offsets = [2, 0, 0], sizes = [8, 2, 18], strides = [1, 1, 1]} : vector<10x2x20xf32> to vector<8x2x18xf32>
    %14 = vector.extract_strided_slice %6 {offsets = [2, 0, 1], sizes = [8, 2, 18], strides = [1, 1, 1]} : vector<10x2x20xf32> to vector<8x2x18xf32>
    %15 = vector.extract_strided_slice %6 {offsets = [2, 0, 2], sizes = [8, 2, 18], strides = [1, 1, 1]} : vector<10x2x20xf32> to vector<8x2x18xf32>
    %c0_3 = arith.constant 0 : index
    %c0_4 = arith.constant 0 : index
    %c0_5 = arith.constant 0 : index
    %c0_6 = arith.constant 0 : index
    %16 = vector.load %arg1[%c0_3, %c0_4, %c0_5, %c0_6] : memref<4x9x2x1xf32, #tpu.memory_space<vmem>>, vector<4x9x2x1xf32>
    %cst = arith.constant 0.000000e+00 : f32
    %17 = vector.broadcast %cst : f32 to vector<8x2x18xf32>
    %18 = vector.extract_strided_slice %16 {offsets = [0, 0, 0, 0], sizes = [1, 1, 2, 1], strides = [1, 1, 1, 1]} : vector<4x9x2x1xf32> to vector<1x1x2x1xf32>
    %19 = vector.shape_cast %18 : vector<1x1x2x1xf32> to vector<2x1xf32>
    %20 = vector.shape_cast %19 : vector<2x1xf32> to vector<1x2x1xf32>
    %21 = vector.broadcast %20 : vector<1x2x1xf32> to vector<8x2x18xf32>
    %22 = arith.mulf %21, %7 : vector<8x2x18xf32>
    %23 = arith.addf %17, %22 : vector<8x2x18xf32>
    %24 = vector.extract_strided_slice %16 {offsets = [0, 1, 0, 0], sizes = [1, 1, 2, 1], strides = [1, 1, 1, 1]} : vector<4x9x2x1xf32> to vector<1x1x2x1xf32>
    %25 = vector.shape_cast %24 : vector<1x1x2x1xf32> to vector<2x1xf32>
    %26 = vector.shape_cast %25 : vector<2x1xf32> to vector<1x2x1xf32>
    %27 = vector.broadcast %26 : vector<1x2x1xf32> to vector<8x2x18xf32>
    %28 = arith.mulf %27, %8 : vector<8x2x18xf32>
    %29 = arith.addf %23, %28 : vector<8x2x18xf32>
    %30 = vector.extract_strided_slice %16 {offsets = [0, 2, 0, 0], sizes = [1, 1, 2, 1], strides = [1, 1, 1, 1]} : vector<4x9x2x1xf32> to vector<1x1x2x1xf32>
    %31 = vector.shape_cast %30 : vector<1x1x2x1xf32> to vector<2x1xf32>
    %32 = vector.shape_cast %31 : vector<2x1xf32> to vector<1x2x1xf32>
    %33 = vector.broadcast %32 : vector<1x2x1xf32> to vector<8x2x18xf32>
    %34 = arith.mulf %33, %9 : vector<8x2x18xf32>
    %35 = arith.addf %29, %34 : vector<8x2x18xf32>
    %36 = vector.extract_strided_slice %16 {offsets = [0, 3, 0, 0], sizes = [1, 1, 2, 1], strides = [1, 1, 1, 1]} : vector<4x9x2x1xf32> to vector<1x1x2x1xf32>
    %37 = vector.shape_cast %36 : vector<1x1x2x1xf32> to vector<2x1xf32>
    %38 = vector.shape_cast %37 : vector<2x1xf32> to vector<1x2x1xf32>
    %39 = vector.broadcast %38 : vector<1x2x1xf32> to vector<8x2x18xf32>
    %40 = arith.mulf %39, %10 : vector<8x2x18xf32>
    %41 = arith.addf %35, %40 : vector<8x2x18xf32>
    %42 = vector.extract_strided_slice %16 {offsets = [0, 4, 0, 0], sizes = [1, 1, 2, 1], strides = [1, 1, 1, 1]} : vector<4x9x2x1xf32> to vector<1x1x2x1xf32>
    %43 = vector.shape_cast %42 : vector<1x1x2x1xf32> to vector<2x1xf32>
    %44 = vector.shape_cast %43 : vector<2x1xf32> to vector<1x2x1xf32>
    %45 = vector.broadcast %44 : vector<1x2x1xf32> to vector<8x2x18xf32>
    %46 = arith.mulf %45, %11 : vector<8x2x18xf32>
    %47 = arith.addf %41, %46 : vector<8x2x18xf32>
    %48 = vector.extract_strided_slice %16 {offsets = [0, 5, 0, 0], sizes = [1, 1, 2, 1], strides = [1, 1, 1, 1]} : vector<4x9x2x1xf32> to vector<1x1x2x1xf32>
    %49 = vector.shape_cast %48 : vector<1x1x2x1xf32> to vector<2x1xf32>
    %50 = vector.shape_cast %49 : vector<2x1xf32> to vector<1x2x1xf32>
    %51 = vector.broadcast %50 : vector<1x2x1xf32> to vector<8x2x18xf32>
    %52 = arith.mulf %51, %12 : vector<8x2x18xf32>
    %53 = arith.addf %47, %52 : vector<8x2x18xf32>
    %54 = vector.extract_strided_slice %16 {offsets = [0, 6, 0, 0], sizes = [1, 1, 2, 1], strides = [1, 1, 1, 1]} : vector<4x9x2x1xf32> to vector<1x1x2x1xf32>
    %55 = vector.shape_cast %54 : vector<1x1x2x1xf32> to vector<2x1xf32>
    %56 = vector.shape_cast %55 : vector<2x1xf32> to vector<1x2x1xf32>
    %57 = vector.broadcast %56 : vector<1x2x1xf32> to vector<8x2x18xf32>
    %58 = arith.mulf %57, %13 : vector<8x2x18xf32>
    %59 = arith.addf %53, %58 : vector<8x2x18xf32>
    %60 = vector.extract_strided_slice %16 {offsets = [0, 7, 0, 0], sizes = [1, 1, 2, 1], strides = [1, 1, 1, 1]} : vector<4x9x2x1xf32> to vector<1x1x2x1xf32>
    %61 = vector.shape_cast %60 : vector<1x1x2x1xf32> to vector<2x1xf32>
    %62 = vector.shape_cast %61 : vector<2x1xf32> to vector<1x2x1xf32>
    %63 = vector.broadcast %62 : vector<1x2x1xf32> to vector<8x2x18xf32>
    %64 = arith.mulf %63, %14 : vector<8x2x18xf32>
    %65 = arith.addf %59, %64 : vector<8x2x18xf32>
    %66 = vector.extract_strided_slice %16 {offsets = [0, 8, 0, 0], sizes = [1, 1, 2, 1], strides = [1, 1, 1, 1]} : vector<4x9x2x1xf32> to vector<1x1x2x1xf32>
    %67 = vector.shape_cast %66 : vector<1x1x2x1xf32> to vector<2x1xf32>
    %68 = vector.shape_cast %67 : vector<2x1xf32> to vector<1x2x1xf32>
    %69 = vector.broadcast %68 : vector<1x2x1xf32> to vector<8x2x18xf32>
    %70 = arith.mulf %69, %15 : vector<8x2x18xf32>
    %71 = arith.addf %65, %70 : vector<8x2x18xf32>
    %72 = vector.extract_strided_slice %71 {offsets = [0, 0, 0], sizes = [1, 2, 18], strides = [1, 1, 1]} : vector<8x2x18xf32> to vector<1x2x18xf32>
    %73 = vector.shape_cast %72 : vector<1x2x18xf32> to vector<2x18xf32>
    %c0_7 = arith.constant 0 : index
    %c0_8 = arith.constant 0 : index
    %74 = vector.load %arg8[%c0_7, %c0_8] : memref<2x576xf32, #tpu.memory_space<vmem>>, vector<2x18xf32>
    tpu.vector_store %arg8[%c0_7, %c0_8], %73 {strides = array<i32>} : memref<2x576xf32, #tpu.memory_space<vmem>>, vector<2x18xf32>,
    %75 = vector.extract_strided_slice %71 {offsets = [1, 0, 0], sizes = [1, 2, 18], strides = [1, 1, 1]} : vector<8x2x18xf32> to vector<1x2x18xf32>
    %76 = vector.shape_cast %75 : vector<1x2x18xf32> to vector<2x18xf32>
    %c0_9 = arith.constant 0 : index
    %c18 = arith.constant 18 : index
    %77 = vector.load %arg8[%c0_9, %c18] : memref<2x576xf32, #tpu.memory_space<vmem>>, vector<2x18xf32>
    tpu.vector_store %arg8[%c0_9, %c18], %76 {strides = array<i32>} : memref<2x576xf32, #tpu.memory_space<vmem>>, vector<2x18xf32>,
    %78 = vector.extract_strided_slice %71 {offsets = [2, 0, 0], sizes = [1, 2, 18], strides = [1, 1, 1]} : vector<8x2x18xf32> to vector<1x2x18xf32>
    %79 = vector.shape_cast %78 : vector<1x2x18xf32> to vector<2x18xf32>
    %c0_10 = arith.constant 0 : index
    %c36 = arith.constant 36 : index
    %80 = vector.load %arg8[%c0_10, %c36] : memref<2x576xf32, #tpu.memory_space<vmem>>, vector<2x18xf32>
    tpu.vector_store %arg8[%c0_10, %c36], %79 {strides = array<i32>} : memref<2x576xf32, #tpu.memory_space<vmem>>, vector<2x18xf32>,
    %81 = vector.extract_strided_slice %71 {offsets = [3, 0, 0], sizes = [1, 2, 18], strides = [1, 1, 1]} : vector<8x2x18xf32> to vector<1x2x18xf32>
    %82 = vector.shape_cast %81 : vector<1x2x18xf32> to vector<2x18xf32>
    %c0_11 = arith.constant 0 : index
    %c54 = arith.constant 54 : index
    %83 = vector.load %arg8[%c0_11, %c54] : memref<2x576xf32, #tpu.memory_space<vmem>>, vector<2x18xf32>
    tpu.vector_store %arg8[%c0_11, %c54], %82 {strides = array<i32>} : memref<2x576xf32, #tpu.memory_space<vmem>>, vector<2x18xf32>,
    %84 = vector.extract_strided_slice %71 {offsets = [4, 0, 0], sizes = [1, 2, 18], strides = [1, 1, 1]} : vector<8x2x18xf32> to vector<1x2x18xf32>
    %85 = vector.shape_cast %84 : vector<1x2x18xf32> to vector<2x18xf32>
    %c0_12 = arith.constant 0 : index
    %c72 = arith.constant 72 : index
    %86 = vector.load %arg8[%c0_12, %c72] : memref<2x576xf32, #tpu.memory_space<vmem>>, vector<2x18xf32>
    tpu.vector_store %arg8[%c0_12, %c72], %85 {strides = array<i32>} : memref<2x576xf32, #tpu.memory_space<vmem>>, vector<2x18xf32>,
    %87 = vector.extract_strided_slice %71 {offsets = [5, 0, 0], sizes = [1, 2, 18], strides = [1, 1, 1]} : vector<8x2x18xf32> to vector<1x2x18xf32>
    %88 = vector.shape_cast %87 : vector<1x2x18xf32> to vector<2x18xf32>
    %c0_13 = arith.constant 0 : index
    %c90 = arith.constant 90 : index
    %89 = vector.load %arg8[%c0_13, %c90] : memref<2x576xf32, #tpu.memory_space<vmem>>, vector<2x18xf32>
    tpu.vector_store %arg8[%c0_13, %c90], %88 {strides = array<i32>} : memref<2x576xf32, #tpu.memory_space<vmem>>, vector<2x18xf32>,
    %90 = vector.extract_strided_slice %71 {offsets = [6, 0, 0], sizes = [1, 2, 18], strides = [1, 1, 1]} : vector<8x2x18xf32> to vector<1x2x18xf32>
    %91 = vector.shape_cast %90 : vector<1x2x18xf32> to vector<2x18xf32>
    %c0_14 = arith.constant 0 : index
    %c108 = arith.constant 108 : index
    %92 = vector.load %arg8[%c0_14, %c108] : memref<2x576xf32, #tpu.memory_space<vmem>>, vector<2x18xf32>
    tpu.vector_store %arg8[%c0_14, %c108], %91 {strides = array<i32>} : memref<2x576xf32, #tpu.memory_space<vmem>>, vector<2x18xf32>,
    %93 = vector.extract_strided_slice %71 {offsets = [7, 0, 0], sizes = [1, 2, 18], strides = [1, 1, 1]} : vector<8x2x18xf32> to vector<1x2x18xf32>
    %94 = vector.shape_cast %93 : vector<1x2x18xf32> to vector<2x18xf32>
    %c0_15 = arith.constant 0 : index
    %c126 = arith.constant 126 : index
    %95 = vector.load %arg8[%c0_15, %c126] : memref<2x576xf32, #tpu.memory_space<vmem>>, vector<2x18xf32>
    tpu.vector_store %arg8[%c0_15, %c126], %94 {strides = array<i32>} : memref<2x576xf32, #tpu.memory_space<vmem>>, vector<2x18xf32>,
    %cst_16 = arith.constant 0.000000e+00 : f32
    %96 = vector.broadcast %cst_16 : f32 to vector<8x2x18xf32>
    %97 = vector.extract_strided_slice %16 {offsets = [1, 0, 0, 0], sizes = [1, 1, 2, 1], strides = [1, 1, 1, 1]} : vector<4x9x2x1xf32> to vector<1x1x2x1xf32>
    %98 = vector.shape_cast %97 : vector<1x1x2x1xf32> to vector<2x1xf32>
    %99 = vector.shape_cast %98 : vector<2x1xf32> to vector<1x2x1xf32>
    %100 = vector.broadcast %99 : vector<1x2x1xf32> to vector<8x2x18xf32>
    %101 = arith.mulf %100, %7 : vector<8x2x18xf32>
    %102 = arith.addf %96, %101 : vector<8x2x18xf32>
    %103 = vector.extract_strided_slice %16 {offsets = [1, 1, 0, 0], sizes = [1, 1, 2, 1], strides = [1, 1, 1, 1]} : vector<4x9x2x1xf32> to vector<1x1x2x1xf32>
    %104 = vector.shape_cast %103 : vector<1x1x2x1xf32> to vector<2x1xf32>
    %105 = vector.shape_cast %104 : vector<2x1xf32> to vector<1x2x1xf32>
    %106 = vector.broadcast %105 : vector<1x2x1xf32> to vector<8x2x18xf32>
    %107 = arith.mulf %106, %8 : vector<8x2x18xf32>
    %108 = arith.addf %102, %107 : vector<8x2x18xf32>
    %109 = vector.extract_strided_slice %16 {offsets = [1, 2, 0, 0], sizes = [1, 1, 2, 1], strides = [1, 1, 1, 1]} : vector<4x9x2x1xf32> to vector<1x1x2x1xf32>
    %110 = vector.shape_cast %109 : vector<1x1x2x1xf32> to vector<2x1xf32>
    %111 = vector.shape_cast %110 : vector<2x1xf32> to vector<1x2x1xf32>
    %112 = vector.broadcast %111 : vector<1x2x1xf32> to vector<8x2x18xf32>
    %113 = arith.mulf %112, %9 : vector<8x2x18xf32>
    %114 = arith.addf %108, %113 : vector<8x2x18xf32>
    %115 = vector.extract_strided_slice %16 {offsets = [1, 3, 0, 0], sizes = [1, 1, 2, 1], strides = [1, 1, 1, 1]} : vector<4x9x2x1xf32> to vector<1x1x2x1xf32>
    %116 = vector.shape_cast %115 : vector<1x1x2x1xf32> to vector<2x1xf32>
    %117 = vector.shape_cast %116 : vector<2x1xf32> to vector<1x2x1xf32>
    %118 = vector.broadcast %117 : vector<1x2x1xf32> to vector<8x2x18xf32>
    %119 = arith.mulf %118, %10 : vector<8x2x18xf32>
    %120 = arith.addf %114, %119 : vector<8x2x18xf32>
    %121 = vector.extract_strided_slice %16 {offsets = [1, 4, 0, 0], sizes = [1, 1, 2, 1], strides = [1, 1, 1, 1]} : vector<4x9x2x1xf32> to vector<1x1x2x1xf32>
    %122 = vector.shape_cast %121 : vector<1x1x2x1xf32> to vector<2x1xf32>
    %123 = vector.shape_cast %122 : vector<2x1xf32> to vector<1x2x1xf32>
    %124 = vector.broadcast %123 : vector<1x2x1xf32> to vector<8x2x18xf32>
    %125 = arith.mulf %124, %11 : vector<8x2x18xf32>
    %126 = arith.addf %120, %125 : vector<8x2x18xf32>
    %127 = vector.extract_strided_slice %16 {offsets = [1, 5, 0, 0], sizes = [1, 1, 2, 1], strides = [1, 1, 1, 1]} : vector<4x9x2x1xf32> to vector<1x1x2x1xf32>
    %128 = vector.shape_cast %127 : vector<1x1x2x1xf32> to vector<2x1xf32>
    %129 = vector.shape_cast %128 : vector<2x1xf32> to vector<1x2x1xf32>
    %130 = vector.broadcast %129 : vector<1x2x1xf32> to vector<8x2x18xf32>
    %131 = arith.mulf %130, %12 : vector<8x2x18xf32>
    %132 = arith.addf %126, %131 : vector<8x2x18xf32>
    %133 = vector.extract_strided_slice %16 {offsets = [1, 6, 0, 0], sizes = [1, 1, 2, 1], strides = [1, 1, 1, 1]} : vector<4x9x2x1xf32> to vector<1x1x2x1xf32>
    %134 = vector.shape_cast %133 : vector<1x1x2x1xf32> to vector<2x1xf32>
    %135 = vector.shape_cast %134 : vector<2x1xf32> to vector<1x2x1xf32>
    %136 = vector.broadcast %135 : vector<1x2x1xf32> to vector<8x2x18xf32>
    %137 = arith.mulf %136, %13 : vector<8x2x18xf32>
    %138 = arith.addf %132, %137 : vector<8x2x18xf32>
    %139 = vector.extract_strided_slice %16 {offsets = [1, 7, 0, 0], sizes = [1, 1, 2, 1], strides = [1, 1, 1, 1]} : vector<4x9x2x1xf32> to vector<1x1x2x1xf32>
    %140 = vector.shape_cast %139 : vector<1x1x2x1xf32> to vector<2x1xf32>
    %141 = vector.shape_cast %140 : vector<2x1xf32> to vector<1x2x1xf32>
    %142 = vector.broadcast %141 : vector<1x2x1xf32> to vector<8x2x18xf32>
    %143 = arith.mulf %142, %14 : vector<8x2x18xf32>
    %144 = arith.addf %138, %143 : vector<8x2x18xf32>
    %145 = vector.extract_strided_slice %16 {offsets = [1, 8, 0, 0], sizes = [1, 1, 2, 1], strides = [1, 1, 1, 1]} : vector<4x9x2x1xf32> to vector<1x1x2x1xf32>
    %146 = vector.shape_cast %145 : vector<1x1x2x1xf32> to vector<2x1xf32>
    %147 = vector.shape_cast %146 : vector<2x1xf32> to vector<1x2x1xf32>
    %148 = vector.broadcast %147 : vector<1x2x1xf32> to vector<8x2x18xf32>
    %149 = arith.mulf %148, %15 : vector<8x2x18xf32>
    %150 = arith.addf %144, %149 : vector<8x2x18xf32>
    %151 = vector.extract_strided_slice %150 {offsets = [0, 0, 0], sizes = [1, 2, 18], strides = [1, 1, 1]} : vector<8x2x18xf32> to vector<1x2x18xf32>
    %152 = vector.shape_cast %151 : vector<1x2x18xf32> to vector<2x18xf32>
    %c0_17 = arith.constant 0 : index
    %c144 = arith.constant 144 : index
    %153 = vector.load %arg8[%c0_17, %c144] : memref<2x576xf32, #tpu.memory_space<vmem>>, vector<2x18xf32>
    tpu.vector_store %arg8[%c0_17, %c144], %152 {strides = array<i32>} : memref<2x576xf32, #tpu.memory_space<vmem>>, vector<2x18xf32>,
    %154 = vector.extract_strided_slice %150 {offsets = [1, 0, 0], sizes = [1, 2, 18], strides = [1, 1, 1]} : vector<8x2x18xf32> to vector<1x2x18xf32>
    %155 = vector.shape_cast %154 : vector<1x2x18xf32> to vector<2x18xf32>
    %c0_18 = arith.constant 0 : index
    %c162 = arith.constant 162 : index
    %156 = vector.load %arg8[%c0_18, %c162] : memref<2x576xf32, #tpu.memory_space<vmem>>, vector<2x18xf32>
    tpu.vector_store %arg8[%c0_18, %c162], %155 {strides = array<i32>} : memref<2x576xf32, #tpu.memory_space<vmem>>, vector<2x18xf32>,
    %157 = vector.extract_strided_slice %150 {offsets = [2, 0, 0], sizes = [1, 2, 18], strides = [1, 1, 1]} : vector<8x2x18xf32> to vector<1x2x18xf32>
    %158 = vector.shape_cast %157 : vector<1x2x18xf32> to vector<2x18xf32>
    %c0_19 = arith.constant 0 : index
    %c180 = arith.constant 180 : index
    %159 = vector.load %arg8[%c0_19, %c180] : memref<2x576xf32, #tpu.memory_space<vmem>>, vector<2x18xf32>
    tpu.vector_store %arg8[%c0_19, %c180], %158 {strides = array<i32>} : memref<2x576xf32, #tpu.memory_space<vmem>>, vector<2x18xf32>,
    %160 = vector.extract_strided_slice %150 {offsets = [3, 0, 0], sizes = [1, 2, 18], strides = [1, 1, 1]} : vector<8x2x18xf32> to vector<1x2x18xf32>
    %161 = vector.shape_cast %160 : vector<1x2x18xf32> to vector<2x18xf32>
    %c0_20 = arith.constant 0 : index
    %c198 = arith.constant 198 : index
    %162 = vector.load %arg8[%c0_20, %c198] : memref<2x576xf32, #tpu.memory_space<vmem>>, vector<2x18xf32>
    tpu.vector_store %arg8[%c0_20, %c198], %161 {strides = array<i32>} : memref<2x576xf32, #tpu.memory_space<vmem>>, vector<2x18xf32>,
    %163 = vector.extract_strided_slice %150 {offsets = [4, 0, 0], sizes = [1, 2, 18], strides = [1, 1, 1]} : vector<8x2x18xf32> to vector<1x2x18xf32>
    %164 = vector.shape_cast %163 : vector<1x2x18xf32> to vector<2x18xf32>
    %c0_21 = arith.constant 0 : index
    %c216 = arith.constant 216 : index
    %165 = vector.load %arg8[%c0_21, %c216] : memref<2x576xf32, #tpu.memory_space<vmem>>, vector<2x18xf32>
    tpu.vector_store %arg8[%c0_21, %c216], %164 {strides = array<i32>} : memref<2x576xf32, #tpu.memory_space<vmem>>, vector<2x18xf32>,
    %166 = vector.extract_strided_slice %150 {offsets = [5, 0, 0], sizes = [1, 2, 18], strides = [1, 1, 1]} : vector<8x2x18xf32> to vector<1x2x18xf32>
    %167 = vector.shape_cast %166 : vector<1x2x18xf32> to vector<2x18xf32>
    %c0_22 = arith.constant 0 : index
    %c234 = arith.constant 234 : index
    %168 = vector.load %arg8[%c0_22, %c234] : memref<2x576xf32, #tpu.memory_space<vmem>>, vector<2x18xf32>
    tpu.vector_store %arg8[%c0_22, %c234], %167 {strides = array<i32>} : memref<2x576xf32, #tpu.memory_space<vmem>>, vector<2x18xf32>,
    %169 = vector.extract_strided_slice %150 {offsets = [6, 0, 0], sizes = [1, 2, 18], strides = [1, 1, 1]} : vector<8x2x18xf32> to vector<1x2x18xf32>
    %170 = vector.shape_cast %169 : vector<1x2x18xf32> to vector<2x18xf32>
    %c0_23 = arith.constant 0 : index
    %c252 = arith.constant 252 : index
    %171 = vector.load %arg8[%c0_23, %c252] : memref<2x576xf32, #tpu.memory_space<vmem>>, vector<2x18xf32>
    tpu.vector_store %arg8[%c0_23, %c252], %170 {strides = array<i32>} : memref<2x576xf32, #tpu.memory_space<vmem>>, vector<2x18xf32>,
    %172 = vector.extract_strided_slice %150 {offsets = [7, 0, 0], sizes = [1, 2, 18], strides = [1, 1, 1]} : vector<8x2x18xf32> to vector<1x2x18xf32>
    %173 = vector.shape_cast %172 : vector<1x2x18xf32> to vector<2x18xf32>
    %c0_24 = arith.constant 0 : index
    %c270 = arith.constant 270 : index
    %174 = vector.load %arg8[%c0_24, %c270] : memref<2x576xf32, #tpu.memory_space<vmem>>, vector<2x18xf32>
    tpu.vector_store %arg8[%c0_24, %c270], %173 {strides = array<i32>} : memref<2x576xf32, #tpu.memory_space<vmem>>, vector<2x18xf32>,
    %cst_25 = arith.constant 0.000000e+00 : f32
    %175 = vector.broadcast %cst_25 : f32 to vector<8x2x18xf32>
    %176 = vector.extract_strided_slice %16 {offsets = [2, 0, 0, 0], sizes = [1, 1, 2, 1], strides = [1, 1, 1, 1]} : vector<4x9x2x1xf32> to vector<1x1x2x1xf32>
    %177 = vector.shape_cast %176 : vector<1x1x2x1xf32> to vector<2x1xf32>
    %178 = vector.shape_cast %177 : vector<2x1xf32> to vector<1x2x1xf32>
    %179 = vector.broadcast %178 : vector<1x2x1xf32> to vector<8x2x18xf32>
    %180 = arith.mulf %179, %7 : vector<8x2x18xf32>
    %181 = arith.addf %175, %180 : vector<8x2x18xf32>
    %182 = vector.extract_strided_slice %16 {offsets = [2, 1, 0, 0], sizes = [1, 1, 2, 1], strides = [1, 1, 1, 1]} : vector<4x9x2x1xf32> to vector<1x1x2x1xf32>
    %183 = vector.shape_cast %182 : vector<1x1x2x1xf32> to vector<2x1xf32>
    %184 = vector.shape_cast %183 : vector<2x1xf32> to vector<1x2x1xf32>
    %185 = vector.broadcast %184 : vector<1x2x1xf32> to vector<8x2x18xf32>
    %186 = arith.mulf %185, %8 : vector<8x2x18xf32>
    %187 = arith.addf %181, %186 : vector<8x2x18xf32>
    %188 = vector.extract_strided_slice %16 {offsets = [2, 2, 0, 0], sizes = [1, 1, 2, 1], strides = [1, 1, 1, 1]} : vector<4x9x2x1xf32> to vector<1x1x2x1xf32>
    %189 = vector.shape_cast %188 : vector<1x1x2x1xf32> to vector<2x1xf32>
    %190 = vector.shape_cast %189 : vector<2x1xf32> to vector<1x2x1xf32>
    %191 = vector.broadcast %190 : vector<1x2x1xf32> to vector<8x2x18xf32>
    %192 = arith.mulf %191, %9 : vector<8x2x18xf32>
    %193 = arith.addf %187, %192 : vector<8x2x18xf32>
    %194 = vector.extract_strided_slice %16 {offsets = [2, 3, 0, 0], sizes = [1, 1, 2, 1], strides = [1, 1, 1, 1]} : vector<4x9x2x1xf32> to vector<1x1x2x1xf32>
    %195 = vector.shape_cast %194 : vector<1x1x2x1xf32> to vector<2x1xf32>
    %196 = vector.shape_cast %195 : vector<2x1xf32> to vector<1x2x1xf32>
    %197 = vector.broadcast %196 : vector<1x2x1xf32> to vector<8x2x18xf32>
    %198 = arith.mulf %197, %10 : vector<8x2x18xf32>
    %199 = arith.addf %193, %198 : vector<8x2x18xf32>
    %200 = vector.extract_strided_slice %16 {offsets = [2, 4, 0, 0], sizes = [1, 1, 2, 1], strides = [1, 1, 1, 1]} : vector<4x9x2x1xf32> to vector<1x1x2x1xf32>
    %201 = vector.shape_cast %200 : vector<1x1x2x1xf32> to vector<2x1xf32>
    %202 = vector.shape_cast %201 : vector<2x1xf32> to vector<1x2x1xf32>
    %203 = vector.broadcast %202 : vector<1x2x1xf32> to vector<8x2x18xf32>
    %204 = arith.mulf %203, %11 : vector<8x2x18xf32>
    %205 = arith.addf %199, %204 : vector<8x2x18xf32>
    %206 = vector.extract_strided_slice %16 {offsets = [2, 5, 0, 0], sizes = [1, 1, 2, 1], strides = [1, 1, 1, 1]} : vector<4x9x2x1xf32> to vector<1x1x2x1xf32>
    %207 = vector.shape_cast %206 : vector<1x1x2x1xf32> to vector<2x1xf32>
    %208 = vector.shape_cast %207 : vector<2x1xf32> to vector<1x2x1xf32>
    %209 = vector.broadcast %208 : vector<1x2x1xf32> to vector<8x2x18xf32>
    %210 = arith.mulf %209, %12 : vector<8x2x18xf32>
    %211 = arith.addf %205, %210 : vector<8x2x18xf32>
    %212 = vector.extract_strided_slice %16 {offsets = [2, 6, 0, 0], sizes = [1, 1, 2, 1], strides = [1, 1, 1, 1]} : vector<4x9x2x1xf32> to vector<1x1x2x1xf32>
    %213 = vector.shape_cast %212 : vector<1x1x2x1xf32> to vector<2x1xf32>
    %214 = vector.shape_cast %213 : vector<2x1xf32> to vector<1x2x1xf32>
    %215 = vector.broadcast %214 : vector<1x2x1xf32> to vector<8x2x18xf32>
    %216 = arith.mulf %215, %13 : vector<8x2x18xf32>
    %217 = arith.addf %211, %216 : vector<8x2x18xf32>
    %218 = vector.extract_strided_slice %16 {offsets = [2, 7, 0, 0], sizes = [1, 1, 2, 1], strides = [1, 1, 1, 1]} : vector<4x9x2x1xf32> to vector<1x1x2x1xf32>
    %219 = vector.shape_cast %218 : vector<1x1x2x1xf32> to vector<2x1xf32>
    %220 = vector.shape_cast %219 : vector<2x1xf32> to vector<1x2x1xf32>
    %221 = vector.broadcast %220 : vector<1x2x1xf32> to vector<8x2x18xf32>
    %222 = arith.mulf %221, %14 : vector<8x2x18xf32>
    %223 = arith.addf %217, %222 : vector<8x2x18xf32>
    %224 = vector.extract_strided_slice %16 {offsets = [2, 8, 0, 0], sizes = [1, 1, 2, 1], strides = [1, 1, 1, 1]} : vector<4x9x2x1xf32> to vector<1x1x2x1xf32>
    %225 = vector.shape_cast %224 : vector<1x1x2x1xf32> to vector<2x1xf32>
    %226 = vector.shape_cast %225 : vector<2x1xf32> to vector<1x2x1xf32>
    %227 = vector.broadcast %226 : vector<1x2x1xf32> to vector<8x2x18xf32>
    %228 = arith.mulf %227, %15 : vector<8x2x18xf32>
    %229 = arith.addf %223, %228 : vector<8x2x18xf32>
    %230 = vector.extract_strided_slice %229 {offsets = [0, 0, 0], sizes = [1, 2, 18], strides = [1, 1, 1]} : vector<8x2x18xf32> to vector<1x2x18xf32>
    %231 = vector.shape_cast %230 : vector<1x2x18xf32> to vector<2x18xf32>
    %c0_26 = arith.constant 0 : index
    %c288 = arith.constant 288 : index
    %232 = vector.load %arg8[%c0_26, %c288] : memref<2x576xf32, #tpu.memory_space<vmem>>, vector<2x18xf32>
    tpu.vector_store %arg8[%c0_26, %c288], %231 {strides = array<i32>} : memref<2x576xf32, #tpu.memory_space<vmem>>, vector<2x18xf32>,
    %233 = vector.extract_strided_slice %229 {offsets = [1, 0, 0], sizes = [1, 2, 18], strides = [1, 1, 1]} : vector<8x2x18xf32> to vector<1x2x18xf32>
    %234 = vector.shape_cast %233 : vector<1x2x18xf32> to vector<2x18xf32>
    %c0_27 = arith.constant 0 : index
    %c306 = arith.constant 306 : index
    %235 = vector.load %arg8[%c0_27, %c306] : memref<2x576xf32, #tpu.memory_space<vmem>>, vector<2x18xf32>
    tpu.vector_store %arg8[%c0_27, %c306], %234 {strides = array<i32>} : memref<2x576xf32, #tpu.memory_space<vmem>>, vector<2x18xf32>,
    %236 = vector.extract_strided_slice %229 {offsets = [2, 0, 0], sizes = [1, 2, 18], strides = [1, 1, 1]} : vector<8x2x18xf32> to vector<1x2x18xf32>
    %237 = vector.shape_cast %236 : vector<1x2x18xf32> to vector<2x18xf32>
    %c0_28 = arith.constant 0 : index
    %c324 = arith.constant 324 : index
    %238 = vector.load %arg8[%c0_28, %c324] : memref<2x576xf32, #tpu.memory_space<vmem>>, vector<2x18xf32>
    tpu.vector_store %arg8[%c0_28, %c324], %237 {strides = array<i32>} : memref<2x576xf32, #tpu.memory_space<vmem>>, vector<2x18xf32>,
    %239 = vector.extract_strided_slice %229 {offsets = [3, 0, 0], sizes = [1, 2, 18], strides = [1, 1, 1]} : vector<8x2x18xf32> to vector<1x2x18xf32>
    %240 = vector.shape_cast %239 : vector<1x2x18xf32> to vector<2x18xf32>
    %c0_29 = arith.constant 0 : index
    %c342 = arith.constant 342 : index
    %241 = vector.load %arg8[%c0_29, %c342] : memref<2x576xf32, #tpu.memory_space<vmem>>, vector<2x18xf32>
    tpu.vector_store %arg8[%c0_29, %c342], %240 {strides = array<i32>} : memref<2x576xf32, #tpu.memory_space<vmem>>, vector<2x18xf32>,
    %242 = vector.extract_strided_slice %229 {offsets = [4, 0, 0], sizes = [1, 2, 18], strides = [1, 1, 1]} : vector<8x2x18xf32> to vector<1x2x18xf32>
    %243 = vector.shape_cast %242 : vector<1x2x18xf32> to vector<2x18xf32>
    %c0_30 = arith.constant 0 : index
    %c360 = arith.constant 360 : index
    %244 = vector.load %arg8[%c0_30, %c360] : memref<2x576xf32, #tpu.memory_space<vmem>>, vector<2x18xf32>
    tpu.vector_store %arg8[%c0_30, %c360], %243 {strides = array<i32>} : memref<2x576xf32, #tpu.memory_space<vmem>>, vector<2x18xf32>,
    %245 = vector.extract_strided_slice %229 {offsets = [5, 0, 0], sizes = [1, 2, 18], strides = [1, 1, 1]} : vector<8x2x18xf32> to vector<1x2x18xf32>
    %246 = vector.shape_cast %245 : vector<1x2x18xf32> to vector<2x18xf32>
    %c0_31 = arith.constant 0 : index
    %c378 = arith.constant 378 : index
    %247 = vector.load %arg8[%c0_31, %c378] : memref<2x576xf32, #tpu.memory_space<vmem>>, vector<2x18xf32>
    tpu.vector_store %arg8[%c0_31, %c378], %246 {strides = array<i32>} : memref<2x576xf32, #tpu.memory_space<vmem>>, vector<2x18xf32>,
    %248 = vector.extract_strided_slice %229 {offsets = [6, 0, 0], sizes = [1, 2, 18], strides = [1, 1, 1]} : vector<8x2x18xf32> to vector<1x2x18xf32>
    %249 = vector.shape_cast %248 : vector<1x2x18xf32> to vector<2x18xf32>
    %c0_32 = arith.constant 0 : index
    %c396 = arith.constant 396 : index
    %250 = vector.load %arg8[%c0_32, %c396] : memref<2x576xf32, #tpu.memory_space<vmem>>, vector<2x18xf32>
    tpu.vector_store %arg8[%c0_32, %c396], %249 {strides = array<i32>} : memref<2x576xf32, #tpu.memory_space<vmem>>, vector<2x18xf32>,
    %251 = vector.extract_strided_slice %229 {offsets = [7, 0, 0], sizes = [1, 2, 18], strides = [1, 1, 1]} : vector<8x2x18xf32> to vector<1x2x18xf32>
    %252 = vector.shape_cast %251 : vector<1x2x18xf32> to vector<2x18xf32>
    %c0_33 = arith.constant 0 : index
    %c414 = arith.constant 414 : index
    %253 = vector.load %arg8[%c0_33, %c414] : memref<2x576xf32, #tpu.memory_space<vmem>>, vector<2x18xf32>
    tpu.vector_store %arg8[%c0_33, %c414], %252 {strides = array<i32>} : memref<2x576xf32, #tpu.memory_space<vmem>>, vector<2x18xf32>,
    %cst_34 = arith.constant 0.000000e+00 : f32
    %254 = vector.broadcast %cst_34 : f32 to vector<8x2x18xf32>
    %255 = vector.extract_strided_slice %16 {offsets = [3, 0, 0, 0], sizes = [1, 1, 2, 1], strides = [1, 1, 1, 1]} : vector<4x9x2x1xf32> to vector<1x1x2x1xf32>
    %256 = vector.shape_cast %255 : vector<1x1x2x1xf32> to vector<2x1xf32>
    %257 = vector.shape_cast %256 : vector<2x1xf32> to vector<1x2x1xf32>
    %258 = vector.broadcast %257 : vector<1x2x1xf32> to vector<8x2x18xf32>
    %259 = arith.mulf %258, %7 : vector<8x2x18xf32>
    %260 = arith.addf %254, %259 : vector<8x2x18xf32>
    %261 = vector.extract_strided_slice %16 {offsets = [3, 1, 0, 0], sizes = [1, 1, 2, 1], strides = [1, 1, 1, 1]} : vector<4x9x2x1xf32> to vector<1x1x2x1xf32>
    %262 = vector.shape_cast %261 : vector<1x1x2x1xf32> to vector<2x1xf32>
    %263 = vector.shape_cast %262 : vector<2x1xf32> to vector<1x2x1xf32>
    %264 = vector.broadcast %263 : vector<1x2x1xf32> to vector<8x2x18xf32>
    %265 = arith.mulf %264, %8 : vector<8x2x18xf32>
    %266 = arith.addf %260, %265 : vector<8x2x18xf32>
    %267 = vector.extract_strided_slice %16 {offsets = [3, 2, 0, 0], sizes = [1, 1, 2, 1], strides = [1, 1, 1, 1]} : vector<4x9x2x1xf32> to vector<1x1x2x1xf32>
    %268 = vector.shape_cast %267 : vector<1x1x2x1xf32> to vector<2x1xf32>
    %269 = vector.shape_cast %268 : vector<2x1xf32> to vector<1x2x1xf32>
    %270 = vector.broadcast %269 : vector<1x2x1xf32> to vector<8x2x18xf32>
    %271 = arith.mulf %270, %9 : vector<8x2x18xf32>
    %272 = arith.addf %266, %271 : vector<8x2x18xf32>
    %273 = vector.extract_strided_slice %16 {offsets = [3, 3, 0, 0], sizes = [1, 1, 2, 1], strides = [1, 1, 1, 1]} : vector<4x9x2x1xf32> to vector<1x1x2x1xf32>
    %274 = vector.shape_cast %273 : vector<1x1x2x1xf32> to vector<2x1xf32>
    %275 = vector.shape_cast %274 : vector<2x1xf32> to vector<1x2x1xf32>
    %276 = vector.broadcast %275 : vector<1x2x1xf32> to vector<8x2x18xf32>
    %277 = arith.mulf %276, %10 : vector<8x2x18xf32>
    %278 = arith.addf %272, %277 : vector<8x2x18xf32>
    %279 = vector.extract_strided_slice %16 {offsets = [3, 4, 0, 0], sizes = [1, 1, 2, 1], strides = [1, 1, 1, 1]} : vector<4x9x2x1xf32> to vector<1x1x2x1xf32>
    %280 = vector.shape_cast %279 : vector<1x1x2x1xf32> to vector<2x1xf32>
    %281 = vector.shape_cast %280 : vector<2x1xf32> to vector<1x2x1xf32>
    %282 = vector.broadcast %281 : vector<1x2x1xf32> to vector<8x2x18xf32>
    %283 = arith.mulf %282, %11 : vector<8x2x18xf32>
    %284 = arith.addf %278, %283 : vector<8x2x18xf32>
    %285 = vector.extract_strided_slice %16 {offsets = [3, 5, 0, 0], sizes = [1, 1, 2, 1], strides = [1, 1, 1, 1]} : vector<4x9x2x1xf32> to vector<1x1x2x1xf32>
    %286 = vector.shape_cast %285 : vector<1x1x2x1xf32> to vector<2x1xf32>
    %287 = vector.shape_cast %286 : vector<2x1xf32> to vector<1x2x1xf32>
    %288 = vector.broadcast %287 : vector<1x2x1xf32> to vector<8x2x18xf32>
    %289 = arith.mulf %288, %12 : vector<8x2x18xf32>
    %290 = arith.addf %284, %289 : vector<8x2x18xf32>
    %291 = vector.extract_strided_slice %16 {offsets = [3, 6, 0, 0], sizes = [1, 1, 2, 1], strides = [1, 1, 1, 1]} : vector<4x9x2x1xf32> to vector<1x1x2x1xf32>
    %292 = vector.shape_cast %291 : vector<1x1x2x1xf32> to vector<2x1xf32>
    %293 = vector.shape_cast %292 : vector<2x1xf32> to vector<1x2x1xf32>
    %294 = vector.broadcast %293 : vector<1x2x1xf32> to vector<8x2x18xf32>
    %295 = arith.mulf %294, %13 : vector<8x2x18xf32>
    %296 = arith.addf %290, %295 : vector<8x2x18xf32>
    %297 = vector.extract_strided_slice %16 {offsets = [3, 7, 0, 0], sizes = [1, 1, 2, 1], strides = [1, 1, 1, 1]} : vector<4x9x2x1xf32> to vector<1x1x2x1xf32>
    %298 = vector.shape_cast %297 : vector<1x1x2x1xf32> to vector<2x1xf32>
    %299 = vector.shape_cast %298 : vector<2x1xf32> to vector<1x2x1xf32>
    %300 = vector.broadcast %299 : vector<1x2x1xf32> to vector<8x2x18xf32>
    %301 = arith.mulf %300, %14 : vector<8x2x18xf32>
    %302 = arith.addf %296, %301 : vector<8x2x18xf32>
    %303 = vector.extract_strided_slice %16 {offsets = [3, 8, 0, 0], sizes = [1, 1, 2, 1], strides = [1, 1, 1, 1]} : vector<4x9x2x1xf32> to vector<1x1x2x1xf32>
    %304 = vector.shape_cast %303 : vector<1x1x2x1xf32> to vector<2x1xf32>
    %305 = vector.shape_cast %304 : vector<2x1xf32> to vector<1x2x1xf32>
    %306 = vector.broadcast %305 : vector<1x2x1xf32> to vector<8x2x18xf32>
    %307 = arith.mulf %306, %15 : vector<8x2x18xf32>
    %308 = arith.addf %302, %307 : vector<8x2x18xf32>
    %309 = vector.extract_strided_slice %308 {offsets = [0, 0, 0], sizes = [1, 2, 18], strides = [1, 1, 1]} : vector<8x2x18xf32> to vector<1x2x18xf32>
    %310 = vector.shape_cast %309 : vector<1x2x18xf32> to vector<2x18xf32>
    %c0_35 = arith.constant 0 : index
    %c432 = arith.constant 432 : index
    %311 = vector.load %arg8[%c0_35, %c432] : memref<2x576xf32, #tpu.memory_space<vmem>>, vector<2x18xf32>
    tpu.vector_store %arg8[%c0_35, %c432], %310 {strides = array<i32>} : memref<2x576xf32, #tpu.memory_space<vmem>>, vector<2x18xf32>,
    %312 = vector.extract_strided_slice %308 {offsets = [1, 0, 0], sizes = [1, 2, 18], strides = [1, 1, 1]} : vector<8x2x18xf32> to vector<1x2x18xf32>
    %313 = vector.shape_cast %312 : vector<1x2x18xf32> to vector<2x18xf32>
    %c0_36 = arith.constant 0 : index
    %c450 = arith.constant 450 : index
    %314 = vector.load %arg8[%c0_36, %c450] : memref<2x576xf32, #tpu.memory_space<vmem>>, vector<2x18xf32>
    tpu.vector_store %arg8[%c0_36, %c450], %313 {strides = array<i32>} : memref<2x576xf32, #tpu.memory_space<vmem>>, vector<2x18xf32>,
    %315 = vector.extract_strided_slice %308 {offsets = [2, 0, 0], sizes = [1, 2, 18], strides = [1, 1, 1]} : vector<8x2x18xf32> to vector<1x2x18xf32>
    %316 = vector.shape_cast %315 : vector<1x2x18xf32> to vector<2x18xf32>
    %c0_37 = arith.constant 0 : index
    %c468 = arith.constant 468 : index
    %317 = vector.load %arg8[%c0_37, %c468] : memref<2x576xf32, #tpu.memory_space<vmem>>, vector<2x18xf32>
    tpu.vector_store %arg8[%c0_37, %c468], %316 {strides = array<i32>} : memref<2x576xf32, #tpu.memory_space<vmem>>, vector<2x18xf32>,
    %318 = vector.extract_strided_slice %308 {offsets = [3, 0, 0], sizes = [1, 2, 18], strides = [1, 1, 1]} : vector<8x2x18xf32> to vector<1x2x18xf32>
    %319 = vector.shape_cast %318 : vector<1x2x18xf32> to vector<2x18xf32>
    %c0_38 = arith.constant 0 : index
    %c486 = arith.constant 486 : index
    %320 = vector.load %arg8[%c0_38, %c486] : memref<2x576xf32, #tpu.memory_space<vmem>>, vector<2x18xf32>
    tpu.vector_store %arg8[%c0_38, %c486], %319 {strides = array<i32>} : memref<2x576xf32, #tpu.memory_space<vmem>>, vector<2x18xf32>,
    %321 = vector.extract_strided_slice %308 {offsets = [4, 0, 0], sizes = [1, 2, 18], strides = [1, 1, 1]} : vector<8x2x18xf32> to vector<1x2x18xf32>
    %322 = vector.shape_cast %321 : vector<1x2x18xf32> to vector<2x18xf32>
    %c0_39 = arith.constant 0 : index
    %c504 = arith.constant 504 : index
    %323 = vector.load %arg8[%c0_39, %c504] : memref<2x576xf32, #tpu.memory_space<vmem>>, vector<2x18xf32>
    tpu.vector_store %arg8[%c0_39, %c504], %322 {strides = array<i32>} : memref<2x576xf32, #tpu.memory_space<vmem>>, vector<2x18xf32>,
    %324 = vector.extract_strided_slice %308 {offsets = [5, 0, 0], sizes = [1, 2, 18], strides = [1, 1, 1]} : vector<8x2x18xf32> to vector<1x2x18xf32>
    %325 = vector.shape_cast %324 : vector<1x2x18xf32> to vector<2x18xf32>
    %c0_40 = arith.constant 0 : index
    %c522 = arith.constant 522 : index
    %326 = vector.load %arg8[%c0_40, %c522] : memref<2x576xf32, #tpu.memory_space<vmem>>, vector<2x18xf32>
    tpu.vector_store %arg8[%c0_40, %c522], %325 {strides = array<i32>} : memref<2x576xf32, #tpu.memory_space<vmem>>, vector<2x18xf32>,
    %327 = vector.extract_strided_slice %308 {offsets = [6, 0, 0], sizes = [1, 2, 18], strides = [1, 1, 1]} : vector<8x2x18xf32> to vector<1x2x18xf32>
    %328 = vector.shape_cast %327 : vector<1x2x18xf32> to vector<2x18xf32>
    %c0_41 = arith.constant 0 : index
    %c540 = arith.constant 540 : index
    %329 = vector.load %arg8[%c0_41, %c540] : memref<2x576xf32, #tpu.memory_space<vmem>>, vector<2x18xf32>
    tpu.vector_store %arg8[%c0_41, %c540], %328 {strides = array<i32>} : memref<2x576xf32, #tpu.memory_space<vmem>>, vector<2x18xf32>,
    %330 = vector.extract_strided_slice %308 {offsets = [7, 0, 0], sizes = [1, 2, 18], strides = [1, 1, 1]} : vector<8x2x18xf32> to vector<1x2x18xf32>
    %331 = vector.shape_cast %330 : vector<1x2x18xf32> to vector<2x18xf32>
    %c0_42 = arith.constant 0 : index
    %c558 = arith.constant 558 : index
    %332 = vector.load %arg8[%c0_42, %c558] : memref<2x576xf32, #tpu.memory_space<vmem>>, vector<2x18xf32>
    tpu.vector_store %arg8[%c0_42, %c558], %331 {strides = array<i32>} : memref<2x576xf32, #tpu.memory_space<vmem>>, vector<2x18xf32>,
    %c0_43 = arith.constant 0 : index
    %c0_44 = arith.constant 0 : index
    %333 = vector.load %arg8[%c0_43, %c0_44] : memref<2x576xf32, #tpu.memory_space<vmem>>, vector<2x576xf32>
    %c0_45 = arith.constant 0 : index
    %c0_46 = arith.constant 0 : index
    %334 = vector.load %arg3[%c0_45, %c0_46] : memref<576x200xf32, #tpu.memory_space<vmem>>, vector<576x200xf32>
    %cst_47 = arith.constant dense<0.000000e+00> : vector<2x200xf32>
    %335 = tpu.matmul %333, %334, %cst_47 {dimension_numbers = #tpu.dot_dimension_numbers<[1], [0], [0], [1], [0, 0, 1, 1], [], []>} : vector<2x576xf32>, vector<576x200xf32>, vector<2x200xf32> -> vector<2x200xf32>
    %c0_48 = arith.constant 0 : index
    %c0_49 = arith.constant 0 : index
    %336 = vector.load %arg4[%c0_48, %c0_49] : memref<1x200xf32, #tpu.memory_space<vmem>>, vector<1x200xf32>
    %337 = vector.broadcast %336 : vector<1x200xf32> to vector<2x200xf32>
    %338 = arith.addf %335, %337 : vector<2x200xf32>
    %cst_50 = arith.constant 0.000000e+00 : f32
    %339 = vector.broadcast %cst_50 : f32 to vector<2x200xf32>
    %340 = arith.maximumf %338, %339 : vector<2x200xf32>
    %c0_51 = arith.constant 0 : index
    %c0_52 = arith.constant 0 : index
    %341 = vector.load %arg5[%c0_51, %c0_52] : memref<200x256xf32, #tpu.memory_space<vmem>>, vector<200x256xf32>
    %cst_53 = arith.constant dense<0.000000e+00> : vector<2x256xf32>
    %342 = tpu.matmul %340, %341, %cst_53 {dimension_numbers = #tpu.dot_dimension_numbers<[1], [0], [0], [1], [0, 0, 1, 1], [], []>} : vector<2x200xf32>, vector<200x256xf32>, vector<2x256xf32> -> vector<2x256xf32>
    %c0_54 = arith.constant 0 : index
    %c0_55 = arith.constant 0 : index
    %343 = vector.load %arg6[%c0_54, %c0_55] : memref<1x256xf32, #tpu.memory_space<vmem>>, vector<1x256xf32>
    %344 = vector.broadcast %343 : vector<1x256xf32> to vector<2x256xf32>
    %345 = arith.addf %342, %344 : vector<2x256xf32>
    %cst_56 = arith.constant 0.000000e+00 : f32
    %346 = vector.broadcast %cst_56 : f32 to vector<2x256xf32>
    %347 = arith.subf %346, %345 : vector<2x256xf32>
    %348 = math.exp %347 : vector<2x256xf32>
    %cst_57 = arith.constant 1.000000e+00 : f32
    %349 = vector.broadcast %cst_57 : f32 to vector<2x256xf32>
    %350 = arith.addf %349, %348 : vector<2x256xf32>
    %cst_58 = arith.constant 1.000000e+00 : f32
    %351 = vector.broadcast %cst_58 : f32 to vector<2x256xf32>
    %352 = arith.divf %351, %350 : vector<2x256xf32>
    %c0_59 = arith.constant 0 : index
    %c0_60 = arith.constant 0 : index
    %353 = vector.load %arg7[%c0_59, %c0_60] : memref<2x256xf32, #tpu.memory_space<vmem>>, vector<2x256xf32>
    tpu.vector_store %arg7[%c0_59, %c0_60], %352 {strides = array<i32>} : memref<2x256xf32, #tpu.memory_space<vmem>>, vector<2x256xf32>,
    return
  }
}

</mosaic_0001>

<bundles_post_ra>
// kernel: hype_forward.1
= control target key start
LH: loop header
LB: loop body
LE: loop exit
PB: predicated region body
PF: predicated region fallthrough
CT: control target
= control target key end

     0   :  { %12 = vsyncpa [#allocation5], 0  ;;  %s5291_s0 = inlined_call_operand.vmem [shape: f32[10,2,20], index: 0, kind: input, shape index: {}]   ;;  %s5292_s1 = inlined_call_operand.vmem [shape: f32[4,9,2,1], index: 1, kind: input, shape index: {}]   ;;  %s5293_s2 = inlined_call_operand.vmem [shape: f32[2], index: 2, kind: input, shape index: {}]   ;;  %s5294_s3 = inlined_call_operand.vmem [shape: f32[576,200], index: 3, kind: input, shape index: {}]   ;;  %s5295_s4 = inlined_call_operand.vmem [shape: f32[1,200], index: 4, kind: input, shape index: {}]   ;;  %s5296_s5 = inlined_call_operand.vmem [shape: f32[200,256], index: 5, kind: input, shape index: {}]   ;;  %s5297_s6 = inlined_call_operand.vmem [shape: f32[1,256], index: 6, kind: input, shape index: {}]   ;;  %s5298_s7 = inlined_call_operand.hbm [shape: f32[2,256], index: 7, kind: output, shape index: {}]  }
   0x1   :  { %13 = vsyncpa [#allocation4], 0  ;;  %s24_s26 = sshll.u32 %s5293_s2, 4  ;;  %s25_s26 = int_to_ptr.vmem [resolvable:$true] %s24_s26 }
   0x2   :  { %s2892_s27 = scalar_lea.vmem %s25_s26, 16  ;;  %p2897_p1 = scmp.lt.s32.totalorder %s25_s26, %s25_s26 }
   0x3   :  { %p2893_p0 = scmp.ne.s32.totalorder %s25_s26, %s2892_s27  ;;  %p2898_p2 = scmp.lt.s32.totalorder %s2892_s27, %s2892_s27 }
   0x5   :  { %p2899_p3 = por %p2898_p2, %p2897_p1 }
   0x7   :  { %p2900_p4 = pnand %p2899_p3, %p2893_p0 }
   0x9   :  { %2903 = shalt.err (!%p2900_p4)
}
   0xa   :  { %s2930_s28 = smov [#allocation3]  }
   0xb   :  { %27 = dma.vmem_to_smem %s25_s26, 16, %s2930_s28, [#allocation5]  }
   0xc   :  { %2926 = dma.done.wait [#allocation5], 16  }
   0xd   :  { %2927 = vsyncadd [#allocation5], 4294967280 }
   0xe   :  { %39 = sfence }
   0xf   :  { %v78_v0 = vld [vmem:[%s5292_s1 + $0x8] sm:$0x3]  ;;  %v75_v1 = vld [vmem:[%s5292_s1 + $0x2] sm:$0x3]  ;;  %v2931_v2 = vmov 0   ;;  %s50_s21 = sld [smem:[#allocation3]] }
  0x10   :  { %2882 = vset.pattern.permute.xlu1 %v2931_v2  ;;  %2881 = vset.pattern.permute.xlu0 %v2931_v2  ;;  %v84_v3 = vld [vmem:[%s5292_s1 + $0x14] sm:$0x3]  ;;  %v76_v4 = vld [vmem:[%s5292_s1 + $0x4] sm:$0x3]  ;;  %v85_v5 = vld [vmem:[%s5292_s1 + $0x16] sm:$0x3] }
  0x11   :  { %260 = vperm.xlu1 %2882, %v78_v0   ;;  %133 = vperm.xlu0 %2881, %v75_v1   ;;  %v79_v6 = vld [vmem:[%s5292_s1 + $0xa] sm:$0x3]  ;;  %v87_v7 = vld [vmem:[%s5292_s1 + $0x1a] sm:$0x3]  ;;  %v81_v8 = vld [vmem:[%s5292_s1 + $0xe] sm:$0x3] }
  0x12   :  { %v88_v9 = vld [vmem:[%s5292_s1 + $0x1c] sm:$0x3]  ;;  %v82_v10 = vld [vmem:[%s5292_s1 + $0x10] sm:$0x3]  ;;  %s2641_s26 = sld [smem:[#allocation3 + $0x1]]  ;;  %s2932_s13 = smov 127  }
  0x13   :  { %v94_v11 = vld [vmem:[%s5292_s1 + $0x28] sm:$0x3]  ;;  %v93_v12 = vld [vmem:[%s5292_s1 + $0x26] sm:$0x3]  ;;  %v49_v13 = vld [vmem:[%s5291_s0 + $0x12] sm:$0x3] }
  0x14   :  { %v91_v16 = vld [vmem:[%s5292_s1 + $0x22] sm:$0x3]  ;;  %v90_v17 = vld [vmem:[%s5292_s1 + $0x20] sm:$0x3]  ;;  %v97_v20 = vld [vmem:[%s5292_s1 + $0x2e] sm:$0x3] }
  0x15   :  { %612 = vperm.xlu1 %2882, %v84_v3   ;;  %186 = vperm.xlu0 %2881, %v76_v4   ;;  %v3049_v14 = vstv %s50_s21  ;;  %v96_v21 = vld [vmem:[%s5292_s1 + $0x2c] sm:$0x3]  ;;  %v103_v22 = vld [vmem:[%s5292_s1 + $0x3a] sm:$0x3]  ;;  %v102_v23 = vld [vmem:[%s5292_s1 + $0x38] sm:$0x3] }
  0x16   :  { %v61_v15 = vmul.f32 %v3049_v14, %v49_v13  ;;  %v100_v24 = vld [vmem:[%s5292_s1 + $0x34] sm:$0x3]  ;;  %v99_v25 = vld [vmem:[%s5292_s1 + $0x32] sm:$0x3]  ;;  %v106_v26 = vld [vmem:[%s5292_s1 + $0x40] sm:$0x3] }
  0x17   :  { %v105_v27 = vld [vmem:[%s5292_s1 + $0x3e] sm:$0x3]  ;;  %v109_v28 = vld [vmem:[%s5292_s1 + $0x46] sm:$0x3]  ;;  %v108_v29 = vld [vmem:[%s5292_s1 + $0x44] sm:$0x3] }
  0x18   :  { %v3058_v18 = vstv %s2641_s26  ;;  %v77_v30 = vld [vmem:[%s5292_s1 + $0x6] sm:$0x3]  ;;  %v74_v31 = vld [vmem:[%s5292_s1] sm:$0x3]  ;;  %v80_v32 = vld [vmem:[%s5292_s1 + $0xc] sm:$0x3] }
  0x19   :  { %665 = vperm.xlu1 %2882, %v85_v5   ;;  %313 = vperm.xlu0 %2881, %v79_v6   ;;  %v3061_v19 = vadd.f32 %v3058_v18, %v61_v15  ;;  %v83_v33 = vld [vmem:[%s5292_s1 + $0x12] sm:$0x3]  ;;  %v92_v34 = vld [vmem:[%s5292_s1 + $0x24] sm:$0x3]  ;;  %v86_v35 = vld [vmem:[%s5292_s1 + $0x18] sm:$0x3] }
  0x1a   :  { %v95_v36 = vld [vmem:[%s5292_s1 + $0x2a] sm:$0x3]  ;;  %v89_v37 = vld [vmem:[%s5292_s1 + $0x1e] sm:$0x3]  ;;  %v42_v38 = vld [vmem:[%s5291_s0 + $0x4] sm:$0x3] }
  0x1b   :  { %v41_v39 = vld [vmem:[%s5291_s0 + $0x2] sm:$0x3]  ;;  %v54_v40 = vmul.f32 %v3049_v14, %v42_v38  ;;  %v43_v42 = vld [vmem:[%s5291_s0 + $0x6] sm:$0x3]  ;;  %v47_v46 = vld [vmem:[%s5291_s0 + $0xe] sm:$0x3] }
  0x1c   :  { %v53_v41 = vmul.f32 %v3049_v14, %v41_v39  ;;  %v55_v45 = vmul.f32 %v3049_v14, %v43_v42  ;;  %v44_v47 = vld [vmem:[%s5291_s0 + $0x8] sm:$0x3]  ;;  %v59_v49 = vmul.f32 %v3049_v14, %v47_v46  ;;  %v45_v54 = vld [vmem:[%s5291_s0 + $0xa] sm:$0x3]  ;;  %v46_v61 = vld [vmem:[%s5291_s0 + $0xc] sm:$0x3] }
  0x1d   :  { %739 = vperm.xlu1 %2882, %v87_v7   ;;  %387 = vperm.xlu0 %2881, %v81_v8   ;;  %v3129_v43 = vadd.f32 %v3058_v18, %v54_v40  ;;  %v56_v53 = vmul.f32 %v3049_v14, %v44_v47  ;;  %v57_v56 = vmul.f32 %v3049_v14, %v45_v54  ;;  %s2933_s16 = smov 126   ;;  %s2936_s28 = smov 18   ;;  %vm491_vm0 = vcmask 140288  }
  0x1e   :  { %v3132_v44 = vadd.f32 %v3058_v18, %v53_v41  ;;  %v3149_v52 = vadd.f32 %v3058_v18, %v55_v45  ;;  %v3165_v59 = vadd.f32 %v3058_v18, %v59_v49  ;;  %v58_v1 = vmul.f32 %v3049_v14, %v46_v61  ;;  %s2937_s29 = smov 72   ;;  %s2938_s30 = smov 54  }
  0x1f   :  { %v3168_v60 = vadd.f32 %v3058_v18, %v56_v53  ;;  %v3180_v0 = vadd.f32 %v3058_v18, %v57_v56  ;;  %s2939_s8 = smov 90   ;;  %s2940_s9 = smov 16   ;;  %vm504_vm1 = vcmask 287888   ;;  %vm517_vm2 = vcmask 435488  }
  0x20   :  { %5322 = vst [vmem:[#allocation9_spill] sm:$0xff] %v3165_v59  ;;  %v3190_v4 = vadd.f32 %v3058_v18, %v58_v1  ;;  %s2941_s2 = smov 108   ;;  %s2942_s10 = smov 52   ;;  %vm530_vm3 = vcmask 583088   ;;  %vm543_vm4 = vcmask 730688   ;;  %vm556_vm5 = vcmask 878288  }
  0x21   :  { %792 = vperm.xlu1 %2882, %v88_v9   ;;  %440 = vperm.xlu0 %2881, %v82_v10   ;;  %5323 = vst [vmem:[#allocation10_spill] sm:$0xff] %v3168_v60  ;;  %5324 = vst [vmem:[#allocation11_spill] sm:$0xff] %v3180_v0  ;;  %s2943_s11 = smov 34   ;;  %s2944_s20 = smov 124   ;;  %vm585_vm6 = vcmask 1042416   ;;  %vm586_vm7 = vcmask 125954  }
  0x22   :  { %5325 = vst [vmem:[#allocation12_spill] sm:$0xff] %v3190_v4  ;;  %s2950_s21 = smov 68   ;;  %s2951_s22 = smov 50   ;;  %vm582_vm8 = vcmask 1031168   ;;  %vm569_vm9 = vcmask 1025888   ;;  %vm587_vm10 = vmor %vm586_vm7, %vm585_vm6  ;;  %vm981_vm11 = vcmask 271488  }
  0x23   :  { %s2952_s14 = smov 122   ;;  %s2953_s26 = smov 86   ;;  %vm994_vm12 = vcmask 419088   ;;  %vm1007_vm13 = vcmask 566688   ;;  %vm1020_vm14 = vcmask 714288   ;;  %vm1062_vm15 = vcmask 1042400  }
  0x24   :  { %vm1471_vm6 = vcmask 402688   ;;  %vm1484_vm7 = vcmask 550288  }
  0x25   :  { %1155 = vperm.xlu1 %2882, %v94_v11   ;;  %1102 = vperm.xlu0 %2881, %v93_v12   ;;  %v40_v11 = vld [vmem:[%s5291_s0] sm:$0x3] }
  0x26   :  { %v52_v13 = vmul.f32 %v3049_v14, %v40_v11 }
  0x29   :  { %919 = vperm.xlu1 %2882, %v91_v16   ;;  %866 = vperm.xlu0 %2881, %v90_v17  }
  0x2d   :  { %1282 = vperm.xlu1 %2882, %v97_v20   ;;  %1229 = vperm.xlu0 %2881, %v96_v21   ;;  %v3227_v20 = vadd.f32 %v3058_v18, %v52_v13  ;;  %v48_v21 = vld [vmem:[%s5291_s0 + $0x10] sm:$0x3]  ;;  %s2945_s0 = smov 70  }
  0x2f   :  { %5326 = vst [vmem:[#allocation13_spill] sm:$0xff] %v3227_v20 }
  0x31   :  { %1645 = vperm.xlu1 %2882, %v103_v22   ;;  %1592 = vperm.xlu0 %2881, %v102_v23  }
  0x35   :  { %1409 = vperm.xlu1 %2882, %v100_v24   ;;  %1356 = vperm.xlu0 %2881, %v99_v25  }
  0x39   :  { %1772 = vperm.xlu1 %2882, %v106_v26   ;;  %1719 = vperm.xlu0 %2881, %v105_v27   ;;  %v60_v26 = vmul.f32 %v3049_v14, %v48_v21 }
  0x3d   :  { %1899 = vperm.xlu1 %2882, %v109_v28   ;;  %1846 = vperm.xlu0 %2881, %v108_v29   ;;  %v3250_v29 = vadd.f32 %v3058_v18, %v60_v26 }
  0x41   :  { %239 = vperm.xlu1 %2882, %v77_v30   ;;  %112 = vperm.xlu0 %2881, %v74_v31  }
  0x45   :  { %366 = vperm.xlu1 %2882, %v80_v32   ;;  %591 = vperm.xlu0 %2881, %v83_v33  }
  0x49   :  { %1081 = vperm.xlu1 %2882, %v92_v34   ;;  %718 = vperm.xlu0 %2881, %v86_v35  }
  0x4d   :  { %1208 = vperm.xlu1 %2882, %v95_v36   ;;  %845 = vperm.xlu0 %2881, %v89_v37  }
  0x90   :  { %v3141_v48 = vpop.permute.xlu0 %133  ;;  %v3204_v9 = vpop.permute.xlu1 %260 }
  0x91   :  { %v138_v50 = vmul.f32 %v3141_v48, %v3129_v43  ;;  %v137_v51 = vmul.f32 %v3141_v48, %v3132_v44  ;;  %v139_v57 = vmul.f32 %v3141_v48, %v3149_v52  ;;  %v143_v62 = vmul.f32 %v3141_v48, %v3165_v59 }
  0x92   :  { %v140_v63 = vmul.f32 %v3141_v48, %v3168_v60  ;;  %v141_v2 = vmul.f32 %v3141_v48, %v3180_v0  ;;  %v142_v5 = vmul.f32 %v3141_v48, %v3190_v4  ;;  %v264_v10 = vmul.f32 %v3204_v9, %v3129_v43 }
  0x93   :  { %156 = vrot.lane.b32.xlu0 %v138_v50, %s2932_s13  ;;  %154 = vrot.lane.b32.xlu1 %v137_v51, %s2932_s13  ;;  %v265_v17 = vmul.f32 %v3204_v9, %v3149_v52  ;;  %v266_v22 = vmul.f32 %v3204_v9, %v3168_v60  ;;  %v267_v14 = vmul.f32 %v3204_v9, %v3180_v0 }
  0x94   :  { %v3157_v55 = vpop.permute.xlu0 %186  ;;  %v3218_v15 = vpop.permute.xlu1 %612  ;;  %v270_v32 = vmul.f32 %v3204_v9, %v3250_v29  ;;  %v268_v37 = vmul.f32 %v3204_v9, %v3190_v4  ;;  %v269_v50 = vmul.f32 %v3204_v9, %v3165_v59 }
  0x95   :  { %v190_v58 = vmul.f32 %v3157_v55, %v3132_v44  ;;  %v191_v3 = vmul.f32 %v3157_v55, %v3129_v43  ;;  %v192_v6 = vmul.f32 %v3157_v55, %v3149_v52  ;;  %v196_v7 = vmul.f32 %v3157_v55, %v3165_v59 }
  0x96   :  { %v193_v8 = vmul.f32 %v3157_v55, %v3168_v60  ;;  %v194_v12 = vmul.f32 %v3157_v55, %v3180_v0  ;;  %v195_v16 = vmul.f32 %v3157_v55, %v3190_v4  ;;  %v615_v23 = vmul.f32 %v3218_v15, %v3227_v20 }
  0x97   :  { %158 = vrot.lane.b32.xlu0 %v139_v57, %s2932_s13  ;;  %207 = vrot.lane.b32.xlu1 %v190_v58, %s2933_s16  ;;  %v616_v27 = vmul.f32 %v3218_v15, %v3132_v44  ;;  %v617_v18 = vmul.f32 %v3218_v15, %v3129_v43  ;;  %v618_v41 = vmul.f32 %v3218_v15, %v3149_v52 }
  0x98   :  { %v3236_v24 = vpop.permute.xlu0 %313  ;;  %v3238_v25 = vpop.permute.xlu1 %665  ;;  %v621_v42 = vmul.f32 %v3218_v15, %v3190_v4  ;;  %v619_v54 = vmul.f32 %v3218_v15, %v3168_v60  ;;  %v622_v26 = vmul.f32 %v3218_v15, %v3165_v59 }
  0x99   :  { %v317_v28 = vmul.f32 %v3236_v24, %v3129_v43  ;;  %v318_v33 = vmul.f32 %v3236_v24, %v3149_v52  ;;  %v668_v36 = vmul.f32 %v3238_v25, %v3227_v20  ;;  %v319_v40 = vmul.f32 %v3236_v24, %v3168_v60 }
  0x9a   :  { %v669_v45 = vmul.f32 %v3238_v25, %v3132_v44  ;;  %v320_v49 = vmul.f32 %v3236_v24, %v3180_v0  ;;  %v323_v56 = vmul.f32 %v3236_v24, %v3250_v29  ;;  %v321_v57 = vmul.f32 %v3236_v24, %v3190_v4 }
  0x9b   :  { %166 = vrot.lane.b32.xlu0 %v143_v62, %s2932_s13  ;;  %160 = vrot.lane.b32.xlu1 %v140_v63, %s2932_s13  ;;  %v670_v58 = vmul.f32 %v3238_v25, %v3129_v43  ;;  %v620_v63 = vmul.f32 %v3218_v15, %v3180_v0  ;;  %v672_v13 = vmul.f32 %v3238_v25, %v3168_v60 }
  0x9c   :  { %v3252_v30 = vpop.permute.xlu1 %739  ;;  %v3254_v31 = vpop.permute.xlu0 %387 }
  0x9d   :  { %5327 = vst [vmem:[#allocation14_spill] sm:$0xff] %v3254_v31  ;;  %v391_v1 = vmul.f32 %v3254_v31, %v3149_v52 }
  0x9f   :  { %162 = vrot.lane.b32.xlu0 %v141_v2, %s2932_s13  ;;  %209 = vrot.lane.b32.xlu1 %v191_v3, %s2933_s16 }
  0xa0   :  { %v3266_v34 = vpop.permute.xlu1 %792  ;;  %v3268_v35 = vpop.permute.xlu0 %440 }
  0xa1   :  { %5328 = vst [vmem:[#allocation15_spill] sm:$0xff] %v3268_v35  ;;  %v444_v21 = vmul.f32 %v3268_v35, %v3149_v52 }
  0xa3   :  { %164 = vrot.lane.b32.xlu0 %v142_v5, %s2932_s13  ;;  %211 = vrot.lane.b32.xlu1 %v192_v6, %s2933_s16  ;;  %v674_v5 = vmul.f32 %v3238_v25, %v3190_v4  ;;  %v671_v6 = vmul.f32 %v3238_v25, %v3149_v52 }
  0xa4   :  { %v3278_v38 = vpop.permute.xlu1 %1155  ;;  %v3280_v39 = vpop.permute.xlu0 %1102 }
  0xa7   :  { %219 = vrot.lane.b32.xlu0 %v196_v7, %s2933_s16  ;;  %213 = vrot.lane.b32.xlu1 %v193_v8, %s2933_s16  ;;  %v392_v7 = vmul.f32 %v3254_v31, %v3168_v60  ;;  %v322_v8 = vmul.f32 %v3236_v24, %v3165_v59 }
  0xa8   :  { %v3292_v46 = vpop.permute.xlu1 %919  ;;  %v3294_v47 = vpop.permute.xlu0 %866 }
  0xab   :  { %281 = vrot.lane.b32.xlu0 %v264_v10, %s2932_s13  ;;  %215 = vrot.lane.b32.xlu1 %v194_v12, %s2933_s16  ;;  %v742_v12 = vmul.f32 %v3252_v30, %v3132_v44 }
  0xac   :  { %v3304_v51 = vpop.permute.xlu1 %1282  ;;  %v3306_v53 = vpop.permute.xlu0 %1229 }
  0xaf   :  { %217 = vrot.lane.b32.xlu0 %v195_v16, %s2933_s16  ;;  %283 = vrot.lane.b32.xlu1 %v265_v17, %s2932_s13 }
  0xb0   :  { %v3318_v61 = vpop.permute.xlu1 %1645  ;;  %v3320_v62 = vpop.permute.xlu0 %1592 }
  0xb3   :  { %285 = vrot.lane.b32.xlu1 %v266_v22, %s2932_s13  ;;  %631 = vrot.lane.b32.xlu0 %v615_v23, %s2932_s13  ;;  %v393_v22 = vmul.f32 %v3254_v31, %v3180_v0  ;;  %v673_v23 = vmul.f32 %v3238_v25, %v3180_v0 }
  0xb4   :  { %v3330_v2 = vpop.permute.xlu1 %1409  ;;  %v3332_v3 = vpop.permute.xlu0 %1356 }
  0xb7   :  { %633 = vrot.lane.b32.xlu1 %v616_v27, %s2932_s13  ;;  %334 = vrot.lane.b32.xlu0 %v317_v28, %s2933_s16 }
  0xb8   :  { %v3344_v10 = vpop.permute.xlu1 %1772  ;;  %v3346_v11 = vpop.permute.xlu0 %1719 }
  0xbb   :  { %287 = vrot.lane.b32.xlu1 %v267_v14, %s2932_s13  ;;  %293 = vrot.lane.b32.xlu0 %v270_v32, %s2932_s13  ;;  %v101_v14 = vld [vmem:[%s5292_s1 + $0x36] sm:$0x3]  ;;  %v743_v32 = vmul.f32 %v3252_v30, %v3129_v43 }
  0xbc   :  { %v3356_v16 = vpop.permute.xlu1 %1899  ;;  %v3358_v17 = vpop.permute.xlu0 %1846 }
  0xbf   :  { %336 = vrot.lane.b32.xlu1 %v318_v33, %s2933_s16  ;;  %635 = vrot.lane.b32.xlu0 %v617_v18, %s2932_s13  ;;  %v397_v18 = vmul.f32 %v3254_v31, %v3061_v19 }
  0xc0   :  { %v3370_v27 = vpop.permute.xlu1 %239  ;;  %v3372_v28 = vpop.permute.xlu0 %112 }
  0xc1   :  { %5329 = vst [vmem:[#allocation16_spill] sm:$0xff] %v3370_v27  ;;  %5330 = vst [vmem:[#allocation17_spill] sm:$0xff] %v3372_v28 }
  0xc3   :  { %684 = vrot.lane.b32.xlu1 %v668_v36, %s2933_s16  ;;  %289 = vrot.lane.b32.xlu0 %v268_v37, %s2932_s13  ;;  %v394_v36 = vmul.f32 %v3254_v31, %v3190_v4  ;;  %v744_v37 = vmul.f32 %v3252_v30, %v3149_v52 }
  0xc4   :  { %v3382_v33 = vpop.permute.xlu1 %366  ;;  %v3384_v15 = vpop.permute.xlu0 %591 }
  0xc5   :  { %5331 = vst [vmem:[#allocation18_spill] sm:$0xff] %v3382_v33 }
  0xc7   :  { %338 = vrot.lane.b32.xlu1 %v319_v40, %s2933_s16  ;;  %637 = vrot.lane.b32.xlu0 %v618_v41, %s2932_s13  ;;  %v445_v40 = vmul.f32 %v3268_v35, %v3168_v60 }
  0xc8   :  { %v3396_v41 = vpop.permute.xlu1 %1081 }
  0xc9   :  { %5332 = vst [vmem:[#allocation19_spill] sm:$0xff] %v3396_v41 }
  0xcb   :  { %643 = vrot.lane.b32.xlu1 %v621_v42, %s2932_s13  ;;  %686 = vrot.lane.b32.xlu0 %v669_v45, %s2933_s16  ;;  %v3398_v42 = vpop.permute.xlu0 %718  ;;  %v1105_v45 = vmul.f32 %v3280_v39, %v3227_v20 }
  0xcf   :  { %340 = vrot.lane.b32.xlu1 %v320_v49, %s2933_s16  ;;  %291 = vrot.lane.b32.xlu0 %v269_v50, %s2932_s13  ;;  %v795_v49 = vmul.f32 %v3266_v34, %v3132_v44  ;;  %v3408_v50 = vpop.permute.xlu1 %1208 }
  0xd0   :  { %5333 = vst [vmem:[#allocation20_spill] sm:$0xff] %v3408_v50 }
  0xd3   :  { %639 = vrot.lane.b32.xlu1 %v619_v54, %s2932_s13  ;;  %346 = vrot.lane.b32.xlu0 %v323_v56, %s2933_s16  ;;  %v3410_v54 = vpop.permute.xlu0 %845  ;;  %v446_v56 = vmul.f32 %v3268_v35, %v3180_v0 }
  0xd7   :  { %342 = vrot.lane.b32.xlu1 %v321_v57, %s2933_s16  ;;  %688 = vrot.lane.b32.xlu0 %v670_v58, %s2933_s16  ;;  %v395_v57 = vmul.f32 %v3254_v31, %v3165_v59 }
  0xdb   :  { %641 = vrot.lane.b32.xlu1 %v620_v63, %s2932_s13  ;;  %408 = vrot.lane.b32.xlu0 %v391_v1, %s2932_s13  ;;  %v745_v1 = vmul.f32 %v3252_v30, %v3168_v60 }
  0xdf   :  { %696 = vrot.lane.b32.xlu1 %v674_v5, %s2933_s16  ;;  %690 = vrot.lane.b32.xlu0 %v671_v6, %s2933_s16  ;;  %v675_v5 = vmul.f32 %v3238_v25, %v3165_v59  ;;  %v98_v25 = vld [vmem:[%s5292_s1 + $0x30] sm:$0x3] }
  0xe3   :  { %410 = vrot.lane.b32.xlu1 %v392_v7, %s2932_s13  ;;  %344 = vrot.lane.b32.xlu0 %v322_v8, %s2933_s16  ;;  %v796_v8 = vmul.f32 %v3266_v34, %v3129_v43 }
  0xe7   :  { %758 = vrot.lane.b32.xlu1 %v742_v12, %s2932_s13  ;;  %692 = vrot.lane.b32.xlu0 %v672_v13, %s2933_s16  ;;  %v748_v12 = vmul.f32 %v3252_v30, %v3165_v59 }
  0xeb   :  { %461 = vrot.lane.b32.xlu1 %v444_v21, %s2933_s16  ;;  %412 = vrot.lane.b32.xlu0 %v393_v22, %s2932_s13  ;;  %v1106_v22 = vmul.f32 %v3280_v39, %v3132_v44 }
  0xef   :  { %694 = vrot.lane.b32.xlu1 %v673_v23, %s2933_s16  ;;  %645 = vrot.lane.b32.xlu0 %v622_v26, %s2932_s13 }
  0xf3   :  { %1571 = vperm.xlu1 %2882, %v101_v14   ;;  %760 = vrot.lane.b32.xlu0 %v743_v32, %s2932_s13  ;;  %v447_v14 = vmul.f32 %v3268_v35, %v3190_v4  ;;  %v396_v32 = vmul.f32 %v3254_v31, %v3250_v29 }
  0xf7   :  { %420 = vrot.lane.b32.xlu1 %v397_v18, %s2932_s13  ;;  %414 = vrot.lane.b32.xlu0 %v394_v36, %s2932_s13 }
  0xfb   :  { %762 = vrot.lane.b32.xlu1 %v744_v37, %s2932_s13  ;;  %463 = vrot.lane.b32.xlu0 %v445_v40, %s2933_s16  ;;  %v746_v37 = vmul.f32 %v3252_v30, %v3180_v0  ;;  %v450_v40 = vmul.f32 %v3268_v35, %v3061_v19 }
  0xff   :  { %1121 = vrot.lane.b32.xlu1 %v1105_v45, %s2932_s13  ;;  %811 = vrot.lane.b32.xlu0 %v795_v49, %s2933_s16 }
 0x103   :  { %465 = vrot.lane.b32.xlu1 %v446_v56, %s2933_s16  ;;  %416 = vrot.lane.b32.xlu0 %v395_v57, %s2932_s13  ;;  %v1107_v56 = vmul.f32 %v3280_v39, %v3129_v43  ;;  %v797_v57 = vmul.f32 %v3266_v34, %v3149_v52 }
 0x105   :  { %v3418_v58 = vpop.permute.xlu0 %156  ;;  %v3420_v63 = vpop.permute.xlu1 %154 }
 0x107   :  { %764 = vrot.lane.b32.xlu1 %v745_v1, %s2932_s13  ;;  %698 = vrot.lane.b32.xlu0 %v675_v5, %s2933_s16 }
 0x109   :  { %v3428_v6 = vpop.permute.xlu0 %158  ;;  %v3430_v7 = vpop.permute.xlu1 %207 }
 0x10b   :  { %813 = vrot.lane.b32.xlu1 %v796_v8, %s2933_s16  ;;  %770 = vrot.lane.b32.xlu0 %v748_v12, %s2932_s13  ;;  %v1158_v8 = vmul.f32 %v3278_v38, %v3227_v20  ;;  %v1110_v12 = vmul.f32 %v3280_v39, %v3180_v0 }
 0x10d   :  { %v3441_v13 = vpop.permute.xlu0 %166  ;;  %v3443_v21 = vpop.permute.xlu1 %160 }
 0x10f   :  { %1335 = vperm.xlu1 %2882, %v98_v25   ;;  %1123 = vrot.lane.b32.xlu0 %v1106_v22, %s2932_s13 }
 0x111   :  { %v3448_v23 = vpop.permute.xlu0 %162  ;;  %v3450_v26 = vpop.permute.xlu1 %209 }
 0x113   :  { %467 = vrot.lane.b32.xlu1 %v447_v14, %s2933_s16  ;;  %418 = vrot.lane.b32.xlu0 %v396_v32, %s2932_s13  ;;  %v747_v14 = vmul.f32 %v3252_v30, %v3190_v4  ;;  %v448_v32 = vmul.f32 %v3268_v35, %v3165_v59 }
 0x115   :  { %v3458_v18 = vpop.permute.xlu0 %164  ;;  %v3460_v36 = vpop.permute.xlu1 %211 }
 0x117   :  { %766 = vrot.lane.b32.xlu1 %v746_v37, %s2932_s13  ;;  %473 = vrot.lane.b32.xlu0 %v450_v40, %s2933_s16 }
 0x119   :  { %v3468_v45 = vpop.permute.xlu0 %219  ;;  %v3470_v49 = vpop.permute.xlu1 %213 }
 0x11b   :  { %1125 = vrot.lane.b32.xlu1 %v1107_v56, %s2932_s13  ;;  %815 = vrot.lane.b32.xlu0 %v797_v57, %s2933_s16  ;;  %v801_v56 = vmul.f32 %v3266_v34, %v3165_v59  ;;  %v798_v57 = vmul.f32 %v3266_v34, %v3168_v60 }
 0x11d   :  { %v3478_v1 = vpop.permute.xlu0 %281  ;;  %v3480_v5 = vpop.permute.xlu1 %215 }
 0x11f   :  { %1174 = vrot.lane.b32.xlu1 %v1158_v8, %s2933_s16  ;;  %1131 = vrot.lane.b32.xlu0 %v1110_v12, %s2932_s13 }
 0x121   :  { %v3488_v25 = vpop.permute.xlu0 %217  ;;  %v3490_v22 = vpop.permute.xlu1 %283 }
 0x123   :  { %768 = vrot.lane.b32.xlu1 %v747_v14, %s2932_s13  ;;  %469 = vrot.lane.b32.xlu0 %v448_v32, %s2933_s16  ;;  %v1159_v14 = vmul.f32 %v3278_v38, %v3132_v44  ;;  %v1108_v32 = vmul.f32 %v3280_v39, %v3149_v52 }
 0x125   :  { %v3498_v37 = vpop.permute.xlu1 %285  ;;  %v3500_v40 = vpop.permute.xlu0 %631 }
 0x126   :  { %5334 = vst [vmem:[#allocation21_spill] sm:$0xff] %v3498_v37  ;;  %5335 = vst [vmem:[#allocation22_spill] sm:$0xff] %v3500_v40 }
 0x127   :  { %823 = vrot.lane.b32.xlu1 %v801_v56, %s2933_s16  ;;  %817 = vrot.lane.b32.xlu0 %v798_v57, %s2933_s16  ;;  %v104_v56 = vld [vmem:[%s5292_s1 + $0x3c] sm:$0x3] }
 0x129   :  { %v3508_v8 = vpop.permute.xlu1 %633  ;;  %v3510_v12 = vpop.permute.xlu0 %334 }
 0x12a   :  { %5336 = vst [vmem:[#allocation23_spill] sm:$0xff] %v3508_v8  ;;  %v449_v8 = vmul.f32 %v3268_v35, %v3250_v29 }
 0x12b   :  { %1176 = vrot.lane.b32.xlu1 %v1159_v14, %s2933_s16  ;;  %1127 = vrot.lane.b32.xlu0 %v1108_v32, %s2932_s13  ;;  %v869_v14 = vmul.f32 %v3294_v47, %v3129_v43  ;;  %v799_v32 = vmul.f32 %v3266_v34, %v3180_v0 }
 0x12d   :  { %v3521_v40 = vpop.permute.xlu1 %287  ;;  %v3523_v57 = vpop.permute.xlu0 %293 }
 0x12e   :  { %5337 = vst [vmem:[#allocation24_spill] sm:$0xff] %v3521_v40  ;;  %5338 = vst [vmem:[#allocation25_spill] sm:$0xff] %v3523_v57 }
 0x12f   :  { %471 = vrot.lane.b32.xlu1 %v449_v8, %s2933_s16  ;;  %1698 = vperm.xlu0 %2881, %v104_v56   ;;  %v1160_v8 = vmul.f32 %v3278_v38, %v3129_v43  ;;  %v1109_v56 = vmul.f32 %v3280_v39, %v3168_v60 }
 0x131   :  { %v3528_v37 = vpop.permute.xlu1 %336  ;;  %v3530_v31 = vpop.permute.xlu0 %635 }
 0x132   :  { %5339 = vst [vmem:[#allocation26_spill] sm:$0xff] %v3530_v31 }
 0x133   :  { %885 = vrot.lane.b32.xlu1 %v869_v14, %s2932_s13  ;;  %819 = vrot.lane.b32.xlu0 %v799_v32, %s2933_s16  ;;  %v749_v14 = vmul.f32 %v3252_v30, %v3250_v29  ;;  %v1163_v32 = vmul.f32 %v3278_v38, %v3180_v0 }
 0x135   :  { %v3538_v57 = vpop.permute.xlu1 %684  ;;  %v3540_v40 = vpop.permute.xlu0 %289 }
 0x136   :  { %5340 = vst [vmem:[#allocation27_spill] sm:$0xff] %v3538_v57  ;;  %5341 = vst [vmem:[#allocation28_spill] sm:$0xff] %v3540_v40 }
 0x137   :  { %1178 = vrot.lane.b32.xlu1 %v1160_v8, %s2933_s16  ;;  %1129 = vrot.lane.b32.xlu0 %v1109_v56, %s2932_s13  ;;  %v870_v8 = vmul.f32 %v3294_v47, %v3149_v52  ;;  %v800_v56 = vmul.f32 %v3266_v34, %v3190_v4 }
 0x139   :  { %v3548_v31 = vpop.permute.xlu1 %338  ;;  %v3550_v35 = vpop.permute.xlu0 %637 }
 0x13a   :  { %5342 = vst [vmem:[#allocation29_spill] sm:$0xff] %v3548_v31  ;;  %5343 = vst [vmem:[#allocation30_spill] sm:$0xff] %v3550_v35  ;;  %v1781_v31 = vmul.f32 %v3344_v10, %v3165_v59 }
 0x13b   :  { %772 = vrot.lane.b32.xlu1 %v749_v14, %s2932_s13  ;;  %1184 = vrot.lane.b32.xlu0 %v1163_v32, %s2933_s16  ;;  %v871_v14 = vmul.f32 %v3294_v47, %v3168_v60  ;;  %v1161_v32 = vmul.f32 %v3278_v38, %v3149_v52 }
 0x13d   :  { %v3558_v40 = vpop.permute.xlu1 %643  ;;  %v3560_v57 = vpop.permute.xlu0 %686 }
 0x13e   :  { %5344 = vst [vmem:[#allocation31_spill] sm:$0xff] %v3558_v40  ;;  %5345 = vst [vmem:[#allocation32_spill] sm:$0xff] %v3560_v57 }
 0x13f   :  { %887 = vrot.lane.b32.xlu1 %v870_v8, %s2932_s13  ;;  %821 = vrot.lane.b32.xlu0 %v800_v56, %s2933_s16  ;;  %v1111_v8 = vmul.f32 %v3280_v39, %v3190_v4  ;;  %v922_v56 = vmul.f32 %v3292_v46, %v3129_v43 }
 0x141   :  { %v3568_v30 = vpop.permute.xlu1 %340  ;;  %v3570_v35 = vpop.permute.xlu0 %291 }
 0x142   :  { %5346 = vst [vmem:[#allocation33_spill] sm:$0xff] %v3568_v30  ;;  %5347 = vst [vmem:[#allocation34_spill] sm:$0xff] %v3570_v35 }
 0x143   :  { %889 = vrot.lane.b32.xlu1 %v871_v14, %s2932_s13  ;;  %1180 = vrot.lane.b32.xlu0 %v1161_v32, %s2933_s16  ;;  %v1232_v14 = vmul.f32 %v3306_v53, %v3132_v44  ;;  %v1162_v32 = vmul.f32 %v3278_v38, %v3168_v60 }
 0x145   :  { %v3578_v57 = vpop.permute.xlu1 %639  ;;  %v3580_v40 = vpop.permute.xlu0 %346 }
 0x146   :  { %5348 = vst [vmem:[#allocation35_spill] sm:$0xff] %v3578_v57  ;;  %5349 = vst [vmem:[#allocation36_spill] sm:$0xff] %v3580_v40 }
 0x147   :  { %1133 = vrot.lane.b32.xlu1 %v1111_v8, %s2932_s13  ;;  %938 = vrot.lane.b32.xlu0 %v922_v56, %s2933_s16  ;;  %v872_v8 = vmul.f32 %v3294_v47, %v3180_v0  ;;  %v802_v56 = vmul.f32 %v3266_v34, %v3250_v29  ;;  %v1233_v34 = vmul.f32 %v3306_v53, %v3129_v43 }
 0x149   :  { %v3588_v35 = vpop.permute.xlu0 %688  ;;  %v3594_v57 = vpop.permute.xlu1 %342 }
 0x14a   :  { %5350 = vst [vmem:[#allocation37_spill] sm:$0xff] %v3588_v35  ;;  %5351 = vst [vmem:[#allocation38_spill] sm:$0xff] %v3594_v57 }
 0x14b   :  { %1248 = vrot.lane.b32.xlu1 %v1232_v14, %s2932_s13  ;;  %1182 = vrot.lane.b32.xlu0 %v1162_v32, %s2933_s16  ;;  %v923_v14 = vmul.f32 %v3292_v46, %v3149_v52  ;;  %v875_v32 = vmul.f32 %v3294_v47, %v3250_v29 }
 0x14d   :  { %v3598_v40 = vpop.permute.xlu0 %408  ;;  %v3606_v35 = vpop.permute.xlu1 %641 }
 0x14e   :  { %5352 = vst [vmem:[#allocation39_spill] sm:$0xff] %v3598_v40  ;;  %5353 = vst [vmem:[#allocation40_spill] sm:$0xff] %v3606_v35 }
 0x14f   :  { %891 = vrot.lane.b32.xlu1 %v872_v8, %s2932_s13  ;;  %825 = vrot.lane.b32.xlu0 %v802_v56, %s2933_s16  ;;  %v1112_v8 = vmul.f32 %v3280_v39, %v3165_v59 }
 0x151   :  { %v3608_v30 = vpop.permute.xlu0 %690  ;;  %v3622_v56 = vpop.permute.xlu1 %696 }
 0x152   :  { %5354 = vst [vmem:[#allocation41_spill] sm:$0xff] %v3608_v30  ;;  %5356 = vst [vmem:[#allocation43_spill] sm:$0xff] %v3622_v56 }
 0x153   :  { %940 = vrot.lane.b32.xlu1 %v923_v14, %s2933_s16  ;;  %897 = vrot.lane.b32.xlu0 %v875_v32, %s2932_s13  ;;  %v924_v14 = vmul.f32 %v3292_v46, %v3168_v60  ;;  %v873_v32 = vmul.f32 %v3294_v47, %v3190_v4 }
 0x155   :  { %v3616_v40 = vpop.permute.xlu0 %344 }
 0x156   :  { %5355 = vst [vmem:[#allocation42_spill] sm:$0xff] %v3616_v40  ;;  %v3634_v40 = vpop.permute.xlu1 %410 }
 0x157   :  { %1250 = vrot.lane.b32.xlu1 %v1233_v34, %s2932_s13  ;;  %1135 = vrot.lane.b32.xlu0 %v1112_v8, %s2932_s13  ;;  %5358 = vst [vmem:[#allocation45_spill] sm:$0xff] %v3634_v40  ;;  %v1234_v34 = vmul.f32 %v3306_v53, %v3149_v52  ;;  %v1164_v8 = vmul.f32 %v3278_v38, %v3190_v4 }
 0x159   :  { %v3626_v30 = vpop.permute.xlu0 %692 }
 0x15a   :  { %5357 = vst [vmem:[#allocation44_spill] sm:$0xff] %v3626_v30  ;;  %v3650_v40 = vpop.permute.xlu1 %758 }
 0x15b   :  { %942 = vrot.lane.b32.xlu1 %v924_v14, %s2933_s16  ;;  %893 = vrot.lane.b32.xlu0 %v873_v32, %s2932_s13  ;;  %v1285_v14 = vmul.f32 %v3304_v51, %v3132_v44  ;;  %v1237_v32 = vmul.f32 %v3306_v53, %v3190_v4  ;;  %5361 = vst [vmem:[#allocation48_spill] sm:$0xff] %v3650_v40 }
 0x15d   :  { %v3636_v39 = vpop.permute.xlu0 %412 }
 0x15e   :  { %5359 = vst [vmem:[#allocation46_spill] sm:$0xff] %v3636_v39 }
 0x15f   :  { %1252 = vrot.lane.b32.xlu1 %v1234_v34, %s2932_s13  ;;  %1186 = vrot.lane.b32.xlu0 %v1164_v8, %s2933_s16  ;;  %v874_v34 = vmul.f32 %v3294_v47, %v3165_v59  ;;  %v1595_v8 = vmul.f32 %v3320_v62, %v3227_v20 }
 0x161   :  { %v3644_v30 = vpop.permute.xlu0 %645 }
 0x162   :  { %5360 = vst [vmem:[#allocation47_spill] sm:$0xff] %v3644_v30  ;;  %v3662_v30 = vpop.permute.xlu1 %461 }
 0x163   :  { %1301 = vrot.lane.b32.xlu1 %v1285_v14, %s2933_s16  ;;  %1258 = vrot.lane.b32.xlu0 %v1237_v32, %s2932_s13  ;;  %5363 = vst [vmem:[#allocation50_spill] sm:$0xff] %v3662_v30  ;;  %v928_v14 = vmul.f32 %v3292_v46, %v3250_v29  ;;  %v925_v32 = vmul.f32 %v3292_v46, %v3180_v0 }
 0x164   :  { %v4070_v30 = vmul.f32 %v3370_v27, %v3165_v59 }
 0x165   :  { %v3654_v39 = vpop.permute.xlu0 %760 }
 0x166   :  { %5362 = vst [vmem:[#allocation49_spill] sm:$0xff] %v3654_v39  ;;  %v3678_v40 = vpop.permute.xlu1 %694 }
 0x167   :  { %895 = vrot.lane.b32.xlu1 %v874_v34, %s2932_s13  ;;  %1611 = vrot.lane.b32.xlu0 %v1595_v8, %s2932_s13  ;;  %v1235_v34 = vmul.f32 %v3306_v53, %v3168_v60  ;;  %v1165_v8 = vmul.f32 %v3278_v38, %v3165_v59  ;;  %5366 = vst [vmem:[#allocation53_spill] sm:$0xff] %v3678_v40  ;;  %v107_v38 = vld [vmem:[%s5292_s1 + $0x42] sm:$0x3]  ;;  %s2935_s1 = smov 36  }
 0x169   :  { %v3664_v56 = vpop.permute.xlu0 %414 }
 0x16a   :  { %5364 = vst [vmem:[#allocation51_spill] sm:$0xff] %v3664_v56 }
 0x16b   :  { %950 = vrot.lane.b32.xlu1 %v928_v14, %s2933_s16  ;;  %944 = vrot.lane.b32.xlu0 %v925_v32, %s2933_s16  ;;  %v1596_v14 = vmul.f32 %v3320_v62, %v3132_v44  ;;  %v1286_v32 = vmul.f32 %v3304_v51, %v3129_v43 }
 0x16d   :  { %v3672_v39 = vpop.permute.xlu0 %463 }
 0x16e   :  { %5365 = vst [vmem:[#allocation52_spill] sm:$0xff] %v3672_v39 }
 0x16f   :  { %1254 = vrot.lane.b32.xlu1 %v1235_v34, %s2932_s13  ;;  %1188 = vrot.lane.b32.xlu0 %v1165_v8, %s2933_s16  ;;  %v1599_v8 = vmul.f32 %v3320_v62, %v3168_v60 }
 0x171   :  { %v3682_v56 = vpop.permute.xlu0 %811 }
 0x172   :  { %5367 = vst [vmem:[#allocation54_spill] sm:$0xff] %v3682_v56  ;;  %v3688_v39 = vpop.permute.xlu1 %1571 }
 0x173   :  { %5368 = vst [vmem:[#allocation55_spill] sm:$0xff] %v3688_v39  ;;  %1613 = vrot.lane.b32.xlu1 %v1596_v14, %s2932_s13  ;;  %1303 = vrot.lane.b32.xlu0 %v1286_v32, %s2933_s16  ;;  %v1236_v14 = vmul.f32 %v3306_v53, %v3180_v0  ;;  %v926_v32 = vmul.f32 %v3292_v46, %v3190_v4 }
 0x175   :  { %v3695_v34 = vpop.permute.xlu0 %416 }
 0x176   :  { %5369 = vst [vmem:[#allocation56_spill] sm:$0xff] %v3695_v34  ;;  %v3699_v56 = vpop.permute.xlu1 %420 }
 0x177   :  { %5370 = vst [vmem:[#allocation57_spill] sm:$0xff] %v3699_v56  ;;  %1825 = vperm.xlu1 %2882, %v107_v38   ;;  %1619 = vrot.lane.b32.xlu0 %v1599_v8, %s2932_s13  ;;  %v1290_v38 = vmul.f32 %v3304_v51, %v3190_v4  ;;  %v1287_v8 = vmul.f32 %v3304_v51, %v3149_v52 }
 0x179   :  { %v3702_v40 = vpop.permute.xlu0 %698 }
 0x17a   :  { %5371 = vst [vmem:[#allocation58_spill] sm:$0xff] %v3702_v40  ;;  %v3708_v39 = vpop.permute.xlu1 %762 }
 0x17b   :  { %5372 = vst [vmem:[#allocation59_spill] sm:$0xff] %v3708_v39  ;;  %1256 = vrot.lane.b32.xlu1 %v1236_v14, %s2932_s13  ;;  %946 = vrot.lane.b32.xlu0 %v926_v32, %s2933_s16  ;;  %v1648_v14 = vmul.f32 %v3318_v61, %v3227_v20  ;;  %v1597_v32 = vmul.f32 %v3320_v62, %v3129_v43 }
 0x17c   :  { %v1598_v39 = vmul.f32 %v3320_v62, %v3149_v52 }
 0x17d   :  { %v3712_v34 = vpop.permute.xlu0 %770 }
 0x17e   :  { %5373 = vst [vmem:[#allocation60_spill] sm:$0xff] %v3712_v34  ;;  %v3718_v40 = vpop.permute.xlu1 %1121 }
 0x17f   :  { %5374 = vst [vmem:[#allocation61_spill] sm:$0xff] %v3718_v40  ;;  %1311 = vrot.lane.b32.xlu1 %v1290_v38, %s2933_s16  ;;  %1305 = vrot.lane.b32.xlu0 %v1287_v8, %s2933_s16  ;;  %v927_v40 = vmul.f32 %v3292_v46, %v3165_v59  ;;  %v876_v38 = vmul.f32 %v3294_v47, %v3061_v19 }
 0x181   :  { %v3722_v56 = vpop.permute.xlu0 %1123 }
 0x182   :  { %5375 = vst [vmem:[#allocation62_spill] sm:$0xff] %v3722_v56  ;;  %v3728_v34 = vpop.permute.xlu1 %465 }
 0x183   :  { %5376 = vst [vmem:[#allocation63_spill] sm:$0xff] %v3728_v34  ;;  %1664 = vrot.lane.b32.xlu1 %v1648_v14, %s2933_s16  ;;  %1615 = vrot.lane.b32.xlu0 %v1597_v32, %s2932_s13  ;;  %v1288_v14 = vmul.f32 %v3304_v51, %v3168_v60  ;;  %v4066_v34 = vmul.f32 %v3370_v27, %v3190_v4 }
 0x185   :  { %v3736_v8 = vpop.permute.xlu0 %418  ;;  %5432 = vst [vmem:[#allocation119_spill] sm:$0xff] %v4066_v34  ;;  %v4088_v34 = vmul.f32 %v3384_v15, %v3129_v43 }
 0x186   :  { %5377 = vst [vmem:[#allocation64_spill] sm:$0xff] %v3736_v8  ;;  %v3738_v56 = vpop.permute.xlu1 %764  ;;  %v1652_v8 = vmul.f32 %v3318_v61, %v3168_v60 }
 0x187   :  { %5378 = vst [vmem:[#allocation65_spill] sm:$0xff] %v3738_v56  ;;  %948 = vrot.lane.b32.xlu1 %v927_v40, %s2933_s16  ;;  %899 = vrot.lane.b32.xlu0 %v876_v38, %s2932_s13  ;;  %v1649_v40 = vmul.f32 %v3318_v61, %v3132_v44  ;;  %5435 = vst [vmem:[#allocation122_spill] sm:$0xff] %v4088_v34  ;;  %v4134_v34 = vmul.f32 %v3382_v33, %v3061_v19 }
 0x189   :  { %v3750_v47 = vpop.permute.xlu0 %473 }
 0x18a   :  { %v3746_v32 = vpop.permute.xlu1 %813  ;;  %5380 = vst [vmem:[#allocation67_spill] sm:$0xff] %v3750_v47 }
 0x18b   :  { %5379 = vst [vmem:[#allocation66_spill] sm:$0xff] %v3746_v32  ;;  %1617 = vrot.lane.b32.xlu1 %v1598_v39, %s2932_s13  ;;  %1307 = vrot.lane.b32.xlu0 %v1288_v14, %s2933_s16  ;;  %v1289_v32 = vmul.f32 %v3304_v51, %v3180_v0  ;;  %v1238_v39 = vmul.f32 %v3306_v53, %v3165_v59 }
 0x18d   :  { %v3764_v14 = vpop.permute.xlu0 %815 }
 0x18e   :  { %v3756_v38 = vpop.permute.xlu1 %1335  ;;  %5382 = vst [vmem:[#allocation69_spill] sm:$0xff] %v3764_v14  ;;  %v1239_v14 = vmul.f32 %v3306_v53, %v3250_v29  ;;  %v1291_v53 = vmul.f32 %v3304_v51, %v3165_v59 }
 0x18f   :  { %5381 = vst [vmem:[#allocation68_spill] sm:$0xff] %v3756_v38  ;;  %1672 = vrot.lane.b32.xlu1 %v1652_v8, %s2933_s16  ;;  %1666 = vrot.lane.b32.xlu0 %v1649_v40, %s2933_s16  ;;  %v1650_v38 = vmul.f32 %v3318_v61, %v3129_v43  ;;  %v1359_v8 = vmul.f32 %v3332_v3, %v3129_v43 }
 0x191   :  { %v3778_v56 = vpop.permute.xlu0 %1131 }
 0x192   :  { %v3766_v47 = vpop.permute.xlu1 %467  ;;  %5385 = vst [vmem:[#allocation72_spill] sm:$0xff] %v3778_v56 }
 0x193   :  { %5383 = vst [vmem:[#allocation70_spill] sm:$0xff] %v3766_v47  ;;  %1309 = vrot.lane.b32.xlu1 %v1289_v32, %s2933_s16  ;;  %1260 = vrot.lane.b32.xlu0 %v1238_v39, %s2932_s13  ;;  %v929_v32 = vmul.f32 %v3292_v46, %v3061_v19  ;;  %v1361_v46 = vmul.f32 %v3332_v3, %v3168_v60 }
 0x194   :  { %v4058_v47 = vmul.f32 %v3370_v27, %v3180_v0 }
 0x196   :  { %v3774_v40 = vpop.permute.xlu1 %766  ;;  %5430 = vst [vmem:[#allocation117_spill] sm:$0xff] %v4058_v47  ;;  %v4080_v47 = vmul.f32 %v3384_v15, %v3227_v20 }
 0x197   :  { %5384 = vst [vmem:[#allocation71_spill] sm:$0xff] %v3774_v40  ;;  %1668 = vrot.lane.b32.xlu1 %v1650_v38, %s2933_s16  ;;  %1375 = vrot.lane.b32.xlu0 %v1359_v8, %s2932_s13  ;;  %v1651_v40 = vmul.f32 %v3318_v61, %v3149_v52  ;;  %v1360_v38 = vmul.f32 %v3332_v3, %v3149_v52  ;;  %v3792_v8 = vpop.permute.xlu0 %469 }
 0x198   :  { %5387 = vst [vmem:[#allocation74_spill] sm:$0xff] %v3792_v8  ;;  %v4054_v8 = vmul.f32 %v3370_v27, %v3168_v60 }
 0x19a   :  { %v3784_v39 = vpop.permute.xlu1 %1125 }
 0x19b   :  { %5386 = vst [vmem:[#allocation73_spill] sm:$0xff] %v3784_v39  ;;  %1262 = vrot.lane.b32.xlu1 %v1239_v14, %s2932_s13  ;;  %952 = vrot.lane.b32.xlu0 %v929_v32, %s2933_s16  ;;  %v3806_v32 = vpop.permute.xlu0 %817  ;;  %v1412_v39 = vmul.f32 %v3330_v2, %v3129_v43 }
 0x19c   :  { %5390 = vst [vmem:[#allocation77_spill] sm:$0xff] %v3806_v32  ;;  %v4042_v32 = vmul.f32 %v3372_v28, %v3190_v4 }
 0x19e   :  { %v3794_v56 = vpop.permute.xlu1 %1174 }
 0x19f   :  { %5388 = vst [vmem:[#allocation75_spill] sm:$0xff] %v3794_v56  ;;  %1670 = vrot.lane.b32.xlu1 %v1651_v40, %s2933_s16  ;;  %1377 = vrot.lane.b32.xlu0 %v1360_v38, %s2932_s13  ;;  %v1364_v40 = vmul.f32 %v3332_v3, %v3165_v59 }
 0x1a2   :  { %v3802_v14 = vpop.permute.xlu1 %768 }
 0x1a3   :  { %5389 = vst [vmem:[#allocation76_spill] sm:$0xff] %v3802_v14  ;;  %1379 = vrot.lane.b32.xlu1 %v1361_v46, %s2932_s13  ;;  %1313 = vrot.lane.b32.xlu0 %v1291_v53, %s2933_s16  ;;  %v1292_v14 = vmul.f32 %v3304_v51, %v3250_v29  ;;  %v1722_v46 = vmul.f32 %v3346_v11, %v3132_v44  ;;  %v3820_v53 = vpop.permute.xlu0 %1127 }
 0x1a4   :  { %5392 = vst [vmem:[#allocation79_spill] sm:$0xff] %v3820_v53  ;;  %v1726_v53 = vmul.f32 %v3346_v11, %v3180_v0 }
 0x1a6   :  { %v3812_v38 = vpop.permute.xlu1 %823 }
 0x1a7   :  { %5391 = vst [vmem:[#allocation78_spill] sm:$0xff] %v3812_v38  ;;  %1428 = vrot.lane.b32.xlu1 %v1412_v39, %s2933_s16  ;;  %1385 = vrot.lane.b32.xlu0 %v1364_v40, %s2932_s13  ;;  %v1413_v38 = vmul.f32 %v3330_v2, %v3149_v52  ;;  %v1362_v39 = vmul.f32 %v3332_v3, %v3180_v0 }
 0x1aa   :  { %v3822_v56 = vpop.permute.xlu1 %1176 }
 0x1ab   :  { %5393 = vst [vmem:[#allocation80_spill] sm:$0xff] %v3822_v56  ;;  %1315 = vrot.lane.b32.xlu1 %v1292_v14, %s2933_s16  ;;  %1738 = vrot.lane.b32.xlu0 %v1722_v46, %s2932_s13  ;;  %v1723_v14 = vmul.f32 %v3346_v11, %v3129_v43 }
 0x1ae   :  { %v3830_v40 = vpop.permute.xlu1 %471  ;;  %v3832_v51 = vpop.permute.xlu0 %1698 }
 0x1af   :  { %5394 = vst [vmem:[#allocation81_spill] sm:$0xff] %v3830_v40  ;;  %5395 = vst [vmem:[#allocation82_spill] sm:$0xff] %v3832_v51  ;;  %1430 = vrot.lane.b32.xlu1 %v1413_v38, %s2933_s16  ;;  %1381 = vrot.lane.b32.xlu0 %v1362_v39, %s2932_s13  ;;  %v1414_v51 = vmul.f32 %v3330_v2, %v3168_v60  ;;  %v1363_v38 = vmul.f32 %v3332_v3, %v3190_v4 }
 0x1b2   :  { %v3840_v46 = vpop.permute.xlu1 %885  ;;  %v3842_v56 = vpop.permute.xlu0 %819 }
 0x1b3   :  { %5396 = vst [vmem:[#allocation83_spill] sm:$0xff] %v3840_v46  ;;  %5397 = vst [vmem:[#allocation84_spill] sm:$0xff] %v3842_v56  ;;  %1746 = vrot.lane.b32.xlu1 %v1726_v53, %s2932_s13  ;;  %1740 = vrot.lane.b32.xlu0 %v1723_v14, %s2932_s13  ;;  %v1724_v56 = vmul.f32 %v3346_v11, %v3149_v52  ;;  %v1417_v53 = vmul.f32 %v3330_v2, %v3165_v59 }
 0x1b6   :  { %v3850_v39 = vpop.permute.xlu1 %1178  ;;  %v3852_v40 = vpop.permute.xlu0 %1129 }
 0x1b7   :  { %5398 = vst [vmem:[#allocation85_spill] sm:$0xff] %v3850_v39  ;;  %5399 = vst [vmem:[#allocation86_spill] sm:$0xff] %v3852_v40  ;;  %1432 = vrot.lane.b32.xlu1 %v1414_v51, %s2933_s16  ;;  %1383 = vrot.lane.b32.xlu0 %v1363_v38, %s2932_s13  ;;  %v1415_v40 = vmul.f32 %v3330_v2, %v3180_v0  ;;  %v1775_v51 = vmul.f32 %v3344_v10, %v3132_v44 }
 0x1ba   :  { %v3860_v14 = vpop.permute.xlu1 %772  ;;  %v3862_v46 = vpop.permute.xlu0 %1184 }
 0x1bb   :  { %5400 = vst [vmem:[#allocation87_spill] sm:$0xff] %v3860_v14  ;;  %5401 = vst [vmem:[#allocation88_spill] sm:$0xff] %v3862_v46  ;;  %1742 = vrot.lane.b32.xlu1 %v1724_v56, %s2932_s13  ;;  %1438 = vrot.lane.b32.xlu0 %v1417_v53, %s2933_s16  ;;  %v1776_v46 = vmul.f32 %v3344_v10, %v3129_v43  ;;  %v1725_v56 = vmul.f32 %v3346_v11, %v3168_v60 }
 0x1be   :  { %v3870_v38 = vpop.permute.xlu1 %887  ;;  %v3872_v39 = vpop.permute.xlu0 %821 }
 0x1bf   :  { %5402 = vst [vmem:[#allocation89_spill] sm:$0xff] %v3870_v38  ;;  %5403 = vst [vmem:[#allocation90_spill] sm:$0xff] %v3872_v39  ;;  %1434 = vrot.lane.b32.xlu1 %v1415_v40, %s2933_s16  ;;  %1791 = vrot.lane.b32.xlu0 %v1775_v51, %s2933_s16  ;;  %v1365_v39 = vmul.f32 %v3332_v3, %v3250_v29  ;;  %v1779_v40 = vmul.f32 %v3344_v10, %v3180_v0 }
 0x1c2   :  { %v3880_v53 = vpop.permute.xlu1 %889  ;;  %v3882_v14 = vpop.permute.xlu0 %1180 }
 0x1c3   :  { %5404 = vst [vmem:[#allocation91_spill] sm:$0xff] %v3880_v53  ;;  %5405 = vst [vmem:[#allocation92_spill] sm:$0xff] %v3882_v14  ;;  %1793 = vrot.lane.b32.xlu1 %v1776_v46, %s2933_s16  ;;  %1744 = vrot.lane.b32.xlu0 %v1725_v56, %s2932_s13  ;;  %v1777_v14 = vmul.f32 %v3344_v10, %v3149_v52  ;;  %v1416_v46 = vmul.f32 %v3330_v2, %v3190_v4 }
 0x1c6   :  { %v3890_v51 = vpop.permute.xlu1 %1133  ;;  %v3892_v38 = vpop.permute.xlu0 %938 }
 0x1c7   :  { %5406 = vst [vmem:[#allocation93_spill] sm:$0xff] %v3890_v51  ;;  %5407 = vst [vmem:[#allocation94_spill] sm:$0xff] %v3892_v38  ;;  %1387 = vrot.lane.b32.xlu1 %v1365_v39, %s2932_s13  ;;  %1799 = vrot.lane.b32.xlu0 %v1779_v40, %s2933_s16  ;;  %v1778_v51 = vmul.f32 %v3344_v10, %v3168_v60  ;;  %v1366_v39 = vmul.f32 %v3332_v3, %v3061_v19 }
 0x1c8   :  { %v1850_v3 = vmul.f32 %v3358_v17, %v3149_v52 }
 0x1ca   :  { %v3900_v56 = vpop.permute.xlu1 %1248  ;;  %v3902_v53 = vpop.permute.xlu0 %1182 }
 0x1cb   :  { %5408 = vst [vmem:[#allocation95_spill] sm:$0xff] %v3900_v56  ;;  %5409 = vst [vmem:[#allocation96_spill] sm:$0xff] %v3902_v53  ;;  %1795 = vrot.lane.b32.xlu1 %v1777_v14, %s2933_s16  ;;  %1436 = vrot.lane.b32.xlu0 %v1416_v46, %s2933_s16  ;;  %v1849_v53 = vmul.f32 %v3358_v17, %v3129_v43  ;;  %v1418_v14 = vmul.f32 %v3330_v2, %v3250_v29 }
 0x1ce   :  { %v3910_v40 = vpop.permute.xlu1 %891  ;;  %v3912_v38 = vpop.permute.xlu0 %825 }
 0x1cf   :  { %5410 = vst [vmem:[#allocation97_spill] sm:$0xff] %v3910_v40  ;;  %5411 = vst [vmem:[#allocation98_spill] sm:$0xff] %v3912_v38  ;;  %1797 = vrot.lane.b32.xlu1 %v1778_v51, %s2933_s16  ;;  %1389 = vrot.lane.b32.xlu0 %v1366_v39, %s2932_s13  ;;  %v1419_v51 = vmul.f32 %v3330_v2, %v3061_v19  ;;  %v1852_v2 = vmul.f32 %v3358_v17, %v3180_v0 }
 0x1d2   :  { %v3920_v46 = vpop.permute.xlu1 %940  ;;  %v3922_v56 = vpop.permute.xlu0 %897 }
 0x1d3   :  { %5412 = vst [vmem:[#allocation99_spill] sm:$0xff] %v3920_v46  ;;  %5413 = vst [vmem:[#allocation100_spill] sm:$0xff] %v3922_v56  ;;  %1865 = vrot.lane.b32.xlu1 %v1849_v53, %s2932_s13  ;;  %1440 = vrot.lane.b32.xlu0 %v1418_v14, %s2933_s16  ;;  %v1851_v56 = vmul.f32 %v3358_v17, %v3168_v60  ;;  %v1853_v53 = vmul.f32 %v3358_v17, %v3190_v4 }
 0x1d4   :  { %v4038_v46 = vmul.f32 %v3372_v28, %v3180_v0 }
 0x1d6   :  { %v3930_v39 = vpop.permute.xlu1 %1250  ;;  %v3932_v38 = vpop.permute.xlu0 %1135 }
 0x1d7   :  { %5414 = vst [vmem:[#allocation101_spill] sm:$0xff] %v3930_v39  ;;  %5415 = vst [vmem:[#allocation102_spill] sm:$0xff] %v3932_v38  ;;  %1867 = vrot.lane.b32.xlu1 %v1850_v3, %s2932_s13  ;;  %1442 = vrot.lane.b32.xlu0 %v1419_v51, %s2933_s16  ;;  %v1902_v3 = vmul.f32 %v3356_v16, %v3129_v43 }
 0x1da   :  { %v3940_v14 = vpop.permute.xlu1 %942  ;;  %v3942_v40 = vpop.permute.xlu0 %893 }
 0x1db   :  { %5416 = vst [vmem:[#allocation103_spill] sm:$0xff] %v3940_v14  ;;  %5417 = vst [vmem:[#allocation104_spill] sm:$0xff] %v3942_v40  ;;  %1869 = vrot.lane.b32.xlu1 %v1851_v56, %s2932_s13  ;;  %1873 = vrot.lane.b32.xlu0 %v1853_v53, %s2932_s13  ;;  %v1906_v40 = vmul.f32 %v3356_v16, %v3190_v4  ;;  %v1903_v56 = vmul.f32 %v3356_v16, %v3149_v52 }
 0x1dc   :  { %v4034_v14 = vmul.f32 %v3372_v28, %v3168_v60 }
 0x1de   :  { %v3950_v51 = vpop.permute.xlu1 %1252  ;;  %v3952_v38 = vpop.permute.xlu0 %1186 }
 0x1df   :  { %5418 = vst [vmem:[#allocation105_spill] sm:$0xff] %v3950_v51  ;;  %5419 = vst [vmem:[#allocation106_spill] sm:$0xff] %v3952_v38  ;;  %1871 = vrot.lane.b32.xlu1 %v1852_v2, %s2932_s13  ;;  %1918 = vrot.lane.b32.xlu0 %v1902_v3, %s2933_s16  ;;  %v1905_v38 = vmul.f32 %v3356_v16, %v3180_v0  ;;  %v1904_v2 = vmul.f32 %v3356_v16, %v3168_v60 }
 0x1e2   :  { %v3960_v53 = vpop.permute.xlu1 %1301  ;;  %v3962_v39 = vpop.permute.xlu0 %1258 }
 0x1e3   :  { %5420 = vst [vmem:[#allocation107_spill] sm:$0xff] %v3960_v53  ;;  %5421 = vst [vmem:[#allocation108_spill] sm:$0xff] %v3962_v39  ;;  %1926 = vrot.lane.b32.xlu1 %v1906_v40, %s2933_s16  ;;  %1920 = vrot.lane.b32.xlu0 %v1903_v56, %s2933_s16  ;;  %v1601_v39 = vmul.f32 %v3320_v62, %v3190_v4  ;;  %v1600_v40 = vmul.f32 %v3320_v62, %v3180_v0 }
 0x1e6   :  { %v3970_v3 = vpop.permute.xlu1 %895  ;;  %v3972_v51 = vpop.permute.xlu0 %1611 }
 0x1e7   :  { %5422 = vst [vmem:[#allocation109_spill] sm:$0xff] %v3970_v3  ;;  %5423 = vst [vmem:[#allocation110_spill] sm:$0xff] %v3972_v51  ;;  %1924 = vrot.lane.b32.xlu1 %v1905_v38, %s2933_s16  ;;  %1922 = vrot.lane.b32.xlu0 %v1904_v2, %s2933_s16  ;;  %v1653_v51 = vmul.f32 %v3318_v61, %v3180_v0  ;;  %v1602_v38 = vmul.f32 %v3320_v62, %v3165_v59 }
 0x1e8   :  { %v4004_v62 = vmul.f32 %v3141_v48, %v3227_v20  ;;  %v117_v48 = vmul.f32 %v3372_v28, %v3129_v43 }
 0x1ea   :  { %v3980_v56 = vpop.permute.xlu1 %950  ;;  %v3982_v53 = vpop.permute.xlu0 %944 }
 0x1eb   :  { %5424 = vst [vmem:[#allocation111_spill] sm:$0xff] %v3980_v56  ;;  %5425 = vst [vmem:[#allocation112_spill] sm:$0xff] %v3982_v53  ;;  %1623 = vrot.lane.b32.xlu1 %v1601_v39, %s2932_s13  ;;  %1621 = vrot.lane.b32.xlu0 %v1600_v40, %s2932_s13  ;;  %v1655_v53 = vmul.f32 %v3318_v61, %v3165_v59  ;;  %v1654_v39 = vmul.f32 %v3318_v61, %v3190_v4 }
 0x1ec   :  { %v1728_v40 = vmul.f32 %v3346_v11, %v3165_v59  ;;  %v1729_v61 = vmul.f32 %v3346_v11, %v3250_v29  ;;  %v1782_v56 = vmul.f32 %v3344_v10, %v3250_v29 }
 0x1ee   :  { %v3990_v2 = vpop.permute.xlu1 %1254  ;;  %v3992_v3 = vpop.permute.xlu0 %1188 }
 0x1ef   :  { %5426 = vst [vmem:[#allocation113_spill] sm:$0xff] %v3990_v2  ;;  %5427 = vst [vmem:[#allocation114_spill] sm:$0xff] %v3992_v3  ;;  %1674 = vrot.lane.b32.xlu1 %v1653_v51, %s2933_s16  ;;  %1625 = vrot.lane.b32.xlu0 %v1602_v38, %s2932_s13  ;;  %v1727_v51 = vmul.f32 %v3346_v11, %v3190_v4  ;;  %v1780_v38 = vmul.f32 %v3344_v10, %v3190_v4 }
 0x1f0   :  { %v4030_v11 = vmul.f32 %v3372_v28, %v3165_v59  ;;  %v4098_v10 = vmul.f32 %v3384_v15, %v3190_v4 }
 0x1f2   :  { %v4006_v2 = vpop.permute.xlu1 %1613  ;;  %v4008_v3 = vpop.permute.xlu0 %1303  ;;  %5437 = vst [vmem:[#allocation124_spill] sm:$0xff] %v4098_v10  ;;  %v4122_v10 = vmul.f32 %v3384_v15, %v3165_v59 }
 0x1f3   :  { %5428 = vst [vmem:[#allocation115_spill] sm:$0xff] %v4006_v2  ;;  %5429 = vst [vmem:[#allocation116_spill] sm:$0xff] %v4008_v3  ;;  %v116_v2 = vmul.f32 %v3372_v28, %v3132_v44  ;;  %v4024_v3 = vmul.f32 %v3372_v28, %v3149_v52  ;;  %1678 = vrot.lane.b32.xlu1 %v1655_v53, %s2933_s16  ;;  %1676 = vrot.lane.b32.xlu0 %v1654_v39, %s2933_s16 }
 0x1f4   :  { %v4046_v53 = vmul.f32 %v3370_v27, %v3129_v43  ;;  %v4050_v39 = vmul.f32 %v3370_v27, %v3149_v52  ;;  %v4062_v28 = vmul.f32 %v3370_v27, %v3250_v29  ;;  %v4094_v27 = vmul.f32 %v3384_v15, %v3149_v52  ;;  %5442 = vst [vmem:[#allocation129_spill] sm:$0xff] %v4122_v10 }
 0x1f5   :  { %v4146_v10 = vmul.f32 %v3398_v42, %v3132_v44 }
 0x1f6   :  { %5431 = vst [vmem:[#allocation118_spill] sm:$0xff] %v4062_v28  ;;  %v4072_v35 = vpop.permute.xlu1 %1825  ;;  %v4074_v57 = vpop.permute.xlu0 %1619  ;;  %v4084_v28 = vmul.f32 %v3384_v15, %v3132_v44  ;;  %5436 = vst [vmem:[#allocation123_spill] sm:$0xff] %v4094_v27  ;;  %v4118_v27 = vmul.f32 %v3382_v33, %v3180_v0 }
 0x1f7   :  { %5433 = vst [vmem:[#allocation120_spill] sm:$0xff] %v4072_v35  ;;  %5434 = vst [vmem:[#allocation121_spill] sm:$0xff] %v4074_v57  ;;  %1750 = vrot.lane.b32.xlu1 %v1728_v40, %s2932_s13  ;;  %1748 = vrot.lane.b32.xlu0 %v1727_v51, %s2932_s13  ;;  %v4102_v35 = vmul.f32 %v3384_v15, %v3168_v60  ;;  %v4106_v57 = vmul.f32 %v3384_v15, %v3180_v0 }
 0x1f8   :  { %v4110_v40 = vmul.f32 %v3382_v33, %v3149_v52  ;;  %v4114_v51 = vmul.f32 %v3382_v33, %v3168_v60  ;;  %5441 = vst [vmem:[#allocation128_spill] sm:$0xff] %v4118_v27 }
 0x1f9   :  { %5438 = vst [vmem:[#allocation125_spill] sm:$0xff] %v4102_v35  ;;  %5439 = vst [vmem:[#allocation126_spill] sm:$0xff] %v4106_v57  ;;  %v4126_v35 = vmul.f32 %v3382_v33, %v3190_v4  ;;  %v4130_v57 = vmul.f32 %v3382_v33, %v3165_v59 }
 0x1fa   :  { %5440 = vst [vmem:[#allocation127_spill] sm:$0xff] %v4114_v51  ;;  %v4138_v51 = vmul.f32 %v3382_v33, %v3250_v29  ;;  %v4140_v27 = vpop.permute.xlu1 %1256  ;;  %v4142_v15 = vpop.permute.xlu0 %946  ;;  %v4160_v33 = vmul.f32 %v3398_v42, %v3165_v59 }
 0x1fb   :  { %5443 = vst [vmem:[#allocation130_spill] sm:$0xff] %v4126_v35  ;;  %5444 = vst [vmem:[#allocation131_spill] sm:$0xff] %v4130_v57  ;;  %v4150_v35 = vmul.f32 %v3398_v42, %v3129_v43  ;;  %v4154_v57 = vmul.f32 %v3398_v42, %v3149_v52  ;;  %1801 = vrot.lane.b32.xlu1 %v1780_v38, %s2933_s16  ;;  %1752 = vrot.lane.b32.xlu0 %v1729_v61, %s2932_s13 }
 0x1fc   :  { %5445 = vst [vmem:[#allocation132_spill] sm:$0xff] %v4138_v51  ;;  %5446 = vst [vmem:[#allocation133_spill] sm:$0xff] %v4140_v27  ;;  %v4164_v27 = vmul.f32 %v3396_v41, %v3227_v20  ;;  %v4172_v51 = vmul.f32 %v3398_v42, %v3168_v60  ;;  %v4176_v38 = vmul.f32 %v3396_v41, %v3180_v0 }
 0x1fd   :  { %5447 = vst [vmem:[#allocation134_spill] sm:$0xff] %v4142_v15  ;;  %5448 = vst [vmem:[#allocation135_spill] sm:$0xff] %v4160_v33  ;;  %v4168_v15 = vmul.f32 %v3396_v41, %v3132_v44  ;;  %v4180_v61 = vmul.f32 %v3398_v42, %v3180_v0  ;;  %v4184_v33 = vmul.f32 %v3396_v41, %v3129_v43 }
 0x1fe   :  { %5449 = vst [vmem:[#allocation136_spill] sm:$0xff] %v4164_v27  ;;  %5451 = vst [vmem:[#allocation138_spill] sm:$0xff] %v4172_v51  ;;  %v4188_v27 = vmul.f32 %v3396_v41, %v3149_v52  ;;  %v4196_v51 = vmul.f32 %v3410_v54, %v3129_v43  ;;  %v4208_v41 = vpop.permute.xlu0 %1305 }
 0x1ff   :  { %5450 = vst [vmem:[#allocation137_spill] sm:$0xff] %v4168_v15  ;;  %5452 = vst [vmem:[#allocation139_spill] sm:$0xff] %v4176_v38  ;;  %v4192_v15 = vmul.f32 %v3398_v42, %v3190_v4  ;;  %v4200_v38 = vmul.f32 %v3398_v42, %v3250_v29  ;;  %1805 = vrot.lane.b32.xlu1 %v1782_v56, %s2933_s16  ;;  %1803 = vrot.lane.b32.xlu0 %v1781_v31, %s2933_s16 }
 0x200   :  { %5453 = vst [vmem:[#allocation140_spill] sm:$0xff] %v4180_v61  ;;  %5454 = vst [vmem:[#allocation141_spill] sm:$0xff] %v4184_v33  ;;  %v4204_v61 = vmul.f32 %v3410_v54, %v3149_v52  ;;  %v4206_v33 = vpop.permute.xlu1 %1311  ;;  %v178_v42 = vadd.f32 %v3418_v58, %v117_v48  ;;  %v1854_v31 = vmul.f32 %v3358_v17, %v3165_v59 }
 0x201   :  { %5455 = vst [vmem:[#allocation142_spill] sm:$0xff] %v4188_v27  ;;  %5456 = vst [vmem:[#allocation143_spill] sm:$0xff] %v4192_v15  ;;  %v177_v27 = vadd.f32 %v3420_v63, %v116_v2  ;;  %v4213_v15 = vmul.f32 %v3410_v54, %v3168_v60  ;;  %v4228_v63 = vmul.f32 %v3410_v54, %v3250_v29 }
 0x202   :  { %5457 = vst [vmem:[#allocation144_spill] sm:$0xff] %v4196_v51  ;;  %5458 = vst [vmem:[#allocation145_spill] sm:$0xff] %v4206_v33  ;;  %v4217_v51 = vmul.f32 %v3408_v50, %v3132_v44  ;;  %v4224_v33 = vmul.f32 %v3410_v54, %v3180_v0  ;;  %v4233_v60 = vmul.f32 %v3408_v50, %v3129_v43  ;;  %v4252_v0 = vpop.permute.xlu0 %1615 }
 0x203   :  { %5459 = vst [vmem:[#allocation146_spill] sm:$0xff] %v4208_v41  ;;  %5460 = vst [vmem:[#allocation147_spill] sm:$0xff] %v4228_v63  ;;  %v230_v2 = vadd.f32 %v3430_v7, %v177_v27  ;;  %v497_v41 = vlaneseq  ;;  %v231_v58 = vadd.f32 %v3450_v26, %v178_v42  ;;  %v4240_v56 = vmul.f32 %v3410_v54, %v3190_v4  ;;  %1875 = vrot.lane.b32.xlu1 %v1854_v31, %s2932_s13 }
 0x204   :  { %5461 = vst [vmem:[#allocation148_spill] sm:$0xff] %v4233_v60  ;;  %v4244_v48 = vmul.f32 %v3408_v50, %v3149_v52  ;;  %v4248_v27 = vmul.f32 %v3408_v50, %v3190_v4  ;;  %v4250_v7 = vpop.permute.xlu1 %1664  ;;  %5463 = vst [vmem:[#allocation150_spill] sm:$0xff] %v4252_v0  ;;  %v2934_v60 = vmov 1983009808   ;;  %v4256_v26 = vmul.f32 %v3410_v54, %v3165_v59  ;;  %152 = vrot.lane.b32.xlu0 %v4004_v62, %s2932_s13 }
 0x205   :  { %5462 = vst [vmem:[#allocation149_spill] sm:$0xff] %v4250_v7  ;;  %v495_v63 = vunpack.c.l.s4 %v2934_v60  ;;  %v4263_v42 = vmul.f32 %v3410_v54, %v3061_v19  ;;  %v189_v7 = vmul.f32 %v3157_v55, %v3227_v20  ;;  %v179_v0 = vadd.f32 %v3428_v6, %v4024_v3 }
 0x206   :  { %v1855_v60 = vmul.f32 %v3358_v17, %v3250_v29  ;;  %v1907_v4 = vmul.f32 %v3356_v16, %v3165_v59  ;;  %v1856_v31 = vmul.f32 %v3358_v17, %v3061_v19  ;;  %v183_v62 = vadd.f32 %v3441_v13, %v4030_v11  ;;  %v4290_v13 = vpop.permute.xlu0 %899 }
 0x207   :  { %v180_v54 = vadd.f32 %v3443_v21, %v4034_v14  ;;  %v251_v55 = vadd.f32 %v4046_v53, %v230_v2  ;;  %v4280_v20 = vshrl.u32 %v497_v41, 7  ;;  %v181_v6 = vadd.f32 %v3448_v23, %v4038_v46  ;;  %205 = vrot.lane.b32.xlu1 %v189_v7, %s2933_s16  ;;  %v5464_v53 = vld [vmem:[#allocation15_spill] sm:$0xff] }
 0x208   :  { %v182_v3 = vadd.f32 %v3458_v18, %v4042_v32  ;;  %v232_v59 = vadd.f32 %v3460_v36, %v179_v0  ;;  %v252_v17 = vadd.f32 %v4050_v39, %v231_v58  ;;  %v4288_v50 = vpop.permute.xlu1 %948  ;;  %v236_v21 = vadd.f32 %v3468_v45, %v183_v62  ;;  %1877 = vrot.lane.b32.xlu0 %v1855_v60, %s2932_s13  ;;  %v5465_v39 = vld [vmem:[#allocation14_spill] sm:$0xff]  ;;  %v5470_v60 = vld [vmem:[#allocation119_spill] sm:$0xff] }
 0x209   :  { %v233_v14 = vadd.f32 %v3470_v49, %v180_v54  ;;  %v304_v41 = vadd.f32 %v3478_v1, %v251_v55  ;;  %v496_v11 = vunpack.c.0.s8 %v495_v63  ;;  %v234_v23 = vadd.f32 %v3480_v5, %v181_v6  ;;  %v5466_v63 = vld [vmem:[#allocation117_spill] sm:$0xff]  ;;  %v5471_v55 = vld [vmem:[#allocation23_spill] sm:$0xff] }
 0x20a   :  { %v235_v0 = vadd.f32 %v3488_v25, %v182_v3  ;;  %v305_v18 = vadd.f32 %v3490_v22, %v252_v17  ;;  %v1909_v36 = vmul.f32 %v3356_v16, %v3061_v19  ;;  %v1908_v49 = vmul.f32 %v3356_v16, %v3250_v29  ;;  %v4313_v22 = vpop.permute.xlu0 %1307  ;;  %v5472_v3 = vld [vmem:[#allocation24_spill] sm:$0xff] }
 0x20b   :  { %v357_v45 = vadd.f32 %v3510_v12, %v304_v41  ;;  %v316_v1 = vmul.f32 %v3236_v24, %v3132_v44  ;;  %v263_v32 = vmul.f32 %v3204_v9, %v3132_v44  ;;  %v253_v5 = vadd.f32 %v4054_v8, %v232_v59  ;;  %v5467_v24 = vld [vmem:[#allocation118_spill] sm:$0xff]  ;;  %1928 = vrot.lane.b32.xlu1 %v1907_v4, %s2933_s16  ;;  %v5468_v59 = vld [vmem:[#allocation21_spill] sm:$0xff] }
 0x20c   :  { %v358_v25 = vadd.f32 %v3528_v37, %v305_v18  ;;  %v4311_v46 = vpop.permute.xlu1 %1617  ;;  %v443_v12 = vmul.f32 %v5464_v53, %v3129_v43  ;;  %v390_v16 = vmul.f32 %v5465_v39, %v3129_v43  ;;  %v254_v2 = vadd.f32 %v5466_v63, %v233_v14  ;;  %1879 = vrot.lane.b32.xlu0 %v1856_v31, %s2932_s13  ;;  %v5469_v8 = vld [vmem:[#allocation22_spill] sm:$0xff]  ;;  %v5476_v18 = vld [vmem:[#allocation27_spill] sm:$0xff]  ;;  %v5477_v53 = vld [vmem:[#allocation28_spill] sm:$0xff] }
 0x20d   :  { %v257_v58 = vadd.f32 %v5467_v24, %v236_v21  ;;  %v4322_v9 = vsub.s32 %v496_v11, %v4280_v20  ;;  %v306_v37 = vadd.f32 %v5468_v59, %v253_v5  ;;  %v655_v7 = vadd.f32 %v5469_v8, %v4080_v47  ;;  %v5473_v21 = vld [vmem:[#allocation25_spill] sm:$0xff]  ;;  %v5474_v41 = vld [vmem:[#allocation122_spill] sm:$0xff]  ;;  %v5478_v39 = vld [vmem:[#allocation127_spill] sm:$0xff] }
 0x20e   :  { %v255_v62 = vadd.f32 %v5470_v60, %v234_v23  ;;  %v256_v54 = vadd.f32 %v4070_v30, %v235_v0  ;;  %v656_v6 = vadd.f32 %v5471_v55, %v4084_v28  ;;  %v307_v17 = vadd.f32 %v5472_v3, %v254_v2  ;;  %v5475_v31 = vld [vmem:[#allocation26_spill] sm:$0xff]  ;;  %v4343_v30 = vpop.permute.xlu0 %1666  ;;  %v5479_v28 = vld [vmem:[#allocation29_spill] sm:$0xff]  ;;  %v5480_v2 = vld [vmem:[#allocation123_spill] sm:$0xff] }
 0x20f   :  { %v310_v14 = vadd.f32 %v5473_v21, %v257_v58  ;;  %v378_v4 = vadd.f32 %v4110_v40, %v357_v45  ;;  %v657_v11 = vadd.f32 %v5475_v31, %v5474_v41  ;;  %v708_v5 = vadd.f32 %v5476_v18, %v655_v7  ;;  %v5481_v24 = vld [vmem:[#allocation30_spill] sm:$0xff]  ;;  %v5482_v59 = vld [vmem:[#allocation124_spill] sm:$0xff]  ;;  %v5483_v40 = vld [vmem:[#allocation31_spill] sm:$0xff]  ;;  %1932 = vrot.lane.b32.xlu1 %v1909_v36, %s2933_s16 }
 0x210   :  { %v308_v47 = vadd.f32 %v5477_v53, %v255_v62  ;;  %v379_v23 = vadd.f32 %v5478_v39, %v358_v25  ;;  %v4341_v63 = vpop.permute.xlu1 %1672  ;;  %v359_v0 = vadd.f32 %v5479_v28, %v306_v37  ;;  %v658_v58 = vadd.f32 %v5481_v24, %v5480_v2  ;;  %1930 = vrot.lane.b32.xlu0 %v1908_v49, %s2933_s16  ;;  %v5484_v8 = vld [vmem:[#allocation32_spill] sm:$0xff]  ;;  %v5485_v60 = vld [vmem:[#allocation33_spill] sm:$0xff]  ;;  %v5486_v62 = vld [vmem:[#allocation34_spill] sm:$0xff] }
 0x211   :  { %v661_v45 = vadd.f32 %v5483_v40, %v5482_v59  ;;  %v709_v7 = vadd.f32 %v5484_v8, %v656_v6  ;;  %v360_v25 = vadd.f32 %v5485_v60, %v307_v17  ;;  %v309_v55 = vadd.f32 %v5486_v62, %v256_v54  ;;  %v5487_v3 = vld [vmem:[#allocation125_spill] sm:$0xff]  ;;  %v5488_v21 = vld [vmem:[#allocation35_spill] sm:$0xff]  ;;  %v5489_v37 = vld [vmem:[#allocation36_spill] sm:$0xff] }
 0x212   :  { %v659_v41 = vadd.f32 %v5488_v21, %v5487_v3  ;;  %v363_v31 = vadd.f32 %v5489_v37, %v310_v14  ;;  %v5490_v18 = vld [vmem:[#allocation38_spill] sm:$0xff]  ;;  %v5491_v39 = vld [vmem:[#allocation37_spill] sm:$0xff]  ;;  %v5493_v24 = vld [vmem:[#allocation40_spill] sm:$0xff]  ;;  %v4368_v3 = vpop.permute.xlu0 %1260 }
 0x213   :  { %v361_v53 = vadd.f32 %v5490_v18, %v308_v47  ;;  %v710_v28 = vadd.f32 %v5491_v39, %v657_v11  ;;  %v5492_v2 = vld [vmem:[#allocation126_spill] sm:$0xff]  ;;  %v5494_v59 = vld [vmem:[#allocation39_spill] sm:$0xff]  ;;  %v5496_v8 = vld [vmem:[#allocation41_spill] sm:$0xff]  ;;  %v729_v47 = vadd.f32 %v4146_v10, %v708_v5  ;;  %332 = vrot.lane.b32.xlu1 %v316_v1, %s2933_s16 }
 0x214   :  { %v660_v36 = vadd.f32 %v5493_v24, %v5492_v2  ;;  %v431_v49 = vadd.f32 %v5494_v59, %v378_v4  ;;  %v5495_v40 = vld [vmem:[#allocation43_spill] sm:$0xff]  ;;  %v711_v17 = vadd.f32 %v5496_v8, %v658_v58  ;;  %v5497_v60 = vld [vmem:[#allocation42_spill] sm:$0xff]  ;;  %v4366_v62 = vpop.permute.xlu1 %1309  ;;  %v5498_v14 = vld [vmem:[#allocation45_spill] sm:$0xff]  ;;  %279 = vrot.lane.b32.xlu0 %v263_v32, %s2932_s13  ;;  %v730_v2 = vadd.f32 %v4150_v35, %v709_v7 }
 0x215   :  { %v714_v6 = vadd.f32 %v5495_v40, %v661_v45  ;;  %v362_v54 = vadd.f32 %v5497_v60, %v309_v55  ;;  %v432_v21 = vadd.f32 %v5498_v14, %v379_v23  ;;  %v5499_v11 = vld [vmem:[#allocation128_spill] sm:$0xff]  ;;  %v5501_v18 = vld [vmem:[#allocation50_spill] sm:$0xff]  ;;  %v5502_v39 = vld [vmem:[#allocation53_spill] sm:$0xff]  ;;  %v384_v5 = vadd.f32 %v4134_v34, %v363_v31 }
 0x216   :  { %v380_v37 = vadd.f32 %v5499_v11, %v359_v0  ;;  %v5500_v4 = vld [vmem:[#allocation44_spill] sm:$0xff]  ;;  %v484_v58 = vadd.f32 %v5501_v18, %v431_v49  ;;  %v713_v55 = vadd.f32 %v5502_v39, %v660_v36  ;;  %v5503_v24 = vld [vmem:[#allocation130_spill] sm:$0xff]  ;;  %v5505_v8 = vld [vmem:[#allocation131_spill] sm:$0xff]  ;;  %v731_v1 = vadd.f32 %v4154_v57, %v710_v28  ;;  %v4389_v36 = vpop.permute.xlu0 %1375 }
 0x217   :  { %v712_v45 = vadd.f32 %v5500_v4, %v659_v41  ;;  %v381_v59 = vadd.f32 %v5503_v24, %v360_v25  ;;  %v5504_v40 = vld [vmem:[#allocation52_spill] sm:$0xff]  ;;  %v382_v10 = vadd.f32 %v5505_v8, %v361_v53  ;;  %v5506_v0 = vld [vmem:[#allocation135_spill] sm:$0xff]  ;;  %v5508_v14 = vld [vmem:[#allocation138_spill] sm:$0xff]  ;;  %459 = vrot.lane.b32.xlu1 %v443_v12, %s2933_s16 }
 0x218   :  { %v485_v23 = vadd.f32 %v5504_v40, %v432_v21  ;;  %v735_v32 = vadd.f32 %v5506_v0, %v714_v6  ;;  %v5507_v60 = vld [vmem:[#allocation132_spill] sm:$0xff]  ;;  %v732_v49 = vadd.f32 %v5508_v14, %v711_v17  ;;  %v4387_v11 = vpop.permute.xlu1 %1668  ;;  %v5510_v25 = vld [vmem:[#allocation46_spill] sm:$0xff]  ;;  %v5511_v4 = vld [vmem:[#allocation51_spill] sm:$0xff]  ;;  %406 = vrot.lane.b32.xlu0 %v390_v16, %s2932_s13  ;;  %v500_v57 = vrot.slane %v484_v58, %v4322_v9 }
 0x219   :  { %v383_v41 = vadd.f32 %v5507_v60, %v362_v54  ;;  %v5509_v35 = vld [vmem:[#allocation48_spill] sm:$0xff]  ;;  %v433_v21 = vadd.f32 %v5510_v25, %v380_v37  ;;  %v434_v53 = vadd.f32 %v5511_v4, %v381_v59  ;;  %v5512_v34 = vld [vmem:[#allocation129_spill] sm:$0xff]  ;;  %v5513_v31 = vld [vmem:[#allocation47_spill] sm:$0xff] }
 0x21a   :  { %v782_v7 = vadd.f32 %v5509_v35, %v729_v47  ;;  %v662_v28 = vadd.f32 %v5513_v31, %v5512_v34  ;;  %v5514_v6 = vld [vmem:[#allocation140_spill] sm:$0xff]  ;;  %v5515_v54 = vld [vmem:[#allocation143_spill] sm:$0xff]  ;;  %v513_v39 = vrot.slane %v485_v23, %v4322_v9  ;;  %v5516_v47 = vld [vmem:[#allocation54_spill] sm:$0xff] }
 0x21b   :  { %v733_v17 = vadd.f32 %v5514_v6, %v712_v45  ;;  %v734_v18 = vadd.f32 %v5515_v54, %v713_v55  ;;  %v5517_v37 = vld [vmem:[#allocation63_spill] sm:$0xff]  ;;  %v5518_v59 = vld [vmem:[#allocation70_spill] sm:$0xff]  ;;  %v5519_v12 = vld [vmem:[#allocation49_spill] sm:$0xff]  ;;  %v4411_v45 = vpop.permute.xlu0 %952 }
 0x21c   :  { %v835_v24 = vadd.f32 %v5516_v47, %v782_v7  ;;  %v486_v40 = vadd.f32 %v5517_v37, %v433_v21  ;;  %v487_v8 = vadd.f32 %v5518_v59, %v434_v53  ;;  %v783_v0 = vadd.f32 %v5519_v12, %v730_v2  ;;  %v5520_v16 = vld [vmem:[#allocation56_spill] sm:$0xff]  ;;  %v5521_v58 = vld [vmem:[#allocation57_spill] sm:$0xff]  ;;  %v5522_v35 = vld [vmem:[#allocation59_spill] sm:$0xff]  ;;  %v4409_v4 = vpop.permute.xlu1 %1262  ;;  %514 = vrot.lane.b32.xlu1 %v513_v39, %s2935_s1 }
 0x21d   :  { %v435_v60 = vadd.f32 %v5520_v16, %v382_v10  ;;  %v437_v14 = vadd.f32 %v5521_v58, %v384_v5  ;;  %v784_v25 = vadd.f32 %v5522_v35, %v731_v1  ;;  %v5523_v55 = vld [vmem:[#allocation58_spill] sm:$0xff]  ;;  %v5524_v34 = vld [vmem:[#allocation60_spill] sm:$0xff]  ;;  %v5526_v21 = vld [vmem:[#allocation61_spill] sm:$0xff]  ;;  %501 = vrot.lane.b32.xlu0 %v500_v57, %s2936_s28  ;;  %s2948_s28 = smov 32  }
 0x21e   :  { %v715_v23 = vadd.f32 %v5523_v55, %v662_v28  ;;  %v788_v7 = vadd.f32 %v5524_v34, %v735_v32  ;;  %v5525_v31 = vld [vmem:[#allocation136_spill] sm:$0xff]  ;;  %v5527_v2 = vld [vmem:[#allocation65_spill] sm:$0xff]  ;;  %v5528_v5 = vld [vmem:[#allocation67_spill] sm:$0xff]  ;;  %v526_v59 = vrot.slane %v486_v40, %v4322_v9  ;;  %v539_v28 = vrot.slane %v487_v8, %v4322_v9 }
 0x21f   :  { %v1145_v6 = vadd.f32 %v5526_v21, %v5525_v31  ;;  %v785_v10 = vadd.f32 %v5527_v2, %v732_v49  ;;  %v490_v53 = vadd.f32 %v5528_v5, %v437_v14  ;;  %v5529_v1 = vld [vmem:[#allocation66_spill] sm:$0xff]  ;;  %v5530_v47 = vld [vmem:[#allocation69_spill] sm:$0xff]  ;;  %v5532_v16 = vld [vmem:[#allocation144_spill] sm:$0xff] }
 0x220   :  { %v836_v54 = vadd.f32 %v5529_v1, %v783_v0  ;;  %v837_v37 = vadd.f32 %v5530_v47, %v784_v25  ;;  %v5531_v32 = vld [vmem:[#allocation74_spill] sm:$0xff]  ;;  %v856_v58 = vadd.f32 %v5532_v16, %v835_v24  ;;  %v5533_v35 = vld [vmem:[#allocation64_spill] sm:$0xff]  ;;  %v5534_v55 = vld [vmem:[#allocation77_spill] sm:$0xff]  ;;  %v4429_v21 = vpop.permute.xlu1 %1670  ;;  %v4431_v0 = vpop.permute.xlu0 %1377  ;;  %540 = vrot.lane.b32.xlu1 %v539_v28, %s2937_s29  ;;  %s2949_s29 = smov 14  }
 0x221   :  { %v488_v12 = vadd.f32 %v5531_v32, %v435_v60  ;;  %v436_v39 = vadd.f32 %v5533_v35, %v383_v41  ;;  %v838_v57 = vadd.f32 %v5534_v55, %v785_v10  ;;  %v5535_v34 = vld [vmem:[#allocation75_spill] sm:$0xff]  ;;  %v5536_v31 = vld [vmem:[#allocation78_spill] sm:$0xff]  ;;  %v5537_v25 = vld [vmem:[#allocation137_spill] sm:$0xff]  ;;  %v736_v60 = vadd.f32 %v4200_v38, %v715_v23  ;;  %527 = vrot.lane.b32.xlu0 %v526_v59, %s2938_s30 }
 0x222   :  { %v1198_v49 = vadd.f32 %v5535_v34, %v1145_v6  ;;  %v841_v14 = vadd.f32 %v5536_v31, %v788_v7  ;;  %v5538_v40 = vld [vmem:[#allocation62_spill] sm:$0xff]  ;;  %v5539_v8 = vld [vmem:[#allocation83_spill] sm:$0xff]  ;;  %v578_v41 = vrot.slane %v490_v53, %v4322_v9  ;;  %v5540_v24 = vld [vmem:[#allocation81_spill] sm:$0xff]  ;;  %v857_v7 = vadd.f32 %v4204_v61, %v836_v54 }
 0x223   :  { %v1146_v2 = vadd.f32 %v5538_v40, %v5537_v25  ;;  %v909_v5 = vadd.f32 %v5539_v8, %v856_v58  ;;  %v489_v6 = vadd.f32 %v5540_v24, %v436_v39  ;;  %v858_v10 = vadd.f32 %v4213_v15, %v837_v37  ;;  %v5541_v47 = vld [vmem:[#allocation71_spill] sm:$0xff]  ;;  %v5542_v16 = vld [vmem:[#allocation141_spill] sm:$0xff]  ;;  %v5544_v38 = vld [vmem:[#allocation94_spill] sm:$0xff] }
 0x224   :  { %v552_v1 = vrot.slane %v488_v12, %v4322_v9  ;;  %v786_v32 = vadd.f32 %v5541_v47, %v733_v17  ;;  %v5543_v58 = vld [vmem:[#allocation73_spill] sm:$0xff]  ;;  %v5545_v28 = vld [vmem:[#allocation76_spill] sm:$0xff]  ;;  %v1219_v59 = vadd.f32 %v4217_v51, %v1198_v49  ;;  %v859_v53 = vadd.f32 %v4224_v33, %v838_v57  ;;  %v5546_v39 = vld [vmem:[#allocation147_spill] sm:$0xff]  ;;  %v4450_v61 = vpop.permute.xlu1 %1379  ;;  %v4452_v15 = vpop.permute.xlu0 %1313 }
 0x225   :  { %v1147_v35 = vadd.f32 %v5543_v58, %v5542_v16  ;;  %v962_v23 = vadd.f32 %v5544_v38, %v909_v5  ;;  %v787_v55 = vadd.f32 %v5545_v28, %v734_v18  ;;  %v862_v34 = vadd.f32 %v5546_v39, %v841_v14  ;;  %v5547_v54 = vld [vmem:[#allocation80_spill] sm:$0xff]  ;;  %v5548_v17 = vld [vmem:[#allocation89_spill] sm:$0xff]  ;;  %v5549_v31 = vld [vmem:[#allocation91_spill] sm:$0xff]  ;;  %579 = vrot.lane.b32.xlu0 %v578_v41, %s2933_s16 }
 0x226   :  { %v1199_v37 = vadd.f32 %v5547_v54, %v1146_v2  ;;  %v910_v12 = vadd.f32 %v5548_v17, %v857_v7  ;;  %v911_v25 = vadd.f32 %v5549_v31, %v858_v10  ;;  %553 = vrot.lane.b32.xlu1 %v552_v1, %s2939_s8  ;;  %v565_v51 = vrot.slane %v489_v6, %v4322_v9  ;;  %v5550_v18 = vld [vmem:[#allocation84_spill] sm:$0xff]  ;;  %v5551_v57 = vld [vmem:[#allocation85_spill] sm:$0xff]  ;;  %v5552_v14 = vld [vmem:[#allocation87_spill] sm:$0xff] }
 0x227   :  { %v839_v33 = vadd.f32 %v5550_v18, %v786_v32  ;;  %v1200_v49 = vadd.f32 %v5551_v57, %v1147_v35  ;;  %v789_v40 = vadd.f32 %v5552_v14, %v736_v60  ;;  %v5553_v8 = vld [vmem:[#allocation90_spill] sm:$0xff]  ;;  %v977_v2 = vrot.slane %v962_v23, %v4322_v9  ;;  %v5554_v24 = vld [vmem:[#allocation99_spill] sm:$0xff]  ;;  %v5557_v58 = vld [vmem:[#allocation97_spill] sm:$0xff] }
 0x228   :  { %v840_v5 = vadd.f32 %v5553_v8, %v787_v55  ;;  %v963_v7 = vadd.f32 %v5554_v24, %v910_v12  ;;  %v5555_v47 = vld [vmem:[#allocation103_spill] sm:$0xff]  ;;  %v912_v41 = vadd.f32 %v5557_v58, %v859_v53  ;;  %v5558_v38 = vld [vmem:[#allocation98_spill] sm:$0xff]  ;;  %v5559_v28 = vld [vmem:[#allocation100_spill] sm:$0xff]  ;;  %v4470_v39 = vpop.permute.xlu1 %1428  ;;  %v4472_v35 = vpop.permute.xlu0 %1385 }
 0x229   :  { %v964_v10 = vadd.f32 %v5555_v47, %v911_v25  ;;  %v5556_v16 = vld [vmem:[#allocation95_spill] sm:$0xff]  ;;  %v842_v6 = vadd.f32 %v5558_v38, %v789_v40  ;;  %v915_v32 = vadd.f32 %v5559_v28, %v862_v34  ;;  %v5561_v55 = vld [vmem:[#allocation72_spill] sm:$0xff]  ;;  %566 = vrot.lane.b32.xlu0 %v565_v51, %s2941_s2  ;;  %v5567_v47 = vld [vmem:[#allocation142_spill] sm:$0xff]  ;;  %s2947_s2 = smov 88  }
 0x22a   :  { %v1272_v1 = vadd.f32 %v5556_v16, %v1219_v59  ;;  %v5560_v60 = vld [vmem:[#allocation139_spill] sm:$0xff]  ;;  %v5562_v23 = vld [vmem:[#allocation148_spill] sm:$0xff]  ;;  %978 = vrot.lane.b32.xlu1 %v977_v2, %s2940_s9  ;;  %v860_v59 = vadd.f32 %v4240_v56, %v839_v33  ;;  %v990_v40 = vrot.slane %v963_v7, %v4322_v9  ;;  %v861_v24 = vadd.f32 %v4256_v26, %v840_v5  ;;  %v5570_v56 = vld [vmem:[#allocation101_spill] sm:$0xff]  ;;  %s2946_s9 = smov 106  }
 0x22b   :  { %v1150_v54 = vadd.f32 %v5561_v55, %v5560_v60  ;;  %v1220_v17 = vadd.f32 %v5562_v23, %v1199_v37  ;;  %v5563_v12 = vld [vmem:[#allocation68_spill] sm:$0xff]  ;;  %v5564_v53 = vld [vmem:[#allocation107_spill] sm:$0xff]  ;;  %v1003_v8 = vrot.slane %v964_v10, %v4322_v9  ;;  %v1221_v37 = vadd.f32 %v4244_v48, %v1200_v49  ;;  %v5572_v10 = vld [vmem:[#allocation105_spill] sm:$0xff] }
 0x22c   :  { %v1338_v31 = vmul.f32 %v5563_v12, %v3129_v43  ;;  %v1325_v34 = vadd.f32 %v5564_v53, %v1272_v1  ;;  %v5565_v25 = vld [vmem:[#allocation111_spill] sm:$0xff]  ;;  %v5566_v57 = vld [vmem:[#allocation112_spill] sm:$0xff]  ;;  %v863_v1 = vadd.f32 %v4263_v42, %v842_v6  ;;  %v4492_v38 = vpop.permute.xlu1 %1315  ;;  %v5573_v48 = vld [vmem:[#allocation109_spill] sm:$0xff] }
 0x22d   :  { %v968_v18 = vadd.f32 %v5565_v25, %v915_v32  ;;  %v965_v14 = vadd.f32 %v5566_v57, %v912_v41  ;;  %v5568_v2 = vld [vmem:[#allocation79_spill] sm:$0xff]  ;;  %v5569_v51 = vld [vmem:[#allocation88_spill] sm:$0xff]  ;;  %v1273_v33 = vadd.f32 %v5570_v56, %v1220_v17  ;;  %v4494_v41 = vpop.permute.xlu0 %1738  ;;  %v1274_v32 = vadd.f32 %v5572_v10, %v1221_v37  ;;  %991 = vrot.lane.b32.xlu0 %v990_v40, %s2943_s11  ;;  %v5575_v53 = vld [vmem:[#allocation134_spill] sm:$0xff]  ;;  %s2955_s11 = smov 12  }
 0x22e   :  { %v1148_v16 = vadd.f32 %v5568_v2, %v5567_v47  ;;  %v1203_v58 = vadd.f32 %v5569_v51, %v1150_v54  ;;  %v5571_v7 = vld [vmem:[#allocation104_spill] sm:$0xff]  ;;  %v914_v49 = vadd.f32 %v5573_v48, %v861_v24  ;;  %1004 = vrot.lane.b32.xlu1 %v1003_v8, %s2942_s10  ;;  %v2062_v26 = vld [vmem:[%s5294_s3 + $0x8] sm:$0xff]  ;;  %v1346_v60 = vadd.f32 %v1338_v31, %v1325_v34  ;;  %v2061_v54 = vld [vmem:[%s5294_s3] sm:$0xff]  ;;  %s2964_s10 = smov 28  }
 0x22f   :  { %v913_v28 = vadd.f32 %v5571_v7, %v860_v59  ;;  %v2064_v42 = vld [vmem:[%s5294_s3 + $0x18] sm:$0xff]  ;;  %v1055_v5 = vrot.slane %v968_v18, %v4322_v9  ;;  %v1016_v6 = vrot.slane %v965_v14, %v4322_v9  ;;  %v2063_v23 = vld [vmem:[%s5294_s3 + $0x10] sm:$0xff]  ;;  %v5576_v18 = vld [vmem:[#allocation10_spill] sm:$0xff]  ;;  %v916_v24 = vadd.f32 %v4290_v13, %v863_v1 }
 0x230   :  { %v2646_v55 = vpack.c.bf16 %v2064_v42, %v2062_v26  ;;  %v5574_v17 = vld [vmem:[#allocation116_spill] sm:$0xff]  ;;  %v967_v57 = vadd.f32 %v4288_v50, %v914_v49  ;;  %v2648_v40 = vpack.c.bf16 %v2063_v23, %v2061_v54  ;;  %v5577_v8 = vld [vmem:[#allocation19_spill] sm:$0xff]  ;;  %v1224_v37 = vadd.f32 %v4248_v27, %v1203_v58  ;;  %v1431_v47 = vpop.permute.xlu1 %1430  ;;  %v5579_v51 = vld [vmem:[#allocation146_spill] sm:$0xff] }
 0x231   :  { %v1326_v59 = vadd.f32 %v5574_v17, %v1273_v33  ;;  %v966_v25 = vadd.f32 %v5575_v53, %v913_v28  ;;  %v4518_v14 = vmul.f32 %v5577_v8, %v5576_v18  ;;  %v5578_v31 = vld [vmem:[#allocation92_spill] sm:$0xff]  ;;  %v4523_v2 = vpop.permute.xlu0 %1381  ;;  %v1327_v56 = vadd.f32 %v5579_v51, %v1274_v32  ;;  %1017 = vrot.lane.b32.xlu0 %v1016_v6, %s2945_s0  ;;  %v2126_v48 = vld [vmem:[%s5294_s3 + $0x208] sm:$0xff]  ;;  %v5582_v42 = vld [vmem:[#allocation145_spill] sm:$0xff]  ;;  %s2961_s0 = smov 84  }
 0x232   :  { %v1201_v34 = vadd.f32 %v5578_v31, %v1148_v16  ;;  %2647 = vmatprep.subr.bf16.mxu1 %v2646_v55  ;;  %v1399_v33 = vadd.f32 %v4389_v36, %v1346_v60  ;;  %v1339_v50 = vmul.f32 %v5563_v12, %v3149_v52  ;;  %1056 = vrot.lane.b32.xlu1 %v1055_v5, %s2944_s20  ;;  %v5580_v16 = vld [vmem:[#allocation108_spill] sm:$0xff]  ;;  %v5583_v6 = vld [vmem:[#allocation9_spill] sm:$0xff]  ;;  %v2066_v17 = vld [vmem:[%s5294_s3 + $0x28] sm:$0xff]  ;;  %s2960_s20 = smov 102  }
 0x233   :  { %v1277_v7 = vadd.f32 %v5580_v16, %v1224_v37  ;;  %v5581_v27 = vld [vmem:[#allocation20_spill] sm:$0xff]  ;;  %v969_v58 = vadd.f32 %v4411_v45, %v916_v24  ;;  %v1340_v1 = vmul.f32 %v5563_v12, %v5576_v18  ;;  %2649 = vmatpush1.bf16.msra.mxu1 %v2648_v40  ;;  %v1029_v36 = vrot.slane %v966_v25, %v4322_v9  ;;  %v2125_v45 = vld [vmem:[%s5294_s3 + $0x200] sm:$0xff] }
 0x234   :  { %v1214_v13 = vmul.f32 %v5581_v27, %v5576_v18  ;;  %v1042_v28 = vrot.slane %v967_v57, %v4322_v9  ;;  %v1347_v10 = vadd.f32 %v1339_v50, %v1326_v59  ;;  %v1452_v32 = vadd.f32 %v4470_v39, %v1399_v33  ;;  %v2128_v49 = vld [vmem:[%s5294_s3 + $0x218] sm:$0xff]  ;;  %v4550_v55 = vpop.permute.xlu1 %1746  ;;  %v2127_v23 = vld [vmem:[%s5294_s3 + $0x210] sm:$0xff]  ;;  %v2065_v40 = vld [vmem:[%s5294_s3 + $0x20] sm:$0xff] }
 0x235   :  { %v1330_v5 = vadd.f32 %v5582_v42, %v1277_v7  ;;  %v1343_v60 = vmul.f32 %v5563_v12, %v5583_v6  ;;  %v4552_v39 = vpop.permute.xlu0 %1740  ;;  %v2710_v54 = vpack.c.bf16 %v2128_v49, %v2126_v48  ;;  %v2068_v59 = vld [vmem:[%s5294_s3 + $0x38] sm:$0xff]  ;;  %v1348_v25 = vadd.f32 %v1340_v1, %v1327_v56  ;;  %1030 = vrot.lane.b32.xlu0 %v1029_v36, %s2947_s2  ;;  %v2067_v31 = vld [vmem:[%s5294_s3 + $0x30] sm:$0xff]  ;;  %v2130_v56 = vld [vmem:[%s5294_s3 + $0x228] sm:$0xff]  ;;  %s2963_s2 = smov 46  }
 0x236   :  { %v1222_v26 = vadd.f32 %v1214_v13, %v1201_v34  ;;  %v1400_v53 = vadd.f32 %v4431_v0, %v1347_v10  ;;  %1043 = vrot.lane.b32.xlu1 %v1042_v28, %s2946_s9  ;;  %v2712_v57 = vpack.c.bf16 %v2127_v23, %v2125_v45  ;;  %v5584_v34 = vld [vmem:[#allocation113_spill] sm:$0xff]  ;;  %v1073_v24 = vrot.slane %v969_v58, %v4322_v9  ;;  %v2131_v1 = vld [vmem:[%s5294_s3 + $0x230] sm:$0xff]  ;;  %v2070_v36 = vld [vmem:[%s5294_s3 + $0x48] sm:$0xff] }
 0x237   :  { %2711 = vmatprep.subr.bf16.mxu0 %v2710_v54  ;;  %v2650_v0 = vpack.c.bf16 %v2068_v59, %v2066_v17  ;;  %v2652_v51 = vpack.c.bf16 %v2067_v31, %v2065_v40  ;;  %v2132_v33 = vld [vmem:[%s5294_s3 + $0x238] sm:$0xff]  ;;  %v2129_v50 = vld [vmem:[%s5294_s3 + $0x220] sm:$0xff]  ;;  %v1401_v16 = vadd.f32 %v4450_v61, %v1348_v25  ;;  %v1467_v7 = vrot.slane %v1452_v32, %v4322_v9  ;;  %v5585_v48 = vld [vmem:[#allocation11_spill] sm:$0xff] }
 0x238   :  { %v1275_v37 = vadd.f32 %v5584_v34, %v1222_v26  ;;  %v1453_v13 = vadd.f32 %v1431_v47, %v1400_v53  ;;  %2713 = vmatpush1.bf16.msra.mxu0 %v2712_v57  ;;  %v2714_v58 = vpack.c.bf16 %v2132_v33, %v2130_v56  ;;  %v2072_v28 = vld [vmem:[%s5294_s3 + $0x58] sm:$0xff]  ;;  %v1351_v10 = vadd.f32 %v1343_v60, %v1330_v5  ;;  %v1433_v32 = vpop.permute.xlu1 %1432  ;;  %v2069_v26 = vld [vmem:[%s5294_s3 + $0x40] sm:$0xff]  ;;  %v2071_v42 = vld [vmem:[%s5294_s3 + $0x50] sm:$0xff] }
 0x239   :  { %v1341_v61 = vmul.f32 %v5563_v12, %v5585_v48  ;;  %v4594_v47 = vpop.permute.xlu0 %1383  ;;  %2651 = vmatprep.subr.bf16.mxu1 %v2650_v0  ;;  %v2716_v49 = vpack.c.bf16 %v2131_v1, %v2129_v50  ;;  %v2654_v45 = vpack.c.bf16 %v2072_v28, %v2070_v36  ;;  %v5586_v54 = vld [vmem:[#allocation86_spill] sm:$0xff]  ;;  %v1454_v23 = vadd.f32 %v1433_v32, %v1401_v16  ;;  %v2136_v59 = vld [vmem:[%s5294_s3 + $0x258] sm:$0xff]  ;;  %v2135_v57 = vld [vmem:[%s5294_s3 + $0x250] sm:$0xff] }
 0x23a   :  { %v1149_v5 = vadd.f32 %v5586_v54, %v4518_v14  ;;  %v1328_v60 = vadd.f32 %v4313_v22, %v1275_v37  ;;  %1468 = vrot.lane.b32.xlu1 %v1467_v7, %s2948_s28  ;;  %1074 = vrot.lane.b32.xlu0 %v1073_v24, %s2949_s29  ;;  %v2134_v17 = vld [vmem:[%s5294_s3 + $0x248] sm:$0xff]  ;;  %v1404_v53 = vadd.f32 %v4472_v35, %v1351_v10  ;;  %v2133_v22 = vld [vmem:[%s5294_s3 + $0x240] sm:$0xff]  ;;  %v5587_v50 = vld [vmem:[#allocation96_spill] sm:$0xff]  ;;  %s2954_s28 = smov 104   ;;  %s2957_s29 = smov 48  }
 0x23b   :  { %2653 = vmatpush1.bf16.msra.mxu1 %v2652_v51  ;;  %2715 = vmatprep.subr.bf16.mxu0 %v2714_v58  ;;  %v2656_v14 = vpack.c.bf16 %v2071_v42, %v2069_v26  ;;  %v2718_v25 = vpack.c.bf16 %v2136_v59, %v2134_v17  ;;  %v2074_v40 = vld [vmem:[%s5294_s3 + $0x68] sm:$0xff]  ;;  %v1480_v31 = vrot.slane %v1453_v13, %v4322_v9  ;;  %v2076_v37 = vld [vmem:[%s5294_s3 + $0x78] sm:$0xff]  ;;  %v2073_v24 = vld [vmem:[%s5294_s3 + $0x60] sm:$0xff] }
 0x23c   :  { %v1493_v35 = vrot.slane %v1454_v23, %v4322_v9  ;;  %2717 = vmatpush1.bf16.msra.mxu0 %v2716_v49  ;;  %2655 = vmatprep.subr.bf16.mxu1 %v2654_v45  ;;  %v2720_v34 = vpack.c.bf16 %v2135_v57, %v2133_v22  ;;  %v2075_v0 = vld [vmem:[%s5294_s3 + $0x70] sm:$0xff]  ;;  %v4632_v51 = vpop.permute.xlu1 %1742  ;;  %v2658_v33 = vpack.c.bf16 %v2076_v37, %v2074_v40  ;;  %v2138_v58 = vld [vmem:[%s5294_s3 + $0x268] sm:$0xff]  ;;  %v2140_v1 = vld [vmem:[%s5294_s3 + $0x278] sm:$0xff] }
 0x23d   :  { %v1439_v56 = vpop.permute.xlu0 %1438  ;;  %2719 = vmatprep.subr.bf16.mxu0 %v2718_v25  ;;  %v1202_v16 = vadd.f32 %v5587_v50, %v1149_v5  ;;  %v1349_v7 = vadd.f32 %v1341_v61, %v1328_v60  ;;  %v1215_v36 = vmul.f32 %v5581_v27, %v5585_v48  ;;  %v2660_v28 = vpack.c.bf16 %v2075_v0, %v2073_v24  ;;  %v2137_v61 = vld [vmem:[%s5294_s3 + $0x260] sm:$0xff]  ;;  %v2139_v32 = vld [vmem:[%s5294_s3 + $0x270] sm:$0xff]  ;;  %v2078_v49 = vld [vmem:[%s5294_s3 + $0x88] sm:$0xff] }
 0x23e   :  { %v1457_v13 = vadd.f32 %v1439_v56, %v1404_v53  ;;  %1494 = vrot.lane.b32.xlu1 %v1493_v35, %s2950_s21  ;;  %1481 = vrot.lane.b32.xlu0 %v1480_v31, %s2951_s22  ;;  %v2722_v10 = vpack.c.bf16 %v2140_v1, %v2138_v58  ;;  %v2724_v42 = vpack.c.bf16 %v2139_v32, %v2137_v61  ;;  %v2080_v54 = vld [vmem:[%s5294_s3 + $0x98] sm:$0xff]  ;;  %v2077_v5 = vld [vmem:[%s5294_s3 + $0x80] sm:$0xff]  ;;  %s2956_s21 = smov 30  }
 0x23f   :  { %2657 = vmatpush1.bf16.msra.mxu1 %v2656_v14  ;;  %v1402_v45 = vadd.f32 %v4523_v2, %v1349_v7  ;;  %v2079_v60 = vld [vmem:[%s5294_s3 + $0x90] sm:$0xff]  ;;  %v2662_v53 = vpack.c.bf16 %v2080_v54, %v2078_v49  ;;  %v1223_v14 = vadd.f32 %v1215_v36, %v1202_v16  ;;  %v5589_v22 = vld [vmem:[#allocation93_spill] sm:$0xff]  ;;  %v2142_v37 = vld [vmem:[%s5294_s3 + $0x288] sm:$0xff]  ;;  %v1091_v56 = vmul.f32 %v5577_v8, %v5583_v6 }
 0x240   :  { %v1532_v26 = vrot.slane %v1457_v13, %v4322_v9  ;;  %2721 = vmatpush1.bf16.msra.mxu0 %v2720_v34  ;;  %2659 = vmatprep.subr.bf16.mxu1 %v2658_v33  ;;  %v5588_v23 = vld [vmem:[#allocation12_spill] sm:$0xff]  ;;  %v1435_v17 = vpop.permute.xlu1 %1434  ;;  %v2664_v40 = vpack.c.bf16 %v2079_v60, %v2077_v5  ;;  %v5590_v31 = vld [vmem:[#allocation133_spill] sm:$0xff]  ;;  %v5591_v33 = vld [vmem:[#allocation106_spill] sm:$0xff] }
 0x241   :  { %v1090_v2 = vmul.f32 %v5577_v8, %v5588_v23  ;;  %v4665_v59 = vpop.permute.xlu0 %1791  ;;  %2723 = vmatprep.subr.bf16.mxu0 %v2722_v10  ;;  %v1455_v25 = vadd.f32 %v1435_v17, %v1402_v45  ;;  %v1276_v35 = vadd.f32 %v5590_v31, %v1223_v14  ;;  %v2144_v24 = vld [vmem:[%s5294_s3 + $0x298] sm:$0xff]  ;;  %v2141_v0 = vld [vmem:[%s5294_s3 + $0x280] sm:$0xff]  ;;  %v2143_v58 = vld [vmem:[%s5294_s3 + $0x290] sm:$0xff] }
 0x242   :  { %1533 = vrot.lane.b32.xlu0 %v1532_v26, %s2952_s14  ;;  %v2726_v13 = vpack.c.bf16 %v2144_v24, %v2142_v37  ;;  %v2082_v1 = vld [vmem:[%s5294_s3 + $0xa8] sm:$0xff]  ;;  %v2084_v36 = vld [vmem:[%s5294_s3 + $0xb8] sm:$0xff]  ;;  %v2081_v61 = vld [vmem:[%s5294_s3 + $0xa0] sm:$0xff] }
 0x243   :  { %v1151_v57 = vadd.f32 %v5589_v22, %v1090_v2  ;;  %2661 = vmatpush1.bf16.msra.mxu1 %v2660_v28  ;;  %v1506_v34 = vrot.slane %v1455_v25, %v4322_v9  ;;  %v1329_v8 = vadd.f32 %v4366_v62, %v1276_v35  ;;  %v2728_v28 = vpack.c.bf16 %v2143_v58, %v2141_v0  ;;  %v2083_v32 = vld [vmem:[%s5294_s3 + $0xb0] sm:$0xff]  ;;  %v2146_v49 = vld [vmem:[%s5294_s3 + $0x2a8] sm:$0xff]  ;;  %v2148_v54 = vld [vmem:[%s5294_s3 + $0x2b8] sm:$0xff] }
 0x244   :  { %2725 = vmatpush1.bf16.msra.mxu0 %v2724_v42  ;;  %2663 = vmatprep.subr.bf16.mxu1 %v2662_v53  ;;  %v4682_v16 = vpop.permute.xlu1 %1793  ;;  %v2666_v10 = vpack.c.bf16 %v2084_v36, %v2082_v1  ;;  %v5592_v45 = vld [vmem:[#allocation102_spill] sm:$0xff]  ;;  %v1217_v62 = vmul.f32 %v5581_v27, %v5583_v6  ;;  %v2668_v42 = vpack.c.bf16 %v2083_v32, %v2081_v61  ;;  %v2147_v60 = vld [vmem:[%s5294_s3 + $0x2b0] sm:$0xff]  ;;  %v2088_v25 = vld [vmem:[%s5294_s3 + $0xd8] sm:$0xff] }
 0x245   :  { %v1204_v50 = vadd.f32 %v5591_v33, %v1151_v57  ;;  %v4684_v7 = vpop.permute.xlu0 %1744  ;;  %1507 = vrot.lane.b32.xlu1 %v1506_v34, %s2953_s26  ;;  %v1152_v26 = vadd.f32 %v5592_v45, %v1091_v56  ;;  %2727 = vmatprep.subr.bf16.mxu0 %v2726_v13  ;;  %v2145_v5 = vld [vmem:[%s5294_s3 + $0x2a0] sm:$0xff]  ;;  %v1342_v2 = vmul.f32 %v5563_v12, %v5588_v23  ;;  %v2086_v14 = vld [vmem:[%s5294_s3 + $0xc8] sm:$0xff]  ;;  %v2087_v24 = vld [vmem:[%s5294_s3 + $0xd0] sm:$0xff] }
 0x246   :  { %v2730_v17 = vpack.c.bf16 %v2148_v54, %v2146_v49  ;;  %v2732_v53 = vpack.c.bf16 %v2147_v60, %v2145_v5  ;;  %v2085_v22 = vld [vmem:[%s5294_s3 + $0xc0] sm:$0xff]  ;;  %v2670_v37 = vpack.c.bf16 %v2088_v25, %v2086_v14  ;;  %v2150_v0 = vld [vmem:[%s5294_s3 + $0x2c8] sm:$0xff]  ;;  %v2152_v56 = vld [vmem:[%s5294_s3 + $0x2d8] sm:$0xff] }
 0x247   :  { %2665 = vmatpush1.bf16.msra.mxu1 %v2664_v40  ;;  %v5593_v57 = vld [vmem:[#allocation114_spill] sm:$0xff]  ;;  %v1225_v31 = vadd.f32 %v1217_v62, %v1204_v50  ;;  %v1350_v33 = vadd.f32 %v1342_v2, %v1329_v8  ;;  %v2734_v50 = vpack.c.bf16 %v2152_v56, %v2150_v0  ;;  %v2151_v58 = vld [vmem:[%s5294_s3 + $0x2d0] sm:$0xff]  ;;  %v5594_v36 = vld [vmem:[#allocation13_spill] sm:$0xff]  ;;  %v1218_v8 = vmul.f32 %v5581_v27, %v3250_v29 }
 0x248   :  { %2729 = vmatpush1.bf16.msra.mxu0 %v2728_v28  ;;  %2667 = vmatprep.subr.bf16.mxu1 %v2666_v10  ;;  %v1205_v40 = vadd.f32 %v5593_v57, %v1152_v26  ;;  %v4729_v35 = vpop.permute.xlu1 %1387  ;;  %v2149_v13 = vld [vmem:[%s5294_s3 + $0x2c0] sm:$0xff]  ;;  %v2090_v1 = vld [vmem:[%s5294_s3 + $0xe8] sm:$0xff]  ;;  %v2672_v32 = vpack.c.bf16 %v2087_v24, %v2085_v22  ;;  %v2092_v49 = vld [vmem:[%s5294_s3 + $0xf8] sm:$0xff]  ;;  %v1344_v22 = vmul.f32 %v5563_v12, %v3250_v29 }
 0x249   :  { %v4731_v34 = vpop.permute.xlu0 %1799  ;;  %2731 = vmatprep.subr.bf16.mxu0 %v2730_v17  ;;  %v5595_v28 = vld [vmem:[#allocation55_spill] sm:$0xff]  ;;  %v1278_v61 = vadd.f32 %v4368_v3, %v1225_v31  ;;  %v1403_v45 = vadd.f32 %v4594_v47, %v1350_v33  ;;  %v2736_v26 = vpack.c.bf16 %v2151_v58, %v2149_v13  ;;  %v2674_v62 = vpack.c.bf16 %v2092_v49, %v2090_v1  ;;  %v5596_v54 = vld [vmem:[#allocation110_spill] sm:$0xff]  ;;  %v5597_v24 = vld [vmem:[#allocation149_spill] sm:$0xff] }
 0x24a   :  { %v1574_v10 = vmul.f32 %v5595_v28, %v5594_v36  ;;  %v1575_v3 = vmul.f32 %v5595_v28, %v3132_v44  ;;  %v1578_v27 = vmul.f32 %v5595_v28, %v5576_v18  ;;  %v2089_v47 = vld [vmem:[%s5294_s3 + $0xe0] sm:$0xff]  ;;  %v2091_v17 = vld [vmem:[%s5294_s3 + $0xf0] sm:$0xff]  ;;  %v1576_v14 = vmul.f32 %v5595_v28, %v3129_v43  ;;  %v2096_v13 = vld [vmem:[%s5294_s3 + $0x118] sm:$0xff] }
 0x24b   :  { %2669 = vmatpush1.bf16.msra.mxu1 %v2668_v42  ;;  %v1226_v42 = vadd.f32 %v1218_v8, %v1205_v40  ;;  %v1331_v25 = vadd.f32 %v4452_v15, %v1278_v61  ;;  %v2156_v40 = vld [vmem:[%s5294_s3 + $0x2f8] sm:$0xff]  ;;  %v2153_v31 = vld [vmem:[%s5294_s3 + $0x2e0] sm:$0xff]  ;;  %v2676_v56 = vpack.c.bf16 %v2091_v17, %v2089_v47 }
 0x24c   :  { %2733 = vmatpush1.bf16.msra.mxu0 %v2732_v53  ;;  %2671 = vmatprep.subr.bf16.mxu1 %v2670_v37  ;;  %v1635_v5 = vadd.f32 %v5596_v54, %v1574_v10  ;;  %v4765_v60 = vpop.permute.xlu1 %1795  ;;  %v2154_v53 = vld [vmem:[%s5294_s3 + $0x2e8] sm:$0xff]  ;;  %v2155_v37 = vld [vmem:[%s5294_s3 + $0x2f0] sm:$0xff] }
 0x24d   :  { %v1437_v2 = vpop.permute.xlu0 %1436  ;;  %2735 = vmatprep.subr.bf16.mxu0 %v2734_v50  ;;  %v1279_v15 = vadd.f32 %v4409_v4, %v1226_v42  ;;  %v2738_v33 = vpack.c.bf16 %v2156_v40, %v2154_v53  ;;  %v2094_v50 = vld [vmem:[%s5294_s3 + $0x108] sm:$0xff]  ;;  %v2740_v1 = vpack.c.bf16 %v2155_v37, %v2153_v31  ;;  %v1577_v4 = vmul.f32 %v5595_v28, %v3149_v52  ;;  %v2160_v53 = vld [vmem:[%s5294_s3 + $0x318] sm:$0xff] }
 0x24e   :  { %v1456_v57 = vadd.f32 %v1437_v2, %v1403_v45  ;;  %v1688_v0 = vadd.f32 %v5597_v24, %v1635_v5  ;;  %v2678_v10 = vpack.c.bf16 %v2096_v13, %v2094_v50  ;;  %v5598_v8 = vld [vmem:[#allocation82_spill] sm:$0xff]  ;;  %v1345_v45 = vmul.f32 %v5563_v12, %v3061_v19  ;;  %v5599_v5 = vld [vmem:[#allocation115_spill] sm:$0xff]  ;;  %v5600_v2 = vld [vmem:[#allocation121_spill] sm:$0xff] }
 0x24f   :  { %2673 = vmatpush1.bf16.msra.mxu1 %v2672_v32  ;;  %v1332_v61 = vadd.f32 %v4492_v38, %v1279_v15  ;;  %v1701_v32 = vmul.f32 %v5598_v8, %v3132_v44  ;;  %v2158_v38 = vld [vmem:[%s5294_s3 + $0x308] sm:$0xff]  ;;  %v1636_v42 = vadd.f32 %v5599_v5, %v1575_v3  ;;  %v1639_v47 = vadd.f32 %v5600_v2, %v1578_v27  ;;  %v2159_v3 = vld [vmem:[%s5294_s3 + $0x310] sm:$0xff]  ;;  %v2100_v24 = vld [vmem:[%s5294_s3 + $0x138] sm:$0xff] }
 0x250   :  { %v1519_v58 = vrot.slane %v1456_v57, %v4322_v9  ;;  %2737 = vmatpush1.bf16.msra.mxu0 %v2736_v26  ;;  %2675 = vmatprep.subr.bf16.mxu1 %v2674_v62  ;;  %v4804_v49 = vpop.permute.xlu1 %1797  ;;  %v2093_v26 = vld [vmem:[%s5294_s3 + $0x100] sm:$0xff]  ;;  %v2095_v62 = vld [vmem:[%s5294_s3 + $0x110] sm:$0xff]  ;;  %v1705_v12 = vmul.f32 %v5598_v8, %v5585_v48  ;;  %v1352_v17 = vadd.f32 %v1344_v22, %v1331_v25  ;;  %v2098_v22 = vld [vmem:[%s5294_s3 + $0x128] sm:$0xff] }
 0x251   :  { %v1390_v54 = vpop.permute.xlu0 %1389  ;;  %2739 = vmatprep.subr.bf16.mxu0 %v2738_v33  ;;  %v2157_v57 = vld [vmem:[%s5294_s3 + $0x300] sm:$0xff]  ;;  %v1709_v31 = vadd.f32 %v1701_v32, %v1688_v0  ;;  %v2680_v37 = vpack.c.bf16 %v2095_v62, %v2093_v26  ;;  %v2742_v25 = vpack.c.bf16 %v2160_v53, %v2158_v38  ;;  %v2682_v0 = vpack.c.bf16 %v2100_v24, %v2098_v22  ;;  %v2162_v50 = vld [vmem:[%s5294_s3 + $0x328] sm:$0xff]  ;;  %v2164_v13 = vld [vmem:[%s5294_s3 + $0x338] sm:$0xff] }
 0x252   :  { %1520 = vrot.lane.b32.xlu0 %v1519_v58, %s2954_s28  ;;  %v5601_v40 = vld [vmem:[#allocation150_spill] sm:$0xff]  ;;  %v1405_v33 = vadd.f32 %v4729_v35, %v1352_v17  ;;  %v1692_v58 = vadd.f32 %v4341_v63, %v1639_v47  ;;  %v1689_v35 = vadd.f32 %v4343_v30, %v1636_v42  ;;  %v2746_v26 = vpack.c.bf16 %v2164_v13, %v2162_v50  ;;  %v2163_v38 = vld [vmem:[%s5294_s3 + $0x330] sm:$0xff]  ;;  %v2104_v42 = vld [vmem:[%s5294_s3 + $0x158] sm:$0xff]  ;;  %s2958_s28 = smov 120  }
 0x253   :  { %v1637_v27 = vadd.f32 %v5601_v40, %v1576_v14  ;;  %2677 = vmatpush1.bf16.msra.mxu1 %v2676_v56  ;;  %v2097_v15 = vld [vmem:[%s5294_s3 + $0x120] sm:$0xff]  ;;  %v2744_v14 = vpack.c.bf16 %v2159_v3, %v2157_v57  ;;  %v2099_v56 = vld [vmem:[%s5294_s3 + $0x130] sm:$0xff]  ;;  %v2102_v63 = vld [vmem:[%s5294_s3 + $0x148] sm:$0xff]  ;;  %v1638_v2 = vadd.f32 %v4311_v46, %v1577_v4  ;;  %v1762_v47 = vadd.f32 %v4494_v41, %v1709_v31 }
 0x254   :  { %2741 = vmatpush1.bf16.msra.mxu0 %v2740_v1  ;;  %2679 = vmatprep.subr.bf16.mxu1 %v2678_v10  ;;  %v1353_v1 = vadd.f32 %v1345_v45, %v1332_v61  ;;  %v4852_v10 = vpop.permute.xlu1 %1865  ;;  %v2161_v62 = vld [vmem:[%s5294_s3 + $0x320] sm:$0xff]  ;;  %v1702_v61 = vmul.f32 %v5598_v8, %v3129_v43  ;;  %v1703_v45 = vmul.f32 %v5598_v8, %v3149_v52  ;;  %v2103_v4 = vld [vmem:[%s5294_s3 + $0x150] sm:$0xff] }
 0x255   :  { %v1441_v32 = vpop.permute.xlu0 %1440  ;;  %2743 = vmatprep.subr.bf16.mxu0 %v2742_v25  ;;  %v1690_v30 = vadd.f32 %v4387_v11, %v1637_v27  ;;  %v2684_v53 = vpack.c.bf16 %v2099_v56, %v2097_v15  ;;  %v2748_v57 = vpack.c.bf16 %v2163_v38, %v2161_v62  ;;  %v2686_v3 = vpack.c.bf16 %v2104_v42, %v2102_v63  ;;  %v2101_v41 = vld [vmem:[%s5294_s3 + $0x140] sm:$0xff]  ;;  %v5602_v31 = vld [vmem:[#allocation120_spill] sm:$0xff] }
 0x256   :  { %v1458_v5 = vadd.f32 %v1441_v32, %v1405_v33  ;;  %v1406_v17 = vadd.f32 %v1390_v54, %v1353_v1  ;;  %v1691_v40 = vadd.f32 %v4429_v21, %v1638_v2  ;;  %v1713_v27 = vadd.f32 %v1705_v12, %v1692_v58  ;;  %v2166_v21 = vld [vmem:[%s5294_s3 + $0x348] sm:$0xff]  ;;  %v2168_v33 = vld [vmem:[%s5294_s3 + $0x358] sm:$0xff] }
 0x257   :  { %2681 = vmatpush1.bf16.msra.mxu1 %v2680_v37  ;;  %v1710_v25 = vadd.f32 %v1702_v61, %v1689_v35  ;;  %v1704_v22 = vmul.f32 %v5598_v8, %v5576_v18  ;;  %v1711_v54 = vadd.f32 %v1703_v45, %v1690_v30  ;;  %v1815_v12 = vadd.f32 %v4665_v59, %v1762_v47  ;;  %v2106_v58 = vld [vmem:[%s5294_s3 + $0x168] sm:$0xff]  ;;  %v2108_v35 = vld [vmem:[%s5294_s3 + $0x178] sm:$0xff]  ;;  %v2169_v47 = vld [vmem:[%s5294_s3 + $0x360] sm:$0xff] }
 0x258   :  { %v1550_v11 = vrot.slane %v1458_v5, %v4322_v9  ;;  %2745 = vmatpush1.bf16.msra.mxu0 %v2744_v14  ;;  %2683 = vmatprep.subr.bf16.mxu1 %v2682_v0  ;;  %v4877_v24 = vpop.permute.xlu1 %1867  ;;  %v1828_v37 = vmul.f32 %v5602_v31, %v3129_v43  ;;  %v2165_v14 = vld [vmem:[%s5294_s3 + $0x340] sm:$0xff]  ;;  %v2167_v0 = vld [vmem:[%s5294_s3 + $0x350] sm:$0xff]  ;;  %v1766_v59 = vadd.f32 %v4550_v55, %v1713_v27  ;;  %v2172_v2 = vld [vmem:[%s5294_s3 + $0x378] sm:$0xff] }
 0x259   :  { %v1443_v46 = vpop.permute.xlu0 %1442  ;;  %2747 = vmatprep.subr.bf16.mxu0 %v2746_v26  ;;  %v1763_v56 = vadd.f32 %v4552_v39, %v1710_v25  ;;  %v2688_v50 = vpack.c.bf16 %v2103_v4, %v2101_v41  ;;  %v2750_v13 = vpack.c.bf16 %v2168_v33, %v2166_v21  ;;  %v2752_v32 = vpack.c.bf16 %v2167_v0, %v2165_v14  ;;  %v2110_v27 = vld [vmem:[%s5294_s3 + $0x188] sm:$0xff]  ;;  %v2112_v25 = vld [vmem:[%s5294_s3 + $0x198] sm:$0xff]  ;;  %v2173_v0 = vld [vmem:[%s5294_s3 + $0x380] sm:$0xff] }
 0x25a   :  { %v1459_v15 = vadd.f32 %v1443_v46, %v1406_v17  ;;  %1551 = vrot.lane.b32.xlu1 %v1550_v11, %s2955_s11  ;;  %v2690_v26 = vpack.c.bf16 %v2108_v35, %v2106_v58  ;;  %v1764_v55 = vadd.f32 %v4632_v51, %v1711_v54  ;;  %v1712_v62 = vadd.f32 %v1704_v22, %v1691_v40  ;;  %v2171_v17 = vld [vmem:[%s5294_s3 + $0x370] sm:$0xff]  ;;  %v2109_v54 = vld [vmem:[%s5294_s3 + $0x180] sm:$0xff]  ;;  %v2176_v14 = vld [vmem:[%s5294_s3 + $0x398] sm:$0xff] }
 0x25b   :  { %2685 = vmatpush1.bf16.msra.mxu1 %v2684_v53  ;;  %v1816_v39 = vadd.f32 %v4682_v16, %v1763_v56  ;;  %v1819_v30 = vadd.f32 %v4731_v34, %v1766_v59  ;;  %v1836_v61 = vadd.f32 %v1828_v37, %v1815_v12  ;;  %v1829_v42 = vmul.f32 %v5602_v31, %v3149_v52  ;;  %v2105_v16 = vld [vmem:[%s5294_s3 + $0x160] sm:$0xff]  ;;  %v2107_v34 = vld [vmem:[%s5294_s3 + $0x170] sm:$0xff]  ;;  %v2174_v37 = vld [vmem:[%s5294_s3 + $0x388] sm:$0xff] }
 0x25c   :  { %v1563_v1 = vrot.slane %v1459_v15, %v4322_v9  ;;  %2749 = vmatpush1.bf16.msra.mxu0 %v2748_v57  ;;  %2687 = vmatprep.subr.bf16.mxu1 %v2686_v3  ;;  %v1870_v38 = vpop.permute.xlu1 %1869  ;;  %v1765_v45 = vadd.f32 %v4684_v7, %v1712_v62  ;;  %v1817_v5 = vadd.f32 %v4765_v60, %v1764_v55  ;;  %v2170_v7 = vld [vmem:[%s5294_s3 + $0x368] sm:$0xff]  ;;  %v2111_v12 = vld [vmem:[%s5294_s3 + $0x190] sm:$0xff] }
 0x25d   :  { %v1874_v63 = vpop.permute.xlu0 %1873  ;;  %2751 = vmatprep.subr.bf16.mxu0 %v2750_v13  ;;  %v1830_v51 = vmul.f32 %v5602_v31, %v5576_v18  ;;  %v1889_v60 = vadd.f32 %v4852_v10, %v1836_v61  ;;  %v1832_v52 = vmul.f32 %v5602_v31, %v5588_v23  ;;  %v2692_v18 = vpack.c.bf16 %v2107_v34, %v2105_v16  ;;  %v2175_v59 = vld [vmem:[%s5294_s3 + $0x390] sm:$0xff]  ;;  %v2178_v61 = vld [vmem:[%s5294_s3 + $0x3a8] sm:$0xff] }
 0x25e   :  { %1564 = vrot.lane.b32.xlu0 %v1563_v1, %s2956_s21  ;;  %v1818_v10 = vadd.f32 %v4804_v49, %v1765_v45  ;;  %v1837_v53 = vadd.f32 %v1829_v42, %v1816_v39  ;;  %v2754_v3 = vpack.c.bf16 %v2172_v2, %v2170_v7  ;;  %v2756_v40 = vpack.c.bf16 %v2171_v17, %v2169_v47  ;;  %v2114_v1 = vld [vmem:[%s5294_s3 + $0x1a8] sm:$0xff]  ;;  %v2180_v45 = vld [vmem:[%s5294_s3 + $0x3b8] sm:$0xff]  ;;  %v2179_v16 = vld [vmem:[%s5294_s3 + $0x3b0] sm:$0xff] }
 0x25f   :  { %2689 = vmatpush1.bf16.msra.mxu1 %v2688_v50  ;;  %v1840_v22 = vadd.f32 %v1832_v52, %v1819_v30  ;;  %v2694_v41 = vpack.c.bf16 %v2112_v25, %v2110_v27  ;;  %v1838_v21 = vadd.f32 %v1830_v51, %v1817_v5  ;;  %v1831_v49 = vmul.f32 %v5602_v31, %v5585_v48  ;;  %v2115_v30 = vld [vmem:[%s5294_s3 + $0x1b0] sm:$0xff]  ;;  %v2177_v51 = vld [vmem:[%s5294_s3 + $0x3a0] sm:$0xff]  ;;  %v2118_v34 = vld [vmem:[%s5294_s3 + $0x1c8] sm:$0xff] }
 0x260   :  { %2753 = vmatpush1.bf16.msra.mxu0 %v2752_v32  ;;  %2691 = vmatprep.subr.bf16.mxu1 %v2690_v26  ;;  %v1872_v11 = vpop.permute.xlu1 %1871  ;;  %v1890_v4 = vadd.f32 %v4877_v24, %v1837_v53  ;;  %v2696_v33 = vpack.c.bf16 %v2111_v12, %v2109_v54  ;;  %v2758_v58 = vpack.c.bf16 %v2176_v14, %v2174_v37  ;;  %v2116_v32 = vld [vmem:[%s5294_s3 + $0x1b8] sm:$0xff]  ;;  %v2113_v26 = vld [vmem:[%s5294_s3 + $0x1a0] sm:$0xff]  ;;  %v2119_v47 = vld [vmem:[%s5294_s3 + $0x1d0] sm:$0xff] }
 0x261   :  { %v1919_v57 = vpop.permute.xlu0 %1918  ;;  %2755 = vmatprep.subr.bf16.mxu0 %v2754_v3  ;;  %v1893_v15 = vadd.f32 %v1874_v63, %v1840_v22  ;;  %v1839_v56 = vadd.f32 %v1831_v49, %v1818_v10  ;;  %v2760_v35 = vpack.c.bf16 %v2175_v59, %v2173_v0  ;;  %v1891_v55 = vadd.f32 %v1870_v38, %v1838_v21  ;;  %v2117_v2 = vld [vmem:[%s5294_s3 + $0x1c0] sm:$0xff]  ;;  %v2183_v22 = vld [vmem:[%s5294_s3 + $0x3d0] sm:$0xff]  ;;  %v2124_v21 = vld [vmem:[%s5294_s3 + $0x1f8] sm:$0xff] }
 0x262   :  { %v1942_v46 = vadd.f32 %v1919_v57, %v1889_v60  ;;  %v2698_v63 = vpack.c.bf16 %v2116_v32, %v2114_v1  ;;  %v2700_v38 = vpack.c.bf16 %v2115_v30, %v2113_v26  ;;  %v2762_v42 = vpack.c.bf16 %v2180_v45, %v2178_v61  ;;  %v2184_v57 = vld [vmem:[%s5294_s3 + $0x3d8] sm:$0xff]  ;;  %v2181_v3 = vld [vmem:[%s5294_s3 + $0x3c0] sm:$0xff]  ;;  %v2190_v32 = vld [vmem:[%s5294_s3 + $0x408] sm:$0xff] }
 0x263   :  { %2693 = vmatpush1.bf16.msra.mxu1 %v2692_v18  ;;  %v1892_v5 = vadd.f32 %v1872_v11, %v1839_v56  ;;  %v2764_v52 = vpack.c.bf16 %v2179_v16, %v2177_v51  ;;  %v2120_v18 = vld [vmem:[%s5294_s3 + $0x1d8] sm:$0xff]  ;;  %v2182_v11 = vld [vmem:[%s5294_s3 + $0x3c8] sm:$0xff]  ;;  %v2121_v49 = vld [vmem:[%s5294_s3 + $0x1e0] sm:$0xff]  ;;  %v1579_v61 = vmul.f32 %v5595_v28, %v5585_v48  ;;  %v1580_v45 = vmul.f32 %v5595_v28, %v5588_v23 }
 0x264   :  { %v1957_v24 = vrot.slane %v1942_v46, %v4322_v9  ;;  %2757 = vmatpush1.bf16.msra.mxu0 %v2756_v40  ;;  %2695 = vmatprep.subr.bf16.mxu1 %v2694_v41  ;;  %v1927_v50 = vpop.permute.xlu1 %1926  ;;  %v2702_v53 = vpack.c.bf16 %v2120_v18, %v2118_v34  ;;  %v2766_v25 = vpack.c.bf16 %v2184_v57, %v2182_v11  ;;  %v2122_v46 = vld [vmem:[%s5294_s3 + $0x1e8] sm:$0xff]  ;;  %v2192_v26 = vld [vmem:[%s5294_s3 + $0x418] sm:$0xff] }
 0x265   :  { %v1921_v13 = vpop.permute.xlu0 %1920  ;;  %v1946_v39 = vadd.f32 %v1927_v50, %v1893_v15  ;;  %2759 = vmatprep.subr.bf16.mxu0 %v2758_v58  ;;  %v2704_v41 = vpack.c.bf16 %v2119_v47, %v2117_v2  ;;  %v2706_v37 = vpack.c.bf16 %v2124_v21, %v2122_v46  ;;  %v2123_v15 = vld [vmem:[%s5294_s3 + $0x1f0] sm:$0xff]  ;;  %v2185_v50 = vld [vmem:[%s5294_s3 + $0x3e0] sm:$0xff]  ;;  %v1581_v34 = vmul.f32 %v5595_v28, %v5583_v6 }
 0x266   :  { %v1943_v62 = vadd.f32 %v1921_v13, %v1890_v4  ;;  %1958 = vrot.lane.b32.xlu1 %v1957_v24, %s2957_s29  ;;  %s2959_s29 = smov 66   ;;  %v2768_v4 = vpack.c.bf16 %v2183_v22, %v2181_v3  ;;  %v2186_v24 = vld [vmem:[%s5294_s3 + $0x3e8] sm:$0xff]  ;;  %v2708_v56 = vpack.c.bf16 %v2123_v15, %v2121_v49  ;;  %v2187_v13 = vld [vmem:[%s5294_s3 + $0x3f0] sm:$0xff]  ;;  %v1707_v48 = vmul.f32 %v5598_v8, %v5583_v6 }
 0x267   :  { %2697 = vmatpush1.bf16.msra.mxu1 %v2696_v33  ;;  %v2009_v7 = vrot.slane %v1946_v39, %v4322_v9  ;;  %v2188_v33 = vld [vmem:[%s5294_s3 + $0x3f8] sm:$0xff]  ;;  %v2772_v58 = vpack.c.bf16 %v2187_v13, %v2185_v50  ;;  %v1708_v11 = vmul.f32 %v5598_v8, %v3250_v29 }
 0x268   :  { %v1970_v60 = vrot.slane %v1943_v62, %v4322_v9  ;;  %2761 = vmatpush1.bf16.msra.mxu0 %v2760_v35  ;;  %2699 = vmatprep.subr.bf16.mxu1 %v2698_v63  ;;  %v1925_v17 = vpop.permute.xlu1 %1924  ;;  %v2770_v59 = vpack.c.bf16 %v2188_v33, %v2186_v24 }
 0x269   :  { %v1923_v10 = vpop.permute.xlu0 %1922  ;;  %2763 = vmatprep.subr.bf16.mxu0 %v2762_v42  ;;  %v1945_v40 = vadd.f32 %v1925_v17, %v1892_v5 }
 0x26a   :  { %v1944_v27 = vadd.f32 %v1923_v10, %v1891_v55  ;;  %2010 = vrot.lane.b32.xlu1 %v2009_v7, %s2958_s28  ;;  %1971 = vrot.lane.b32.xlu0 %v1970_v60, %s2959_s29  ;;  %v2774_v55 = vpack.c.bf16 %v2192_v26, %v2190_v32  ;;  %s2962_s28 = smov 10   ;;  %v2468_v32 = vld [vmem:[%s5296_s5 + $0x18] sm:$0xff] }
 0x26b   :  { %2701 = vmatpush1.bf16.msra.mxu1 %v2700_v38  ;;  %v1996_v54 = vrot.slane %v1945_v40, %v4322_v9 }
 0x26c   :  { %v1983_v12 = vrot.slane %v1944_v27, %v4322_v9  ;;  %2765 = vmatpush1.bf16.msra.mxu0 %v2764_v52  ;;  %2703 = vmatprep.subr.bf16.mxu1 %v2702_v53  ;;  %v1624_v14 = vpop.permute.xlu1 %1623  ;;  %v1706_v52 = vmul.f32 %v5598_v8, %v5588_v23  ;;  %v1833_v23 = vmul.f32 %v5602_v31, %v5583_v6 }
 0x26d   :  { %v1622_v0 = vpop.permute.xlu0 %1621  ;;  %2767 = vmatprep.subr.bf16.mxu0 %v2766_v25  ;;  %v1641_v51 = vadd.f32 %v1624_v14, %v1580_v45  ;;  %v1834_v8 = vmul.f32 %v5602_v31, %v3250_v29  ;;  %v5604_v29 = vld [vmem:[#allocation16_spill] sm:$0xff]  ;;  %v5605_v45 = vld [vmem:[#allocation18_spill] sm:$0xff] }
 0x26e   :  { %1997 = vrot.lane.b32.xlu1 %v1996_v54, %s2960_s20  ;;  %1984 = vrot.lane.b32.xlu0 %v1983_v12, %s2961_s0  ;;  %v1640_v5 = vadd.f32 %v1622_v0, %v1579_v61  ;;  %v5603_v54 = vld [vmem:[#allocation17_spill] sm:$0xff] }
 0x26f   :  { %2705 = vmatpush1.bf16.msra.mxu1 %v2704_v41  ;;  %v115_v12 = vmul.f32 %v5603_v54, %v5594_v36 }
 0x270   :  { %2769 = vmatpush1.bf16.msra.mxu0 %v2768_v4  ;;  %2707 = vmatprep.subr.bf16.mxu1 %v2706_v37  ;;  %v1675_v35 = vpop.permute.xlu1 %1674  ;;  %v1835_v37 = vmul.f32 %v5602_v31, %v3061_v19  ;;  %v242_v19 = vmul.f32 %v5604_v29, %v3132_v44  ;;  %v2466_v31 = vld [vmem:[%s5296_s5 + $0x8] sm:$0xff]  ;;  %v2189_v29 = vld [vmem:[%s5294_s3 + $0x400] sm:$0xff] }
 0x271   :  { %v1626_v1 = vpop.permute.xlu0 %1625  ;;  %2771 = vmatprep.subr.bf16.mxu0 %v2770_v59  ;;  %v1693_v16 = vadd.f32 %v1675_v35, %v1640_v5  ;;  %v2790_v26 = vpack.c.bf16 %v2468_v32, %v2466_v31  ;;  %v369_v5 = vmul.f32 %v5605_v45, %v3129_v43  ;;  %v2476_v45 = vld [vmem:[%s5296_s5 + $0x58] sm:$0xff] }
 0x272   :  { %v1642_v7 = vadd.f32 %v1626_v1, %v1581_v34 }
 0x273   :  { %2709 = vmatpush1.bf16.msra.mxu1 %v2708_v56  ;;  %v1714_v17 = vadd.f32 %v1706_v52, %v1693_v16 }
 0x274   :  { %2773 = vmatpush1.bf16.msra.mxu0 %v2772_v58  ;;  %v1679_v39 = vpop.permute.xlu1 %1678  ;;  %2791 = vmatprep.subr.bf16.mxu1 %v2790_v26  ;;  %v2194_v26 = vld [vmem:[%s5294_s3 + $0x428] sm:$0xff] }
 0x275   :  { %v1677_v62 = vpop.permute.xlu0 %1676  ;;  %2775 = vmatprep.subr.bf16.mxu0 %v2774_v55  ;;  %v1695_v47 = vadd.f32 %v1679_v39, %v1642_v7 }
 0x276   :  { %v1694_v60 = vadd.f32 %v1677_v62, %v1641_v51 }
 0x277   :  { %v1716_v40 = vadd.f32 %v1708_v11, %v1695_v47 }
 0x278   :  { %v1751_v63 = vpop.permute.xlu1 %1750  ;;  %v1715_v10 = vadd.f32 %v1707_v48, %v1694_v60 }
 0x279   :  { %v1749_v30 = vpop.permute.xlu0 %1748 }
 0x27a   :  { %v1767_v53 = vadd.f32 %v1749_v30, %v1714_v17  ;;  %v1768_v27 = vadd.f32 %v1751_v63, %v1715_v10 }
 0x27c   :  { %v1802_v38 = vpop.permute.xlu1 %1801 }
 0x27d   :  { %v1753_v42 = vpop.permute.xlu0 %1752  ;;  %v1820_v28 = vadd.f32 %v1802_v38, %v1767_v53 }
 0x27e   :  { %v1769_v25 = vadd.f32 %v1753_v42, %v1716_v40 }
 0x27f   :  { %v1841_v21 = vadd.f32 %v1833_v23, %v1820_v28 }
 0x280   :  { %v1806_v18 = vpop.permute.xlu1 %1805 }
 0x281   :  { %v1804_v2 = vpop.permute.xlu0 %1803  ;;  %v1822_v41 = vadd.f32 %v1806_v18, %v1769_v25 }
 0x282   :  { %v1821_v4 = vadd.f32 %v1804_v2, %v1768_v27 }
 0x283   :  { %v1843_v0 = vadd.f32 %v1835_v37, %v1822_v41 }
 0x284   :  { %v1876_v57 = vpop.permute.xlu1 %1875  ;;  %v1842_v14 = vadd.f32 %v1834_v8, %v1821_v4 }
 0x285   :  { %v153_v3 = vpop.permute.xlu0 %152  ;;  %v1894_v49 = vadd.f32 %v1876_v57, %v1841_v21 }
 0x286   :  { %v176_v33 = vadd.f32 %v153_v3, %v115_v12 }
 0x288   :  { %v206_v22 = vpop.permute.xlu1 %205 }
 0x289   :  { %v1878_v46 = vpop.permute.xlu0 %1877  ;;  %v229_v59 = vadd.f32 %v206_v22, %v176_v33 }
 0x28a   :  { %v1895_v56 = vadd.f32 %v1878_v46, %v1842_v14 }
 0x28b   :  { %v250_v62 = vadd.f32 %v242_v19, %v229_v59  ;;  %v2191_v19 = vld [vmem:[%s5294_s3 + $0x410] sm:$0xff] }
 0x28c   :  { %v1929_v15 = vpop.permute.xlu1 %1928 }
 0x28d   :  { %v1880_v24 = vpop.permute.xlu0 %1879  ;;  %v1947_v6 = vadd.f32 %v1929_v15, %v1894_v49 }
 0x28e   :  { %v1896_v13 = vadd.f32 %v1880_v24, %v1843_v0 }
 0x28f   :  { %v2027_v50 = vrot.slane %v1947_v6, %v4322_v9 }
 0x290   :  { %v1933_v58 = vpop.permute.xlu1 %1932 }
 0x291   :  { %v1931_v35 = vpop.permute.xlu0 %1930  ;;  %v1949_v36 = vadd.f32 %v1933_v58, %v1896_v13  ;;  %2028 = vrot.lane.b32.xlu0 %v2027_v50, %s2962_s28  ;;  %v2465_v50 = vld [vmem:[%s5296_s5] sm:$0xff]  ;;  %v2467_v13 = vld [vmem:[%s5296_s5 + $0x10] sm:$0xff] }
 0x292   :  { %v1948_v1 = vadd.f32 %v1931_v35, %v1895_v56 }
 0x293   :  { %v2053_v55 = vrot.slane %v1949_v36, %v4322_v9  ;;  %v2470_v36 = vld [vmem:[%s5296_s5 + $0x28] sm:$0xff] }
 0x294   :  { %v2040_v39 = vrot.slane %v1948_v1, %v4322_v9  ;;  %v333_v63 = vpop.permute.xlu1 %332  ;;  %v2472_v1 = vld [vmem:[%s5296_s5 + $0x38] sm:$0xff] }
 0x295   :  { %v280_v30 = vpop.permute.xlu0 %279  ;;  %2054 = vrot.lane.b32.xlu0 %v2053_v55, %s2963_s2  ;;  %v2196_v55 = vld [vmem:[%s5294_s3 + $0x438] sm:$0xff] }
 0x296   :  { %v303_v61 = vadd.f32 %v280_v30, %v250_v62  ;;  %2041 = vrot.lane.b32.xlu1 %v2040_v39, %s2964_s10  ;;  %v2792_v39 = vpack.c.bf16 %v2467_v13, %v2465_v50  ;;  %v2794_v62 = vpack.c.bf16 %v2472_v1, %v2470_v36  ;;  %v2471_v30 = vld [vmem:[%s5296_s5 + $0x30] sm:$0xff]  ;;  %v2490_v50 = vld [vmem:[%s5296_s5 + $0xc8] sm:$0xff]  ;;  %v2492_v13 = vld [vmem:[%s5296_s5 + $0xd8] sm:$0xff] }
 0x297   :  { %v2489_v36 = vld [vmem:[%s5296_s5 + $0xc0] sm:$0xff]  ;;  %v2491_v1 = vld [vmem:[%s5296_s5 + $0xd0] sm:$0xff] }
 0x298   :  { %v356_v44 = vadd.f32 %v333_v63, %v303_v61  ;;  %v460_v38 = vpop.permute.xlu1 %459  ;;  %v2469_v63 = vld [vmem:[%s5296_s5 + $0x20] sm:$0xff]  ;;  %v2776_v61 = vpack.c.bf16 %v2191_v19, %v2189_v29  ;;  %v2494_v29 = vld [vmem:[%s5296_s5 + $0xe8] sm:$0xff]  ;;  %v2496_v19 = vld [vmem:[%s5296_s5 + $0xf8] sm:$0xff] }
 0x299   :  { %v407_v42 = vpop.permute.xlu0 %406 }
 0x29a   :  { %v377_v51 = vadd.f32 %v369_v5, %v356_v44  ;;  %v2474_v44 = vld [vmem:[%s5296_s5 + $0x48] sm:$0xff]  ;;  %v2778_v5 = vpack.c.bf16 %v2196_v55, %v2194_v26  ;;  %v2493_v26 = vld [vmem:[%s5296_s5 + $0xe0] sm:$0xff]  ;;  %v2495_v55 = vld [vmem:[%s5296_s5 + $0xf0] sm:$0xff] }
 0x29c   :  { %v430_v16 = vadd.f32 %v407_v42, %v377_v51  ;;  %v515_v34 = vpop.permute.xlu1 %514  ;;  %v2195_v42 = vld [vmem:[%s5294_s3 + $0x430] sm:$0xff]  ;;  %v2198_v51 = vld [vmem:[%s5294_s3 + $0x448] sm:$0xff] }
 0x29d   :  { %v502_v7 = vpop.permute.xlu0 %501 }
 0x29e   :  { %v483_v60 = vadd.f32 %v460_v38, %v430_v16  ;;  %v2193_v38 = vld [vmem:[%s5294_s3 + $0x420] sm:$0xff]  ;;  %v2200_v16 = vld [vmem:[%s5294_s3 + $0x458] sm:$0xff] }
 0x2a0   :  { %492 = vst.msk [vmem:[#allocation2] sm:$0x3] %vm491_vm0, %v483_v60  ;;  %v541_v52 = vpop.permute.xlu1 %540  ;;  %vm1063_vm0 = vcmask 109570   ;;  %v2780_v60 = vpack.c.bf16 %v2195_v42, %v2193_v38  ;;  %v2501_v42 = vld [vmem:[%s5296_s5 + $0x120] sm:$0xff] }
 0x2a1   :  { %505 = vst.msk [vmem:[#allocation2] sm:$0x3] %vm504_vm1, %v502_v7  ;;  %v528_v18 = vpop.permute.xlu0 %527  ;;  %vm1033_vm1 = vcmask 861888   ;;  %v2798_v7 = vpack.c.bf16 %v2476_v45, %v2474_v44  ;;  %v2502_v44 = vld [vmem:[%s5296_s5 + $0x128] sm:$0xff]  ;;  %v2504_v45 = vld [vmem:[%s5296_s5 + $0x138] sm:$0xff] }
 0x2a2   :  { %518 = vst.msk [vmem:[#allocation2] sm:$0x3] %vm517_vm2, %v515_v34  ;;  %vm1059_vm2 = vcmask 1014784   ;;  %v2796_v34 = vpack.c.bf16 %v2471_v30, %v2469_v63  ;;  %v2820_v63 = vpack.c.bf16 %v2495_v55, %v2493_v26  ;;  %v2826_v38 = vpack.c.bf16 %v2504_v45, %v2502_v44 }
 0x2a3   :  { %531 = vst.msk [vmem:[#allocation2] sm:$0x3] %vm530_vm3, %v528_v18  ;;  %vm1046_vm3 = vcmask 1009488   ;;  %v2782_v18 = vpack.c.bf16 %v2200_v16, %v2198_v51  ;;  %v2503_v51 = vld [vmem:[%s5296_s5 + $0x130] sm:$0xff]  ;;  %v2506_v16 = vld [vmem:[%s5296_s5 + $0x148] sm:$0xff] }
 0x2a4   :  { %544 = vst.msk [vmem:[#allocation2] sm:$0x3] %vm543_vm4, %v541_v52  ;;  %v554_v43 = vpop.permute.xlu1 %553  ;;  %vm1064_vm4 = vmor %vm1063_vm0, %vm1062_vm15  ;;  %vm1554_vm15 = vcmask 238688   ;;  %vm1567_vm0 = vcmask 386288   ;;  %v2965_v52 = vmov 0.0  }
 0x2a5   :  { %v580_v2 = vpop.permute.xlu0 %579  ;;  %557 = vst.msk [vmem:[#allocation2] sm:$0x3] %vm556_vm5, %v554_v43  ;;  %vm1077_vm5 = vcmask 255088   ;;  %v2197_v43 = vld [vmem:[%s5294_s3 + $0x440] sm:$0xff] }
 0x2a6   :  { %v581_v47 = vrot.slane %v580_v2, 6 }
 0x2a8   :  { %v979_v48 = vpop.permute.xlu1 %978  ;;  %v583_v10 = vsel %vm582_vm8, %v581_v47, %v580_v2  ;;  %vm1497_vm8 = vcmask 697888   ;;  %v2199_v2 = vld [vmem:[%s5294_s3 + $0x450] sm:$0xff]  ;;  %v2202_v47 = vld [vmem:[%s5294_s3 + $0x468] sm:$0xff] }
 0x2a9   :  { %v567_v17 = vpop.permute.xlu0 %566 }
 0x2aa   :  { %570 = vst.msk [vmem:[#allocation2] sm:$0x3] %vm569_vm9, %v567_v17  ;;  %vm1510_vm9 = vcmask 845488   ;;  %v2784_v17 = vpack.c.bf16 %v2199_v2, %v2197_v43  ;;  %v2510_v2 = vld [vmem:[%s5296_s5 + $0x168] sm:$0xff] }
 0x2ab   :  { %588 = vst.msk [vmem:[#allocation2] sm:$0xf] %vm587_vm10, %v583_v10  ;;  %vm1539_vm10 = vcmask 1042384  }
 0x2ac   :  { %982 = vst.msk [vmem:[#allocation2 + $0x2] sm:$0x3] %vm981_vm11, %v979_v48  ;;  %v1005_v53 = vpop.permute.xlu1 %1004  ;;  %vm1540_vm11 = vcmask 93186   ;;  %v2204_v48 = vld [vmem:[%s5294_s3 + $0x478] sm:$0xff] }
 0x2ad   :  { %v992_v11 = vpop.permute.xlu0 %991  ;;  %v2786_v10 = vpack.c.bf16 %v2204_v48, %v2202_v47  ;;  %v2512_v47 = vld [vmem:[%s5296_s5 + $0x178] sm:$0xff]  ;;  %v2509_v48 = vld [vmem:[%s5296_s5 + $0x160] sm:$0xff] }
 0x2ae   :  { %995 = vst.msk [vmem:[#allocation2 + $0x2] sm:$0x3] %vm994_vm12, %v992_v11  ;;  %vm1536_vm12 = vcmask 998400   ;;  %v2203_v11 = vld [vmem:[%s5294_s3 + $0x470] sm:$0xff] }
 0x2af   :  { %1008 = vst.msk [vmem:[#allocation2 + $0x2] sm:$0x3] %vm1007_vm13, %v1005_v53  ;;  %vm1523_vm13 = vcmask 993088   ;;  %v2201_v53 = vld [vmem:[%s5294_s3 + $0x460] sm:$0xff] }
 0x2b0   :  { %v1057_v57 = vpop.permute.xlu1 %1056 }
 0x2b1   :  { %v1018_v3 = vpop.permute.xlu0 %1017  ;;  %v1058_v28 = vrot.slane %v1057_v57, 6 }
 0x2b2   :  { %1021 = vst.msk [vmem:[#allocation2 + $0x2] sm:$0x3] %vm1020_vm14, %v1018_v3  ;;  %vm1541_vm14 = vmor %vm1540_vm11, %vm1539_vm10  ;;  %vm2044_vm10 = vcmask 369888   ;;  %vm2057_vm11 = vcmask 517488  }
 0x2b3   :  { %v1060_v25 = vsel %vm1059_vm2, %v1058_v28, %v1057_v57  ;;  %vm1974_vm2 = vcmask 681488   ;;  %v2788_v57 = vpack.c.bf16 %v2203_v11, %v2201_v53  ;;  %v2514_v11 = vld [vmem:[%s5296_s5 + $0x188] sm:$0xff] }
 0x2b4   :  { %v1044_v40 = vpop.permute.xlu1 %1043 }
 0x2b5   :  { %v1031_v27 = vpop.permute.xlu0 %1030 }
 0x2b6   :  { %1034 = vst.msk [vmem:[#allocation2 + $0x2] sm:$0x3] %vm1033_vm1, %v1031_v27  ;;  %vm1961_vm1 = vcmask 533888  }
 0x2b7   :  { %1047 = vst.msk [vmem:[#allocation2 + $0x2] sm:$0x3] %vm1046_vm3, %v1044_v40  ;;  %vm2016_vm3 = vcmask 1042368  }
 0x2b8   :  { %1065 = vst.msk [vmem:[#allocation2 + $0x2] sm:$0xf] %vm1064_vm4, %v1060_v25  ;;  %v1469_v23 = vpop.permute.xlu1 %1468  ;;  %vm2017_vm4 = vcmask 76802   ;;  %v2473_v25 = vld [vmem:[%s5296_s5 + $0x40] sm:$0xff] }
 0x2b9   :  { %v1075_v22 = vpop.permute.xlu0 %1074 }
 0x2ba   :  { %1078 = vst.msk [vmem:[#allocation2 + $0x4] sm:$0x3] %vm1077_vm5, %v1075_v22  ;;  %vm1987_vm5 = vcmask 829088  }
 0x2bb   :  { %1472 = vst.msk [vmem:[#allocation2 + $0x4] sm:$0x3] %vm1471_vm6, %v1469_v23  ;;  %vm2013_vm6 = vcmask 982016   ;;  %v2475_v23 = vld [vmem:[%s5296_s5 + $0x50] sm:$0xff] }
 0x2bc   :  { %v1495_v46 = vpop.permute.xlu1 %1494  ;;  %v2800_v22 = vpack.c.bf16 %v2475_v23, %v2473_v25  ;;  %v2213_v25 = vsub.s32 1, %v4280_v20 }
 0x2bd   :  { %v1482_v41 = vpop.permute.xlu0 %1481 }
 0x2be   :  { %1485 = vst.msk [vmem:[#allocation2 + $0x4] sm:$0x3] %vm1484_vm7, %v1482_v41  ;;  %vm2000_vm7 = vcmask 976688   ;;  %v2480_v41 = vld [vmem:[%s5296_s5 + $0x78] sm:$0xff] }
 0x2bf   :  { %1498 = vst.msk [vmem:[#allocation2 + $0x4] sm:$0x3] %vm1497_vm8, %v1495_v46  ;;  %vm2018_vm8 = vmor %vm2017_vm4, %vm2016_vm3  ;;  %v2478_v46 = vld [vmem:[%s5296_s5 + $0x68] sm:$0xff] }
 0x2c0   :  { %v1508_v4 = vpop.permute.xlu1 %1507 }
 0x2c1   :  { %v1534_v21 = vpop.permute.xlu0 %1533  ;;  %1511 = vst.msk [vmem:[#allocation2 + $0x4] sm:$0x3] %vm1510_vm9, %v1508_v4  ;;  %vm2031_vm9 = vcmask 222288   ;;  %v2477_v4 = vld [vmem:[%s5296_s5 + $0x60] sm:$0xff] }
 0x2c2   :  { %v1535_v49 = vrot.slane %v1534_v21, 6 }
 0x2c4   :  { %v1537_v12 = vsel %vm1536_vm12, %v1535_v49, %v1534_v21  ;;  %vm2247_vm12 = vcmask 523264   ;;  %v2802_v21 = vpack.c.bf16 %v2480_v41, %v2478_v46  ;;  %v2479_v49 = vld [vmem:[%s5296_s5 + $0x70] sm:$0xff] }
 0x2c5   :  { %v1521_v54 = vpop.permute.xlu0 %1520 }
 0x2c6   :  { %1524 = vst.msk [vmem:[#allocation2 + $0x4] sm:$0x3] %vm1523_vm13, %v1521_v54  ;;  %v2482_v54 = vld [vmem:[%s5296_s5 + $0x88] sm:$0xff]  ;;  %vm2527_vm13 = vcmask 588800  }
 0x2c7   :  { %1542 = vst.msk [vmem:[#allocation2 + $0x4] sm:$0xf] %vm1541_vm14, %v1537_v12  ;;  %v2484_v12 = vld [vmem:[%s5296_s5 + $0x98] sm:$0xff] }
 0x2cc   :  { %v1552_v8 = vpop.permute.xlu1 %1551 }
 0x2cd   :  { %1555 = vst.msk [vmem:[#allocation2 + $0x6] sm:$0x3] %vm1554_vm15, %v1552_v8  ;;  %v2804_v8 = vpack.c.bf16 %v2479_v49, %v2477_v4 }
 0x2d0   :  { %v1565_v37 = vpop.permute.xlu0 %1564 }
 0x2d1   :  { %1568 = vst.msk [vmem:[#allocation2 + $0x6] sm:$0x3] %vm1567_vm0, %v1565_v37  ;;  %v2806_v37 = vpack.c.bf16 %v2484_v12, %v2482_v54 }
 0x2d8   :  { %v1959_v15 = vpop.permute.xlu1 %1958 }
 0x2d9   :  { %1962 = vst.msk [vmem:[#allocation2 + $0x6] sm:$0x3] %vm1961_vm1, %v1959_v15  ;;  %v2481_v15 = vld [vmem:[%s5296_s5 + $0x80] sm:$0xff] }
 0x2dc   :  { %v2011_v24 = vpop.permute.xlu1 %2010  ;;  %v1972_v33 = vpop.permute.xlu0 %1971 }
 0x2dd   :  { %1975 = vst.msk [vmem:[#allocation2 + $0x6] sm:$0x3] %vm1974_vm2, %v1972_v33  ;;  %v2012_v14 = vrot.slane %v2011_v24, 6  ;;  %v2486_v33 = vld [vmem:[%s5296_s5 + $0xa8] sm:$0xff] }
 0x2df   :  { %v2014_v59 = vsel %vm2013_vm6, %v2012_v14, %v2011_v24  ;;  %v2483_v24 = vld [vmem:[%s5296_s5 + $0x90] sm:$0xff]  ;;  %v2488_v14 = vld [vmem:[%s5296_s5 + $0xb8] sm:$0xff] }
 0x2e0   :  { %v1998_v6 = vpop.permute.xlu1 %1997  ;;  %v1985_v0 = vpop.permute.xlu0 %1984 }
 0x2e1   :  { %1988 = vst.msk [vmem:[#allocation2 + $0x6] sm:$0x3] %vm1987_vm5, %v1985_v0  ;;  %v2810_v0 = vpack.c.bf16 %v2488_v14, %v2486_v33 }
 0x2e2   :  { %2001 = vst.msk [vmem:[#allocation2 + $0x6] sm:$0x3] %vm2000_vm7, %v1998_v6  ;;  %v2808_v6 = vpack.c.bf16 %v2483_v24, %v2481_v15 }
 0x2e3   :  { %2019 = vst.msk [vmem:[#allocation2 + $0x6] sm:$0xf] %vm2018_vm8, %v2014_v59  ;;  %v2485_v59 = vld [vmem:[%s5296_s5 + $0xa0] sm:$0xff] }
 0x2ea   :  { %v2059_v56 = vld [vmem:[#allocation2] sm:$0xff] }
 0x2eb   :  { %v2226_v58 = vrot.slane %v2059_v56, %v4322_v9  ;;  %v2219_v35 = vcombine.high %v2059_v56, %v2059_v56  ;;  %v2487_v56 = vld [vmem:[%s5296_s5 + $0xb0] sm:$0xff] }
 0x2ed   :  { %v2234_v31 = vcombine.high %v2226_v58, %v2226_v58  ;;  %v2233_v32 = vrot.slane %v2219_v35, %v4322_v9  ;;  %v2814_v35 = vpack.c.bf16 %v2492_v13, %v2490_v50 }
 0x2ef   :  { %2314 = vmatprep.mubr.f32.mxu1 %v2234_v31  ;;  %v2235_v9 = vcombine.high %v2233_v32, %v2233_v32  ;;  %v2816_v31 = vpack.c.bf16 %v2491_v1, %v2489_v36 }
 0x2f0   :  { %2315 = vmatmul.mubr.f32.vlgmr.msra.gmra.mrb[0].mxu1 %v2226_v58  ;;  %v2812_v58 = vpack.c.bf16 %v2487_v56, %v2485_v59 }
 0x2f1   :  { %2385 = vmatprep.mubr.f32.mxu0 %v2235_v9  ;;  %2793 = vmatpush1.bf16.msra.mxu1 %v2792_v39  ;;  %v2498_v39 = vld [vmem:[%s5296_s5 + $0x108] sm:$0xff]  ;;  %v2497_v9 = vld [vmem:[%s5296_s5 + $0x100] sm:$0xff] }
 0x2f2   :  { %2386 = vmatmul.mubr.f32.vlgmr.msra.gmra.mrb[0].mxu0 %v2233_v32  ;;  %2795 = vmatprep.subr.bf16.mxu1 %v2794_v62  ;;  %v2818_v32 = vpack.c.bf16 %v2496_v19, %v2494_v29  ;;  %v2500_v62 = vld [vmem:[%s5296_s5 + $0x118] sm:$0xff] }
 0x2f3   :  { %2777 = vmatpush1.bf16.msra.mxu0 %v2776_v61  ;;  %2456 = vmatprep.mubr.f32.mxu0 %v2965_v52  ;;  %v2822_v30 = vpack.c.bf16 %v2500_v62, %v2498_v39  ;;  %v2499_v61 = vld [vmem:[%s5296_s5 + $0x110] sm:$0xff]  ;;  %v2505_v52 = vld [vmem:[%s5296_s5 + $0x140] sm:$0xff] }
 0x2f4   :  { %2779 = vmatprep.subr.bf16.mxu0 %v2778_v5  ;;  %v2824_v5 = vpack.c.bf16 %v2499_v61, %v2497_v9 }
 0x2f5   :  { %2797 = vmatpush1.bf16.msra.mxu1 %v2796_v34  ;;  %v2508_v34 = vld [vmem:[%s5296_s5 + $0x158] sm:$0xff] }
 0x2f6   :  { %2799 = vmatprep.subr.bf16.mxu1 %v2798_v7  ;;  %v2828_v7 = vpack.c.bf16 %v2503_v51, %v2501_v42 }
 0x2f7   :  { %2781 = vmatpush1.bf16.msra.mxu0 %v2780_v60  ;;  %v2830_v60 = vpack.c.bf16 %v2508_v34, %v2506_v16 }
 0x2f8   :  { %2783 = vmatprep.subr.bf16.mxu0 %v2782_v18  ;;  %v2507_v18 = vld [vmem:[%s5296_s5 + $0x150] sm:$0xff] }
 0x2f9   :  { %2801 = vmatpush1.bf16.msra.mxu1 %v2800_v22  ;;  %v2832_v43 = vpack.c.bf16 %v2507_v18, %v2505_v52 }
 0x2fa   :  { %2803 = vmatprep.subr.bf16.mxu1 %v2802_v21 }
 0x2fb   :  { %2785 = vmatpush1.bf16.msra.mxu0 %v2784_v17  ;;  %v2834_v17 = vpack.c.bf16 %v2512_v47, %v2510_v2 }
 0x2fc   :  { %2787 = vmatprep.subr.bf16.mxu0 %v2786_v10  ;;  %v2511_v10 = vld [vmem:[%s5296_s5 + $0x170] sm:$0xff] }
 0x2fd   :  { %2805 = vmatpush1.bf16.msra.mxu1 %v2804_v8  ;;  %v2836_v53 = vpack.c.bf16 %v2511_v10, %v2509_v48 }
 0x2fe   :  { %2807 = vmatprep.subr.bf16.mxu1 %v2806_v37  ;;  %v2515_v37 = vld [vmem:[%s5297_s6] sm:$0x3] }
 0x2ff   :  { %2789 = vmatpush1.bf16.msra.mxu0 %v2788_v57  ;;  %v2513_v57 = vld [vmem:[%s5296_s5 + $0x180] sm:$0xff]  ;;  %v2524_v24 = vrot.slane %v2515_v37, %v2213_v25 }
 0x301   :  { %2809 = vmatpush1.bf16.msra.mxu1 %v2808_v6 }
 0x302   :  { %2811 = vmatprep.subr.bf16.mxu1 %v2810_v0 }
 0x303   :  { %v2029_v3 = vpop.permute.xlu0 %2028 }
 0x304   :  { %2032 = vst.msk [vmem:[#allocation2 + $0x8] sm:$0x3] %vm2031_vm9, %v2029_v3 }
 0x305   :  { %2813 = vmatpush1.bf16.msra.mxu1 %v2812_v58 }
 0x306   :  { %2815 = vmatprep.subr.bf16.mxu1 %v2814_v35 }
 0x307   :  { %v2055_v40 = vpop.permute.xlu0 %2054 }
 0x308   :  { %v2042_v28 = vpop.permute.xlu1 %2041 }
 0x309   :  { %2045 = vst.msk [vmem:[#allocation2 + $0x8] sm:$0x3] %vm2044_vm10, %v2042_v28  ;;  %2817 = vmatpush1.bf16.msra.mxu1 %v2816_v31 }
 0x30a   :  { %2058 = vst.msk [vmem:[#allocation2 + $0x8] sm:$0x3] %vm2057_vm11, %v2055_v40  ;;  %2819 = vmatprep.subr.bf16.mxu1 %v2818_v32  ;;  %v2209_v40 = vsub.s32 0, %v4280_v20 }
 0x30c   :  { %v2520_v15 = vrot.slane %v2515_v37, %v2209_v40 }
 0x30d   :  { %2821 = vmatpush1.bf16.msra.mxu1 %v2820_v63 }
 0x30e   :  { %2823 = vmatprep.subr.bf16.mxu1 %v2822_v30 }
 0x311   :  { %v2642_v27 = vld.sshfl [vmem:[#allocation2 + $0x8] sm:$0x3 pattern:$0x76325410]  ;;  %2825 = vmatpush1.bf16.msra.mxu1 %v2824_v5 }
 0x312   :  { %2643 = vmatmul.mubr.msk.f32.vlgmr.msra.gmra.mrb[0].mxu0 %vm2247_vm12, %v2642_v27  ;;  %2827 = vmatprep.subr.bf16.mxu1 %v2826_v38  ;;  %v2205_v27 = vld [vmem:[%s5295_s4] sm:$0x3]  ;;  %s2966_s4 = smov [#allocation6]  }
 0x313   :  { %v2210_v23 = vrot.slane %v2205_v27, %v2209_v40  ;;  %v2214_v22 = vrot.slane %v2205_v27, %v2213_v25  ;;  %s2632_s6 = sshll.u32 %s2966_s4, 4  ;;  %s2633_s6 = int_to_ptr.vmem [resolvable:$true] %s2632_s6 }
 0x314   :  { %s2904_s3 = scalar_lea.vmem %s2633_s6, 64  ;;  %p2909_p6 = scmp.lt.s32.totalorder %s2633_s6, %s2633_s6 }
 0x315   :  { %2829 = vmatpush1.bf16.msra.mxu1 %v2828_v7  ;;  %p2905_p5 = scmp.ne.s32.totalorder %s2633_s6, %s2904_s3  ;;  %p2910_p7 = scmp.lt.s32.totalorder %s2904_s3, %s2904_s3 }
 0x316   :  { %2831 = vmatprep.subr.bf16.mxu1 %v2830_v60 }
 0x317   :  { %p2911_p8 = por %p2910_p7, %p2909_p6 }
 0x319   :  { %2833 = vmatpush1.bf16.msra.mxu1 %v2832_v43  ;;  %p2912_p9 = pnand %p2911_p8, %p2905_p5 }
 0x31a   :  { %2835 = vmatprep.subr.bf16.mxu1 %v2834_v17 }
 0x31d   :  { %2837 = vmatpush1.bf16.msra.mxu1 %v2836_v53 }
 0x31e   :  { %2579 = vmatprep.subr.mxu1 %v2514_v11 }
 0x321   :  { %2580 = vmatpush1.msra.mxu1 %v2513_v57 }
 0x3c3   :  { %v2316_v3 = vpop.f32.mrb[0].mxu1 }
 0x3c4   :  { %v2318_v28 = vpop.f32.mrb[1].mxu1  ;;  %v2317_v46 = vadd.f32 %v2316_v3, %v2210_v23 }
 0x3c5   :  { %v2319_v41 = vadd.f32 %v2318_v28, %v2214_v22 }
 0x3e5   :  { %v2458_v4 = vpop.f32.mrb[0].mxu0 }
 0x3e6   :  { %v2839_v21 = vadd.f32 %v2458_v4, %v2317_v46  ;;  %v2460_v49 = vpop.f32.mrb[1].mxu0 }
 0x3e7   :  { %v2841_v54 = vadd.f32 %v2460_v49, %v2319_v41 }
 0x3e8   :  { %v2463_v8 = vmax.f32 %v2839_v21, 0.0 }
 0x3e9   :  { %v2464_v12 = vmax.f32 %v2841_v54, 0.0 }
 0x3eb   :  { %2644 = vmatprep.mubr.msk.f32.mxu1 %vm2527_vm13, %v2464_v12 }
 0x3ec   :  { %2596 = vmatmul.mubr.f32.vlgmr.msra.gmra.mrb[2].mxu1 %v2463_v8 }
 0x4bf   :  { %v2597_v20 = vpop.f32.mrb[2].mxu1 }
 0x4c0   :  { %v2598_v33 = vadd.f32 %v2597_v20, %v2520_v15  ;;  %v2599_v14 = vpop.f32.mrb[3].mxu1 }
 0x4c1   :  { %v2600_v6 = vadd.f32 %v2599_v14, %v2524_v24 }
 0x4c2   :  { %v2602_v0 = vsub.f32 0.0, %v2598_v33 }
 0x4c3   :  { %v2603_v59 = vsub.f32 0.0, %v2600_v6 }
 0x4c4   :  { %v2604_v56 = vmul.f32 1.442695, %v2602_v0 }
 0x4c5   :  { %v2606_v50 = vmul.f32 1.442695, %v2603_v59 }
 0x4c6   :  { %2884 = vpow2.f32 %v2604_v56 }
 0x4c7   :  { %2886 = vpow2.f32 %v2606_v50 }
 0x4d0   :  { %v2885_v13 = vpop.eup %2884 }
 0x4d1   :  { %v2887_v58 = vpop.eup %2886  ;;  %v2608_v35 = vadd.f32 1.0, %v2885_v13 }
 0x4d2   :  { %v2609_v36 = vadd.f32 1.0, %v2887_v58 }
 0x4d3   :  { %2888 = vrcp.f32 %v2608_v35 }
 0x4d4   :  { %2890 = vrcp.f32 %v2609_v36 }
 0x4dd   :  { %v2889_v1 = vpop.eup %2888 }
 0x4de   :  { %v2891_v29 = vpop.eup %2890 }
 0x4df   :  { %v2616_v19 = vcombine.low %v2889_v1, %v2891_v29 }
 0x4e1   :  { %2645 = vst.sshfl [vmem:[#allocation6] sm:$0x33 pattern:$0x76325410] %v2616_v19 }
 0x4e2   :  { %2915 = shalt.err (!%p2912_p9)
}
 0x4e3   :  { %s2916_s8 = scalar_lea.hbm %s5298_s7, 64 }
 0x4e4   :  { %p2917_p10 = scmp.ne.s32.totalorder %s5298_s7, %s2916_s8  ;;  %p2920_p11 = scmp.lt.u32.totalorder %s2916_s8, %s5298_s7 }
 0x4e6   :  { %p2922_p12 = pnand %p2920_p11, %p2917_p10 }
 0x4e8   :  { %2925 = shalt.err (!%p2922_p12)
}
 0x4e9   :  { %2635 = dma.vmem_to_hbm [thread:$0]  %s2633_s6, 64, %s5298_s7, [#allocation4]  }
 0x4ea   :  { %2928 = dma.done.wait [#allocation4], 64  }
 0x4eb   :  { %2929 = vsyncadd [#allocation4], 4294967232 }
 0x4ec   :  { %2639 = vsyncpa [#allocation4], 1 }
 0x4ed   :  { %2640 = vsyncpa [#allocation5], 1 }

</bundles_post_ra>
